<compile_context>
chip_gen: v6e
topology: v6e:2x2x1
jax: 0.10.0
libtpu: 0.0.40
codegen_flags: <defaults>
</compile_context>

<pallas_src>
import functools

import jax
import jax.numpy as jnp
from jax.experimental import pallas as pl
from jax.experimental.pallas import tpu as pltpu

# torch.nn.Linear(in, out) chain from Model.__init__; weights kept as (in, out).
LAYER_DIMS = [(13, 16), (16, 32), (32, 64), (64, 128),
              (128, 512), (512, 1024), (1024, 512), (512, 1)]
IN_FEATURES = LAYER_DIMS[0][0]      # 13
IN_K = 16                           # first-layer K padded 13 -> 16 (one bf16 sublane group)
OUT_FEATURES = LAYER_DIMS[-1][1]    # 1
LANE = 128
TM_MAX = 1024                       # largest batch tile (rows per grid step)


def _round_up(n, m):
    return ((n + m - 1) // m) * m


def _cdiv(a, b):
    return -(-a // b)


def _bf16_epilogue_ok():
    """Use a bf16 bias-add/ReLU epilogue only where the VPU has a native bf16 path."""
    try:
        if jax.default_backend() != "tpu":
            return False
        kind = jax.devices()[0].device_kind.lower()
    except Exception:
        return False
    for old in ("v2", "v3", "v4", "v5"):   # v5e/v5p and older: keep f32 epilogue
        if old in kind:
            return False
    return True                             # v6e / v7x


def mlp_kernel(x_ref, *refs):
    """Fused 8-layer MLP over one (tm, IN_K) batch tile.

    refs = (w1, b1, ..., w8, b8, o_ref). Weights are bf16 with lane-padded widths
    (>=128 for hidden layers) and constant index_maps, so they stay VMEM-resident
    across grid steps. Biases carry the epilogue dtype (bf16 on v6e/v7x, f32 on v5e).
    """
    o_ref = refs[-1]
    prm = refs[:-1]
    n_layers = len(prm) // 2

    h = x_ref[...].astype(jnp.bfloat16)                     # (tm, IN_K)
    for li in range(n_layers):
        w = prm[2 * li][...]                                # (k, n) bf16
        b = prm[2 * li + 1][...]                            # (1, n) epilogue dtype
        acc = jnp.dot(h, w, preferred_element_type=jnp.float32)
        if li == n_layers - 1:
            # TODO(synk): the (tm, 1) store is a masked vst; the kernel is MXU-bound,
            # so we keep the simple layout instead of padding the last layer to 128.
            o_ref[...] = (acc + b.astype(jnp.float32)).astype(o_ref.dtype)
        else:
            ep = b.dtype                                    # f32 (v5e) or bf16 (v6e/v7x)
            h = jnp.maximum(acc.astype(ep) + b, 0).astype(jnp.bfloat16)


@functools.partial(jax.jit, static_argnames=("tm",))
def _mlp_forward_padded(x_pad, kparams, *, tm):
    batch_pad = x_pad.shape[0]
    grid = (batch_pad // tm,)

    in_specs = [pl.BlockSpec((tm, IN_K), lambda i: (i, 0))]
    for p in kparams:
        # Whole-array block + constant index -> parameter stays resident in VMEM.
        # TODO(synk): pipeline_mode=pl.Buffered(1) would drop the unused second
        # parameter buffer (~2.4 MiB); not needed at the current VMEM footprint.
        in_specs.append(pl.BlockSpec(p.shape, lambda i: (0, 0)))

    vmem_limit = (48 if tm >= 1024 else 32) * 1024 * 1024
    return pl.pallas_call(
        mlp_kernel,
        grid=grid,
        in_specs=in_specs,
        out_specs=pl.BlockSpec((tm, OUT_FEATURES), lambda i: (i, 0)),
        out_shape=jax.ShapeDtypeStruct((batch_pad, OUT_FEATURES), jnp.float32),
        compiler_params=pltpu.CompilerParams(
            dimension_semantics=("parallel",),
            vmem_limit_bytes=vmem_limit,
        ),
    )(x_pad, *kparams)


def _choose_tile(batch):
    """Pick (tm, batch_pad).

    Small batches: one tiny step. Otherwise minimize padded rows, and once the
    batch is large enough prefer an even number of grid steps so the "parallel"
    axis actually shards across v7x's two TensorCores (no-op on v5e/v6e).
    """
    b8 = _round_up(max(batch, 1), 8)
    if b8 <= 128:
        return b8, b8

    cands = {128, 256, 512, TM_MAX}
    for parts in (1, 2, 4, 8):          # low-waste, 8-aligned equal splits
        tm = _round_up(_cdiv(b8, parts), 8)
        if 8 <= tm <= TM_MAX:
            cands.add(tm)

    best = None
    for tm in sorted(cands):
        bp = _round_up(b8, tm)
        steps = bp // tm
        if b8 >= 256:
            key = (steps % 2, bp, steps, tm)    # even grid first (v7x), then waste
        else:
            key = (bp, steps % 2, steps, tm)    # waste first for small batches
        if best is None or key < best[0]:
            best = (key, tm, bp)
    return best[1], best[2]


def mlp_forward(x, kparams):
    """x: (batch, 13) float; kparams from make_kernel_params()."""
    batch = x.shape[0]
    tm, batch_pad = _choose_tile(batch)
    # Single cheap pad: rows -> batch_pad, features 13 -> 16. The 128-wide lane
    # padding of the first layer lives in the weight, not in an input copy.
    x_pad = jnp.zeros((batch_pad, IN_K), jnp.float32)
    x_pad = x_pad.at[:batch, :IN_FEATURES].set(x.astype(jnp.float32))
    y = _mlp_forward_padded(x_pad, kparams, tm=tm)
    return y[:batch]


def init_params(key):
    """Deterministic init mimicking torch.nn.Linear default:
    U(-1/sqrt(fan_in), 1/sqrt(fan_in)) for weight and bias; weights stored (in, out)."""
    params = []
    for (fan_in, fan_out) in LAYER_DIMS:
        key, kw, kb = jax.random.split(key, 3)
        bound = 1.0 / jnp.sqrt(jnp.float32(fan_in))
        w = jax.random.uniform(kw, (fan_in, fan_out), jnp.float32, -bound, bound)
        b = jax.random.uniform(kb, (1, fan_out), jnp.float32, -bound, bound)
        params.extend([w, b])
    return params


def make_kernel_params(params, *, bf16_epilogue):
    """Pad every hidden width below 128 up to 128 lanes (zero weight cols / bias
    entries and zero next-layer K rows -> semantics unchanged since ReLU(0)=0),
    pad the first layer's K from 13 to 16, cast weights to bf16, and biases to
    the epilogue dtype (bf16 on v6e/v7x, f32 on v5e and for the last layer)."""
    ep_dtype = jnp.bfloat16 if bf16_epilogue else jnp.float32
    n_layers = len(LAYER_DIMS)
    kparams = []
    k_pad = IN_K
    for li, (fan_in, fan_out) in enumerate(LAYER_DIMS):
        w = params[2 * li]
        b = params[2 * li + 1]
        last = li == n_layers - 1
        n_pad = fan_out if (last or fan_out >= LANE) else LANE
        wp = jnp.zeros((k_pad, n_pad), jnp.float32).at[:fan_in, :fan_out].set(w)
        bp = jnp.zeros((1, n_pad), jnp.float32).at[:, :fan_out].set(b)
        kparams.append(wp.astype(jnp.bfloat16))
        kparams.append(bp.astype(jnp.float32 if last else ep_dtype))
        k_pad = n_pad
    return kparams


def reference_forward_kernel_recipe(x, kparams):
    """Pure-JAX reference using the exact bf16 recipe the kernel uses."""
    batch = x.shape[0]
    h = jnp.zeros((batch, IN_K), jnp.float32).at[:, :IN_FEATURES].set(
        x.astype(jnp.float32)).astype(jnp.bfloat16)
    n_layers = len(kparams) // 2
    for li in range(n_layers):
        w = kparams[2 * li]
        b = kparams[2 * li + 1]
        acc = jnp.dot(h, w, preferred_element_type=jnp.float32)
        if li == n_layers - 1:
            h = acc + b.astype(jnp.float32)
        else:
            h = jnp.maximum(acc.astype(b.dtype) + b, 0).astype(jnp.bfloat16)
    return h


def reference_forward_f32(x, params):
    """Pure-f32 reference matching the original PyTorch Model semantics."""
    h = x.astype(jnp.float32)
    n_layers = len(LAYER_DIMS)
    for li in range(n_layers):
        h = jnp.dot(h, params[2 * li]) + params[2 * li + 1]
        if li != n_layers - 1:
            h = jnp.maximum(h, 0.0)
    return h


if __name__ == "__main__":
    key = jax.random.PRNGKey(0)
    key, kx = jax.random.split(key)

    batch = 8
    x = jax.random.normal(kx, (batch, IN_FEATURES), jnp.float32)

    params = init_params(key)
    kparams = make_kernel_params(params, bf16_epilogue=_bf16_epilogue_ok())

    y = mlp_forward(x, kparams)
    jax.block_until_ready(y)

    assert y.shape == (batch, OUT_FEATURES), y.shape
    y_recipe = reference_forward_kernel_recipe(x, kparams)
    y_f32 = reference_forward_f32(x, params)
    assert jnp.allclose(y, y_recipe, atol=1e-2, rtol=1e-2), "mismatch vs bf16-recipe reference"
    assert jnp.allclose(y, y_f32, atol=1e-1, rtol=1e-1), "mismatch vs f32 reference"

    print("KERNEL_OK")
</pallas_src>

<mosaic_0001>
module attributes {stable_mosaic.version = 11 : i64} {
  func.func @mlp_kernel(%arg0: i32, %arg1: memref<8x16xf32, #tpu.memory_space<vmem>>, %arg2: memref<16x128xbf16, #tpu.memory_space<vmem>>, %arg3: memref<1x128xf32, #tpu.memory_space<vmem>>, %arg4: memref<128x128xbf16, #tpu.memory_space<vmem>>, %arg5: memref<1x128xf32, #tpu.memory_space<vmem>>, %arg6: memref<128x128xbf16, #tpu.memory_space<vmem>>, %arg7: memref<1x128xf32, #tpu.memory_space<vmem>>, %arg8: memref<128x128xbf16, #tpu.memory_space<vmem>>, %arg9: memref<1x128xf32, #tpu.memory_space<vmem>>, %arg10: memref<128x512xbf16, #tpu.memory_space<vmem>>, %arg11: memref<1x512xf32, #tpu.memory_space<vmem>>, %arg12: memref<512x1024xbf16, #tpu.memory_space<vmem>>, %arg13: memref<1x1024xf32, #tpu.memory_space<vmem>>, %arg14: memref<1024x512xbf16, #tpu.memory_space<vmem>>, %arg15: memref<1x512xf32, #tpu.memory_space<vmem>>, %arg16: memref<512x1xbf16, #tpu.memory_space<vmem>>, %arg17: memref<1x1xf32, #tpu.memory_space<vmem>>, %arg18: memref<8x1xf32, #tpu.memory_space<vmem>>) attributes {dimension_semantics = [#tpu.dimension_semantics<parallel>], iteration_bounds = array<i64: 1>, scalar_prefetch = 0 : i64, scratch_operands = 0 : i64, tpu.core_type = #tpu.core_type<tc>, window_params = [{transform_indices = @transform_0, window_bounds = array<i64: 8, 16>}, {pipeline_mode = #tpu.pipeline_mode<synchronous>, transform_indices = @transform_1, window_bounds = array<i64: 16, 128>}, {pipeline_mode = #tpu.pipeline_mode<synchronous>, transform_indices = @transform_2, window_bounds = array<i64: 1, 128>}, {pipeline_mode = #tpu.pipeline_mode<synchronous>, transform_indices = @transform_3, window_bounds = array<i64: 128, 128>}, {pipeline_mode = #tpu.pipeline_mode<synchronous>, transform_indices = @transform_4, window_bounds = array<i64: 1, 128>}, {pipeline_mode = #tpu.pipeline_mode<synchronous>, transform_indices = @transform_5, window_bounds = array<i64: 128, 128>}, {pipeline_mode = #tpu.pipeline_mode<synchronous>, transform_indices = @transform_6, window_bounds = array<i64: 1, 128>}, {pipeline_mode = #tpu.pipeline_mode<synchronous>, transform_indices = @transform_7, window_bounds = array<i64: 128, 128>}, {pipeline_mode = #tpu.pipeline_mode<synchronous>, transform_indices = @transform_8, window_bounds = array<i64: 1, 128>}, {pipeline_mode = #tpu.pipeline_mode<synchronous>, transform_indices = @transform_9, window_bounds = array<i64: 128, 512>}, {pipeline_mode = #tpu.pipeline_mode<synchronous>, transform_indices = @transform_10, window_bounds = array<i64: 1, 512>}, {pipeline_mode = #tpu.pipeline_mode<synchronous>, transform_indices = @transform_11, window_bounds = array<i64: 512, 1024>}, {pipeline_mode = #tpu.pipeline_mode<synchronous>, transform_indices = @transform_12, window_bounds = array<i64: 1, 1024>}, {pipeline_mode = #tpu.pipeline_mode<synchronous>, transform_indices = @transform_13, window_bounds = array<i64: 1024, 512>}, {pipeline_mode = #tpu.pipeline_mode<synchronous>, transform_indices = @transform_14, window_bounds = array<i64: 1, 512>}, {pipeline_mode = #tpu.pipeline_mode<synchronous>, transform_indices = @transform_15, window_bounds = array<i64: 512, 1>}, {pipeline_mode = #tpu.pipeline_mode<synchronous>, transform_indices = @transform_16, window_bounds = array<i64: 1, 1>}, {transform_indices = @transform_17, window_bounds = array<i64: 8, 1>}]} {
    %c0 = arith.constant 0 : index
    %c0_0 = arith.constant 0 : index
    %0 = vector.load %arg1[%c0, %c0_0] : memref<8x16xf32, #tpu.memory_space<vmem>>, vector<8x16xf32>
    %1 = arith.truncf %0 : vector<8x16xf32> to vector<8x16xbf16>
    %c0_1 = arith.constant 0 : index
    %c0_2 = arith.constant 0 : index
    %2 = vector.load %arg2[%c0_1, %c0_2] : memref<16x128xbf16, #tpu.memory_space<vmem>>, vector<16x128xbf16>
    %c0_3 = arith.constant 0 : index
    %c0_4 = arith.constant 0 : index
    %3 = vector.load %arg3[%c0_3, %c0_4] : memref<1x128xf32, #tpu.memory_space<vmem>>, vector<1x128xf32>
    %cst = arith.constant dense<0.000000e+00> : vector<8x128xf32>
    %4 = tpu.matmul %1, %2, %cst {dimension_numbers = #tpu.dot_dimension_numbers<[1], [0], [0], [1], [0, 0, 1, 1], [], []>} : vector<8x16xbf16>, vector<16x128xbf16>, vector<8x128xf32> -> vector<8x128xf32>
    %5 = vector.broadcast %3 : vector<1x128xf32> to vector<8x128xf32>
    %6 = arith.addf %4, %5 : vector<8x128xf32>
    %cst_5 = arith.constant 0.000000e+00 : f32
    %7 = vector.broadcast %cst_5 : f32 to vector<8x128xf32>
    %8 = arith.maximumf %6, %7 : vector<8x128xf32>
    %9 = arith.truncf %8 : vector<8x128xf32> to vector<8x128xbf16>
    %c0_6 = arith.constant 0 : index
    %c0_7 = arith.constant 0 : index
    %10 = vector.load %arg4[%c0_6, %c0_7] : memref<128x128xbf16, #tpu.memory_space<vmem>>, vector<128x128xbf16>
    %c0_8 = arith.constant 0 : index
    %c0_9 = arith.constant 0 : index
    %11 = vector.load %arg5[%c0_8, %c0_9] : memref<1x128xf32, #tpu.memory_space<vmem>>, vector<1x128xf32>
    %cst_10 = arith.constant dense<0.000000e+00> : vector<8x128xf32>
    %12 = tpu.matmul %9, %10, %cst_10 {dimension_numbers = #tpu.dot_dimension_numbers<[1], [0], [0], [1], [0, 0, 1, 1], [], []>} : vector<8x128xbf16>, vector<128x128xbf16>, vector<8x128xf32> -> vector<8x128xf32>
    %13 = vector.broadcast %11 : vector<1x128xf32> to vector<8x128xf32>
    %14 = arith.addf %12, %13 : vector<8x128xf32>
    %cst_11 = arith.constant 0.000000e+00 : f32
    %15 = vector.broadcast %cst_11 : f32 to vector<8x128xf32>
    %16 = arith.maximumf %14, %15 : vector<8x128xf32>
    %17 = arith.truncf %16 : vector<8x128xf32> to vector<8x128xbf16>
    %c0_12 = arith.constant 0 : index
    %c0_13 = arith.constant 0 : index
    %18 = vector.load %arg6[%c0_12, %c0_13] : memref<128x128xbf16, #tpu.memory_space<vmem>>, vector<128x128xbf16>
    %c0_14 = arith.constant 0 : index
    %c0_15 = arith.constant 0 : index
    %19 = vector.load %arg7[%c0_14, %c0_15] : memref<1x128xf32, #tpu.memory_space<vmem>>, vector<1x128xf32>
    %cst_16 = arith.constant dense<0.000000e+00> : vector<8x128xf32>
    %20 = tpu.matmul %17, %18, %cst_16 {dimension_numbers = #tpu.dot_dimension_numbers<[1], [0], [0], [1], [0, 0, 1, 1], [], []>} : vector<8x128xbf16>, vector<128x128xbf16>, vector<8x128xf32> -> vector<8x128xf32>
    %21 = vector.broadcast %19 : vector<1x128xf32> to vector<8x128xf32>
    %22 = arith.addf %20, %21 : vector<8x128xf32>
    %cst_17 = arith.constant 0.000000e+00 : f32
    %23 = vector.broadcast %cst_17 : f32 to vector<8x128xf32>
    %24 = arith.maximumf %22, %23 : vector<8x128xf32>
    %25 = arith.truncf %24 : vector<8x128xf32> to vector<8x128xbf16>
    %c0_18 = arith.constant 0 : index
    %c0_19 = arith.constant 0 : index
    %26 = vector.load %arg8[%c0_18, %c0_19] : memref<128x128xbf16, #tpu.memory_space<vmem>>, vector<128x128xbf16>
    %c0_20 = arith.constant 0 : index
    %c0_21 = arith.constant 0 : index
    %27 = vector.load %arg9[%c0_20, %c0_21] : memref<1x128xf32, #tpu.memory_space<vmem>>, vector<1x128xf32>
    %cst_22 = arith.constant dense<0.000000e+00> : vector<8x128xf32>
    %28 = tpu.matmul %25, %26, %cst_22 {dimension_numbers = #tpu.dot_dimension_numbers<[1], [0], [0], [1], [0, 0, 1, 1], [], []>} : vector<8x128xbf16>, vector<128x128xbf16>, vector<8x128xf32> -> vector<8x128xf32>
    %29 = vector.broadcast %27 : vector<1x128xf32> to vector<8x128xf32>
    %30 = arith.addf %28, %29 : vector<8x128xf32>
    %cst_23 = arith.constant 0.000000e+00 : f32
    %31 = vector.broadcast %cst_23 : f32 to vector<8x128xf32>
    %32 = arith.maximumf %30, %31 : vector<8x128xf32>
    %33 = arith.truncf %32 : vector<8x128xf32> to vector<8x128xbf16>
    %c0_24 = arith.constant 0 : index
    %c0_25 = arith.constant 0 : index
    %34 = vector.load %arg10[%c0_24, %c0_25] : memref<128x512xbf16, #tpu.memory_space<vmem>>, vector<128x512xbf16>
    %c0_26 = arith.constant 0 : index
    %c0_27 = arith.constant 0 : index
    %35 = vector.load %arg11[%c0_26, %c0_27] : memref<1x512xf32, #tpu.memory_space<vmem>>, vector<1x512xf32>
    %cst_28 = arith.constant dense<0.000000e+00> : vector<8x512xf32>
    %36 = tpu.matmul %33, %34, %cst_28 {dimension_numbers = #tpu.dot_dimension_numbers<[1], [0], [0], [1], [0, 0, 1, 1], [], []>} : vector<8x128xbf16>, vector<128x512xbf16>, vector<8x512xf32> -> vector<8x512xf32>
    %37 = vector.broadcast %35 : vector<1x512xf32> to vector<8x512xf32>
    %38 = arith.addf %36, %37 : vector<8x512xf32>
    %cst_29 = arith.constant 0.000000e+00 : f32
    %39 = vector.broadcast %cst_29 : f32 to vector<8x512xf32>
    %40 = arith.maximumf %38, %39 : vector<8x512xf32>
    %41 = arith.truncf %40 : vector<8x512xf32> to vector<8x512xbf16>
    %c0_30 = arith.constant 0 : index
    %c0_31 = arith.constant 0 : index
    %42 = vector.load %arg12[%c0_30, %c0_31] : memref<512x1024xbf16, #tpu.memory_space<vmem>>, vector<512x1024xbf16>
    %c0_32 = arith.constant 0 : index
    %c0_33 = arith.constant 0 : index
    %43 = vector.load %arg13[%c0_32, %c0_33] : memref<1x1024xf32, #tpu.memory_space<vmem>>, vector<1x1024xf32>
    %cst_34 = arith.constant dense<0.000000e+00> : vector<8x1024xf32>
    %44 = tpu.matmul %41, %42, %cst_34 {dimension_numbers = #tpu.dot_dimension_numbers<[1], [0], [0], [1], [0, 0, 1, 1], [], []>} : vector<8x512xbf16>, vector<512x1024xbf16>, vector<8x1024xf32> -> vector<8x1024xf32>
    %45 = vector.broadcast %43 : vector<1x1024xf32> to vector<8x1024xf32>
    %46 = arith.addf %44, %45 : vector<8x1024xf32>
    %cst_35 = arith.constant 0.000000e+00 : f32
    %47 = vector.broadcast %cst_35 : f32 to vector<8x1024xf32>
    %48 = arith.maximumf %46, %47 : vector<8x1024xf32>
    %49 = arith.truncf %48 : vector<8x1024xf32> to vector<8x1024xbf16>
    %c0_36 = arith.constant 0 : index
    %c0_37 = arith.constant 0 : index
    %50 = vector.load %arg14[%c0_36, %c0_37] : memref<1024x512xbf16, #tpu.memory_space<vmem>>, vector<1024x512xbf16>
    %c0_38 = arith.constant 0 : index
    %c0_39 = arith.constant 0 : index
    %51 = vector.load %arg15[%c0_38, %c0_39] : memref<1x512xf32, #tpu.memory_space<vmem>>, vector<1x512xf32>
    %cst_40 = arith.constant dense<0.000000e+00> : vector<8x512xf32>
    %52 = tpu.matmul %49, %50, %cst_40 {dimension_numbers = #tpu.dot_dimension_numbers<[1], [0], [0], [1], [0, 0, 1, 1], [], []>} : vector<8x1024xbf16>, vector<1024x512xbf16>, vector<8x512xf32> -> vector<8x512xf32>
    %53 = vector.broadcast %51 : vector<1x512xf32> to vector<8x512xf32>
    %54 = arith.addf %52, %53 : vector<8x512xf32>
    %cst_41 = arith.constant 0.000000e+00 : f32
    %55 = vector.broadcast %cst_41 : f32 to vector<8x512xf32>
    %56 = arith.maximumf %54, %55 : vector<8x512xf32>
    %57 = arith.truncf %56 : vector<8x512xf32> to vector<8x512xbf16>
    %c0_42 = arith.constant 0 : index
    %c0_43 = arith.constant 0 : index
    %58 = vector.load %arg16[%c0_42, %c0_43] : memref<512x1xbf16, #tpu.memory_space<vmem>>, vector<512x1xbf16>
    %c0_44 = arith.constant 0 : index
    %c0_45 = arith.constant 0 : index
    %59 = vector.load %arg17[%c0_44, %c0_45] : memref<1x1xf32, #tpu.memory_space<vmem>>, vector<1x1xf32>
    %cst_46 = arith.constant dense<0.000000e+00> : vector<8x1xf32>
    %60 = tpu.matmul %57, %58, %cst_46 {dimension_numbers = #tpu.dot_dimension_numbers<[1], [0], [0], [1], [0, 0, 1, 1], [], []>} : vector<8x512xbf16>, vector<512x1xbf16>, vector<8x1xf32> -> vector<8x1xf32>
    %61 = vector.broadcast %59 : vector<1x1xf32> to vector<8x1xf32>
    %62 = arith.addf %60, %61 : vector<8x1xf32>
    %c0_47 = arith.constant 0 : index
    %c0_48 = arith.constant 0 : index
    %63 = vector.load %arg18[%c0_47, %c0_48] : memref<8x1xf32, #tpu.memory_space<vmem>>, vector<8x1xf32>
    tpu.vector_store %arg18[%c0_47, %c0_48], %62 {strides = array<i32>} : memref<8x1xf32, #tpu.memory_space<vmem>>, vector<8x1xf32>,
    return
  }
  func.func @transform_0(%arg0: i32) -> (i32, i32) {
    %c0_i32 = arith.constant 0 : i32
    %c0_i32_0 = arith.constant 0 : i32
    return %arg0, %c0_i32 : i32, i32
  }
  func.func @transform_1(%arg0: i32) -> (i32, i32) {
    %c0_i32 = arith.constant 0 : i32
    %c0_i32_0 = arith.constant 0 : i32
    %c0_i32_1 = arith.constant 0 : i32
    return %c0_i32, %c0_i32_0 : i32, i32
  }
  func.func @transform_2(%arg0: i32) -> (i32, i32) {
    %c0_i32 = arith.constant 0 : i32
    %c0_i32_0 = arith.constant 0 : i32
    %c0_i32_1 = arith.constant 0 : i32
    return %c0_i32, %c0_i32_0 : i32, i32
  }
  func.func @transform_3(%arg0: i32) -> (i32, i32) {
    %c0_i32 = arith.constant 0 : i32
    %c0_i32_0 = arith.constant 0 : i32
    %c0_i32_1 = arith.constant 0 : i32
    return %c0_i32, %c0_i32_0 : i32, i32
  }
  func.func @transform_4(%arg0: i32) -> (i32, i32) {
    %c0_i32 = arith.constant 0 : i32
    %c0_i32_0 = arith.constant 0 : i32
    %c0_i32_1 = arith.constant 0 : i32
    return %c0_i32, %c0_i32_0 : i32, i32
  }
  func.func @transform_5(%arg0: i32) -> (i32, i32) {
    %c0_i32 = arith.constant 0 : i32
    %c0_i32_0 = arith.constant 0 : i32
    %c0_i32_1 = arith.constant 0 : i32
    return %c0_i32, %c0_i32_0 : i32, i32
  }
  func.func @transform_6(%arg0: i32) -> (i32, i32) {
    %c0_i32 = arith.constant 0 : i32
    %c0_i32_0 = arith.constant 0 : i32
    %c0_i32_1 = arith.constant 0 : i32
    return %c0_i32, %c0_i32_0 : i32, i32
  }
  func.func @transform_7(%arg0: i32) -> (i32, i32) {
    %c0_i32 = arith.constant 0 : i32
    %c0_i32_0 = arith.constant 0 : i32
    %c0_i32_1 = arith.constant 0 : i32
    return %c0_i32, %c0_i32_0 : i32, i32
  }
  func.func @transform_8(%arg0: i32) -> (i32, i32) {
    %c0_i32 = arith.constant 0 : i32
    %c0_i32_0 = arith.constant 0 : i32
    %c0_i32_1 = arith.constant 0 : i32
    return %c0_i32, %c0_i32_0 : i32, i32
  }
  func.func @transform_9(%arg0: i32) -> (i32, i32) {
    %c0_i32 = arith.constant 0 : i32
    %c0_i32_0 = arith.constant 0 : i32
    %c0_i32_1 = arith.constant 0 : i32
    return %c0_i32, %c0_i32_0 : i32, i32
  }
  func.func @transform_10(%arg0: i32) -> (i32, i32) {
    %c0_i32 = arith.constant 0 : i32
    %c0_i32_0 = arith.constant 0 : i32
    %c0_i32_1 = arith.constant 0 : i32
    return %c0_i32, %c0_i32_0 : i32, i32
  }
  func.func @transform_11(%arg0: i32) -> (i32, i32) {
    %c0_i32 = arith.constant 0 : i32
    %c0_i32_0 = arith.constant 0 : i32
    %c0_i32_1 = arith.constant 0 : i32
    return %c0_i32, %c0_i32_0 : i32, i32
  }
  func.func @transform_12(%arg0: i32) -> (i32, i32) {
    %c0_i32 = arith.constant 0 : i32
    %c0_i32_0 = arith.constant 0 : i32
    %c0_i32_1 = arith.constant 0 : i32
    return %c0_i32, %c0_i32_0 : i32, i32
  }
  func.func @transform_13(%arg0: i32) -> (i32, i32) {
    %c0_i32 = arith.constant 0 : i32
    %c0_i32_0 = arith.constant 0 : i32
    %c0_i32_1 = arith.constant 0 : i32
    return %c0_i32, %c0_i32_0 : i32, i32
  }
  func.func @transform_14(%arg0: i32) -> (i32, i32) {
    %c0_i32 = arith.constant 0 : i32
    %c0_i32_0 = arith.constant 0 : i32
    %c0_i32_1 = arith.constant 0 : i32
    return %c0_i32, %c0_i32_0 : i32, i32
  }
  func.func @transform_15(%arg0: i32) -> (i32, i32) {
    %c0_i32 = arith.constant 0 : i32
    %c0_i32_0 = arith.constant 0 : i32
    %c0_i32_1 = arith.constant 0 : i32
    return %c0_i32, %c0_i32_0 : i32, i32
  }
  func.func @transform_16(%arg0: i32) -> (i32, i32) {
    %c0_i32 = arith.constant 0 : i32
    %c0_i32_0 = arith.constant 0 : i32
    %c0_i32_1 = arith.constant 0 : i32
    return %c0_i32, %c0_i32_0 : i32, i32
  }
  func.func @transform_17(%arg0: i32) -> (i32, i32) {
    %c0_i32 = arith.constant 0 : i32
    %c0_i32_0 = arith.constant 0 : i32
    return %arg0, %c0_i32 : i32, i32
  }
}

</mosaic_0001>

<bundles_post_ra>
// kernel: _mlp_forward_padded.1
= control target key start
LH: loop header
LB: loop body
LE: loop exit
PB: predicated region body
PF: predicated region fallthrough
CT: control target
= control target key end

     0   :  { %s6987_s0 = inlined_call_operand.vmem [shape: f32[8,16], index: 0, kind: input, shape index: {}]   ;;  %s6988_s1 = inlined_call_operand.vmem [shape: bf16[16,128], index: 1, kind: input, shape index: {}]   ;;  %s6989_s2 = inlined_call_operand.vmem [shape: f32[1,128], index: 2, kind: input, shape index: {}]   ;;  %s6990_s3 = inlined_call_operand.hbm [shape: bf16[128,128], index: 3, kind: input, shape index: {}]   ;;  %s6991_s4 = inlined_call_operand.hbm [shape: f32[1,128], index: 4, kind: input, shape index: {}]   ;;  %s6992_s5 = inlined_call_operand.hbm [shape: bf16[128,128], index: 5, kind: input, shape index: {}]   ;;  %s6993_s6 = inlined_call_operand.hbm [shape: f32[1,128], index: 6, kind: input, shape index: {}]   ;;  %s6994_s7 = inlined_call_operand.hbm [shape: bf16[128,128], index: 7, kind: input, shape index: {}]   ;;  %s6995_s8 = inlined_call_operand.hbm [shape: f32[1,128], index: 8, kind: input, shape index: {}]   ;;  %s6996_s9 = inlined_call_operand.vmem [shape: bf16[128,512], index: 9, kind: input, shape index: {}]   ;;  %s6997_s10 = inlined_call_operand.hbm [shape: f32[1,512], index: 10, kind: input, shape index: {}]   ;;  %s6998_s11 = inlined_call_operand.hbm [shape: bf16[512,1024], index: 11, kind: input, shape index: {}]   ;;  %s6999_s12 = inlined_call_operand.vmem [shape: f32[1,1024], index: 12, kind: input, shape index: {}]   ;;  %s7000_s13 = inlined_call_operand.hbm [shape: bf16[1024,512], index: 13, kind: input, shape index: {}]   ;;  %s7001_s14 = inlined_call_operand.vmem [shape: f32[1,512], index: 14, kind: input, shape index: {}]   ;;  %s7002_s15 = inlined_call_operand.vmem [shape: bf16[512,1], index: 15, kind: input, shape index: {}]   ;;  %s7003_s16 = inlined_call_operand.<no memory space> [shape: f32[1,1], index: 16, kind: input, shape index: {}]   ;;  %s7004_s17 = inlined_call_operand.vmem [shape: f32[8,1], index: 17, kind: output, shape index: {}]  }
   0x1   :  { %7005 = sst [smem:[#allocation22_spill]] %s6987_s0  ;;  %v22_v0 = vstv %s7003_s16 }
   0x2   :  { %7006 = sst [smem:[#allocation23_spill]] %s6988_s1  ;;  %23 = vst [vmem:[#allocation2] sm:$0x1] %v22_v0 }
   0x3   :  { %24 = vsyncpa [#allocation4], 0 }
   0x4   :  { %25 = vsyncpa [#allocation6], 0 }
   0x5   :  { %26 = vsyncpa [#allocation9], 0 }
   0x6   :  { %27 = vsyncpa [#allocation12], 0 }
   0x7   :  { %28 = vsyncpa [#allocation15], 0  ;;  %s6492_s26 = smov [#allocation5]   ;;  %s6493_s28 = smov [#allocation8]  }
   0x8   :  { %s53_s27 = sshll.u32 %s6492_s26, 4  ;;  %s75_s29 = sshll.u32 %s6493_s28, 4  ;;  %s54_s27 = int_to_ptr.vmem [resolvable:$true] %s53_s27  ;;  %s76_s29 = int_to_ptr.vmem [resolvable:$true] %s75_s29 }
   0x9   :  { %s6310_s0 = scalar_lea.vmem %s54_s27, 16  ;;  %s6314_s30 = scalar_lea.vmem %s54_s27, 32 }
   0xa   :  { %p6311_p0 = scmp.ne.s32.totalorder %s54_s27, %s6310_s0  ;;  %p6315_p1 = scmp.lt.s32.totalorder %s54_s27, %s54_s27 }
   0xb   :  { %p6316_p2 = scmp.lt.s32.totalorder %s6314_s30, %s6310_s0 }
   0xd   :  { %p6317_p3 = por %p6316_p2, %p6315_p1 }
   0xf   :  { %p6318_p4 = pnand %p6317_p3, %p6311_p0 }
  0x11   :  { %6321 = shalt.err (!%p6318_p4)
}
  0x12   :  { %56 = dma.hbm_to_vmem [thread:$0]  %s6991_s4, 16, %s54_s27, [#allocation6]  }
  0x13   :  { %s6330_s19 = scalar_lea.vmem %s76_s29, 16  ;;  %s6334_s1 = scalar_lea.vmem %s76_s29, 32 }
  0x14   :  { %p6331_p5 = scmp.ne.s32.totalorder %s76_s29, %s6330_s19  ;;  %p6335_p6 = scmp.lt.s32.totalorder %s76_s29, %s76_s29 }
  0x15   :  { %p6336_p7 = scmp.lt.s32.totalorder %s6334_s1, %s6330_s19 }
  0x17   :  { %p6337_p8 = por %p6336_p7, %p6335_p6 }
  0x19   :  { %p6338_p9 = pnand %p6337_p8, %p6331_p5 }
  0x1b   :  { %6341 = shalt.err (!%p6338_p9)
}
  0x1c   :  { %78 = dma.hbm_to_vmem [thread:$0]  %s6993_s6, 16, %s76_s29, [#allocation9]  }
  0x1d   :  { %s6494_s22 = smov [#allocation11]   ;;  %s6495_s24 = smov [#allocation14]  }
  0x1e   :  { %s97_s23 = sshll.u32 %s6494_s22, 4  ;;  %s118_s25 = sshll.u32 %s6495_s24, 4  ;;  %s98_s23 = int_to_ptr.vmem [resolvable:$true] %s97_s23  ;;  %s119_s25 = int_to_ptr.vmem [resolvable:$true] %s118_s25 }
  0x1f   :  { %s6350_s26 = scalar_lea.vmem %s98_s23, 16  ;;  %s6354_s4 = scalar_lea.vmem %s98_s23, 32 }
  0x20   :  { %p6351_p10 = scmp.ne.s32.totalorder %s98_s23, %s6350_s26  ;;  %p6355_p11 = scmp.lt.s32.totalorder %s98_s23, %s98_s23 }
  0x21   :  { %p6356_p12 = scmp.lt.s32.totalorder %s6354_s4, %s6350_s26 }
  0x23   :  { %p6357_p13 = por %p6356_p12, %p6355_p11 }
  0x25   :  { %p6358_p0 = pnand %p6357_p13, %p6351_p10 }
  0x27   :  { %6361 = shalt.err (!%p6358_p0)
}
  0x28   :  { %100 = dma.hbm_to_vmem [thread:$0]  %s6995_s8, 16, %s98_s23, [#allocation12]  }
  0x29   :  { %s6370_s0 = scalar_lea.vmem %s119_s25, 32768  ;;  %p6375_p2 = scmp.lt.s32.totalorder %s119_s25, %s119_s25 }
  0x2a   :  { %p6371_p1 = scmp.ne.s32.totalorder %s119_s25, %s6370_s0  ;;  %p6376_p3 = scmp.lt.s32.totalorder %s6370_s0, %s6370_s0 }
  0x2c   :  { %p6377_p4 = por %p6376_p3, %p6375_p2 }
  0x2e   :  { %p6378_p5 = pnand %p6377_p4, %p6371_p1 }
  0x30   :  { %6381 = shalt.err (!%p6378_p5)
}
  0x31   :  { %s6496_s6 = smov 512   ;;  %s6497_s29 = smov 32  }
  0x32   :  { %124 = dma.hbm_to_vmem [thread:$0]  %s6998_s11, 32768, %s119_s25, [#allocation15], %s6496_s6, %s6496_s6, %s6497_s29  }
  0x33   :  { %s6498_s18 = smov [#allocation3]  }
  0x34   :  { %s40_s19 = sshll.u32 %s6498_s18, 4  ;;  %s41_s19 = int_to_ptr.vmem [resolvable:$true] %s40_s19 }
  0x35   :  { %s6390_s1 = scalar_lea.vmem %s41_s19, 1024  ;;  %p6395_p7 = scmp.lt.s32.totalorder %s41_s19, %s41_s19 }
  0x36   :  { %p6391_p6 = scmp.ne.s32.totalorder %s41_s19, %s6390_s1  ;;  %p6396_p8 = scmp.lt.s32.totalorder %s6390_s1, %s6390_s1 }
  0x38   :  { %p6397_p9 = por %p6396_p8, %p6395_p7 }
  0x3a   :  { %p6398_p10 = pnand %p6397_p9, %p6391_p6 }
  0x3c   :  { %6401 = shalt.err (!%p6398_p10)
}
  0x3d   :  { %s6499_s8 = smov 64   ;;  %s6500_s20 = smov 4  }
  0x3e   :  { %46 = dma.hbm_to_vmem [thread:$0]  %s6990_s3, 1024, %s41_s19, [#allocation4], %s6499_s8, %s6499_s8, %s6500_s20  }
  0x3f   :  { %s6501_s23 = smov [#allocation7]   ;;  %s6502_s11 = smov [#allocation10]  }
  0x40   :  { %s62_s24 = sshll.u32 %s6501_s23, 4  ;;  %s84_s25 = sshll.u32 %s6502_s11, 4  ;;  %s63_s24 = int_to_ptr.vmem [resolvable:$true] %s62_s24  ;;  %s85_s25 = int_to_ptr.vmem [resolvable:$true] %s84_s25 }
  0x41   :  { %s6410_s26 = scalar_lea.vmem %s63_s24, 1024  ;;  %p6415_p12 = scmp.lt.s32.totalorder %s63_s24, %s63_s24 }
  0x42   :  { %p6411_p11 = scmp.ne.s32.totalorder %s63_s24, %s6410_s26  ;;  %p6416_p13 = scmp.lt.s32.totalorder %s6410_s26, %s6410_s26 }
  0x44   :  { %p6417_p0 = por %p6416_p13, %p6415_p12 }
  0x46   :  { %p6418_p1 = pnand %p6417_p0, %p6411_p11 }
  0x48   :  { %6421 = shalt.err (!%p6418_p1)
}
  0x49   :  { %68 = dma.hbm_to_vmem [thread:$0]  %s6992_s5, 1024, %s63_s24, [#allocation6], %s6499_s8, %s6499_s8, %s6500_s20  }
  0x4a   :  { %s6430_s28 = scalar_lea.vmem %s85_s25, 1024  ;;  %p6435_p3 = scmp.lt.s32.totalorder %s85_s25, %s85_s25 }
  0x4b   :  { %p6431_p2 = scmp.ne.s32.totalorder %s85_s25, %s6430_s28  ;;  %p6436_p4 = scmp.lt.s32.totalorder %s6430_s28, %s6430_s28 }
  0x4d   :  { %p6437_p5 = por %p6436_p4, %p6435_p3 }
  0x4f   :  { %p6438_p6 = pnand %p6437_p5, %p6431_p2 }
  0x51   :  { %6441 = shalt.err (!%p6438_p6)
}
  0x52   :  { %90 = dma.hbm_to_vmem [thread:$0]  %s6994_s7, 1024, %s85_s25, [#allocation9], %s6499_s8, %s6499_s8, %s6500_s20  }
  0x53   :  { %s6503_s6 = smov [#allocation13]   ;;  %s6504_s30 = smov [#allocation16]  }
  0x54   :  { %s109_s29 = sshll.u32 %s6503_s6, 4  ;;  %s132_s16 = sshll.u32 %s6504_s30, 4  ;;  %s110_s29 = int_to_ptr.vmem [resolvable:$true] %s109_s29  ;;  %s133_s16 = int_to_ptr.vmem [resolvable:$true] %s132_s16 }
  0x55   :  { %s6450_s18 = scalar_lea.vmem %s110_s29, 64  ;;  %p6455_p8 = scmp.lt.s32.totalorder %s110_s29, %s110_s29 }
  0x56   :  { %p6451_p7 = scmp.ne.s32.totalorder %s110_s29, %s6450_s18  ;;  %p6456_p9 = scmp.lt.s32.totalorder %s6450_s18, %s6450_s18 }
  0x58   :  { %p6457_p10 = por %p6456_p9, %p6455_p8 }
  0x5a   :  { %p6458_p11 = pnand %p6457_p10, %p6451_p7 }
  0x5c   :  { %6461 = shalt.err (!%p6458_p11)
}
  0x5d   :  { %112 = dma.hbm_to_vmem [thread:$0]  %s6997_s10, 64, %s110_s29, [#allocation12]  }
  0x5e   :  { %s6470_s1 = scalar_lea.vmem %s133_s16, 32768  ;;  %p6475_p13 = scmp.lt.s32.totalorder %s133_s16, %s133_s16 }
  0x5f   :  { %p6471_p12 = scmp.ne.s32.totalorder %s133_s16, %s6470_s1  ;;  %p6476_p0 = scmp.lt.s32.totalorder %s6470_s1, %s6470_s1 }
  0x61   :  { %p6477_p1 = por %p6476_p0, %p6475_p13 }
  0x63   :  { %p6478_p2 = pnand %p6477_p1, %p6471_p12 }
  0x65   :  { %6481 = shalt.err (!%p6478_p2)
}
  0x66   :  { %s6505_s7 = smov 256   ;;  %s6506_s8 = smov 16  }
  0x67   :  { %138 = dma.hbm_to_vmem [thread:$0]  %s7000_s13, 32768, %s133_s16, [#allocation15], %s6505_s7, %s6505_s7, %s6506_s8  }
  0x68   :  { %6482 = dma.done.wait [#allocation4], 1024  }
  0x69   :  { %6483 = vsyncadd [#allocation4], 4294966272 }
  0x6a   :  { %6484 = dma.done.wait [#allocation6], 1040  }
  0x6b   :  { %6485 = vsyncadd [#allocation6], 4294966256 }
  0x6c   :  { %6486 = dma.done.wait [#allocation9], 1040  }
  0x6d   :  { %6487 = vsyncadd [#allocation9], 4294966256 }
  0x6e   :  { %6488 = dma.done.wait [#allocation12], 80  }
  0x6f   :  { %6489 = vsyncadd [#allocation12], 4294967216 }
  0x70   :  { %6490 = dma.done.wait [#allocation15], 65536  }
  0x71   :  { %6491 = vsyncadd [#allocation15], 4294901760  ;;  %v6507_v1 = vmov 0.0   ;;  %vm6508_vm0 = vmmov 0   ;;  %s7007_s22 = sld [smem:[#allocation23_spill]]  ;;  %vm190_vm1 = vcmask 130048  }
  0x72   :  { %5729 = vmatprep.subr.bf16.mxu0 %v6507_v1  ;;  %5731 = vmatprep.mubr.msk.bf16.mxu0 %vm6508_vm0, %v6507_v1  ;;  %s7008_s11 = sld [smem:[#allocation22_spill]]  ;;  %v5814_v5 = vld [vmem:[#allocation3 + $0x38] sm:$0xff]   ;;  %v5815_v6 = vld [vmem:[#allocation3 + $0x30] sm:$0xff]   ;;  %v5816_v7 = vld [vmem:[#allocation3 + $0x28] sm:$0xff]   ;;  %vm5038_vm2 = vcmask 7168  }
  0x73   :  { %5735 = vmatprep.subr.bf16.mxu1 %v6507_v1  ;;  %5751 = vmatprep.mubr.msk.bf16.mxu1 %vm6508_vm0, %v6507_v1  ;;  %v5817_v8 = vld [vmem:[#allocation3 + $0x20] sm:$0xff]   ;;  %v5818_v9 = vld [vmem:[#allocation3 + $0x18] sm:$0xff]   ;;  %v5819_v10 = vld [vmem:[#allocation3 + $0x10] sm:$0xff]  }
  0x74   :  { %5736 = vmatpush3.bf16.msra.mxu1 %v5814_v5  ;;  %v5820_v11 = vld [vmem:[#allocation3 + $0x8] sm:$0xff]   ;;  %v5821_v12 = vld [vmem:[#allocation3] sm:$0xff]   ;;  %v5823_v14 = vld [vmem:[#allocation7 + $0x30] sm:$0xff]  }
  0x75   :  { %5737 = vmatprep.subr.bf16.mxu1 %v6507_v1  ;;  %v5822_v13 = vld [vmem:[#allocation7 + $0x38] sm:$0xff]   ;;  %v5824_v15 = vld [vmem:[#allocation7 + $0x28] sm:$0xff]   ;;  %v5825_v16 = vld [vmem:[#allocation7 + $0x20] sm:$0xff]  }
  0x76   :  { %v5826_v17 = vld [vmem:[#allocation7 + $0x18] sm:$0xff]   ;;  %v5827_v18 = vld [vmem:[#allocation7 + $0x10] sm:$0xff]   ;;  %v5828_v27 = vld [vmem:[#allocation7 + $0x8] sm:$0xff]  }
  0x77   :  { %v5813_v2 = vld [vmem:[%s7007_s22] sm:$0xff]   ;;  %v5831_v30 = vld [vmem:[#allocation10 + $0x30] sm:$0xff]   ;;  %v5832_v31 = vld [vmem:[#allocation10 + $0x28] sm:$0xff]  }
  0x78   :  { %v173_v3 = vld [vmem:[%s7008_s11] sm:$0xff]  ;;  %5730 = vmatpush3.bf16.msra.mxu0 %v5813_v2  ;;  %5738 = vmatpush3.bf16.msra.mxu1 %v5815_v6  ;;  %v5835_v34 = vld [vmem:[#allocation10 + $0x10] sm:$0xff]   ;;  %v5836_v43 = vld [vmem:[#allocation10 + $0x8] sm:$0xff]  }
  0x79   :  { %v174_v4 = vpack.c.bf16 %v173_v3, %v173_v3  ;;  %5755 = vmatprep.subr.bf16.mxu0 %v6507_v1  ;;  %5739 = vmatprep.subr.bf16.mxu1 %v6507_v1  ;;  %v5049_v19 = vld [vmem:[%s6989_s2] ss:$0 sm:$0xff]  ;;  %v5829_v28 = vld [vmem:[#allocation7] sm:$0xff]   ;;  %v5052_v35 = vld [vmem:[#allocation5] ss:$0 sm:$0xff] }
  0x7a   :  { %v5830_v29 = vld [vmem:[#allocation10 + $0x38] sm:$0xff]   ;;  %v5833_v32 = vld [vmem:[#allocation10 + $0x20] sm:$0xff]  }
  0x7b   :  { %5732 = vmatmul.mubr.msk.bf16.vlgmr.msra.gmra.mxu0 %vm190_vm1, %v174_v4  ;;  %v5834_v33 = vld [vmem:[#allocation10 + $0x18] sm:$0xff]   ;;  %v5837_v44 = vld [vmem:[#allocation10] sm:$0xff]  }
  0x7c   :  { %5771 = vmatprep.mubr.msk.bf16.mxu0 %vm6508_vm0, %v6507_v1  ;;  %5740 = vmatpush3.bf16.msra.mxu1 %v5816_v7  ;;  %v5838_v45 = vld [vmem:[%s6996_s9 + $0xe0] ss:$16 sps:$4 sm:$0xff]   ;;  %v5840_v46 = vld [vmem:[%s6996_s9 + $0xe4] ss:$16 sps:$4 sm:$0xff]   ;;  %v5843_v47 = vld [vmem:[%s6996_s9 + $0xec] ss:$16 sps:$4 sm:$0xff]  }
  0x7d   :  { %5741 = vmatprep.subr.bf16.mxu1 %v6507_v1  ;;  %5756 = vmatpush3.bf16.msra.mxu0 %v5822_v13  ;;  %v5846_v48 = vld [vmem:[%s6996_s9 + $0xc4] ss:$16 sps:$4 sm:$0xff]   ;;  %v5844_v49 = vld [vmem:[%s6996_s9 + $0xc0] ss:$16 sps:$4 sm:$0xff]   ;;  %v5841_v2 = vld [vmem:[%s6996_s9 + $0xe8] ss:$16 sps:$4 sm:$0xff]  }
  0x7e   :  { %5757 = vmatprep.subr.bf16.mxu0 %v6507_v1  ;;  %v5852_v50 = vld [vmem:[%s6996_s9 + $0xa4] ss:$16 sps:$4 sm:$0xff]   ;;  %v5850_v51 = vld [vmem:[%s6996_s9 + $0xa0] ss:$16 sps:$4 sm:$0xff]   ;;  %v5849_v4 = vld [vmem:[%s6996_s9 + $0xcc] ss:$16 sps:$4 sm:$0xff]  }
  0x7f   :  { %v5858_v52 = vld [vmem:[%s6996_s9 + $0x84] ss:$16 sps:$4 sm:$0xff]   ;;  %v5856_v53 = vld [vmem:[%s6996_s9 + $0x80] ss:$16 sps:$4 sm:$0xff]   ;;  %v5847_v6 = vld [vmem:[%s6996_s9 + $0xc8] ss:$16 sps:$4 sm:$0xff]  }
  0x80   :  { %5742 = vmatpush3.bf16.msra.mxu1 %v5817_v8  ;;  %v5864_v54 = vld [vmem:[%s6996_s9 + $0x64] ss:$16 sps:$4 sm:$0xff]   ;;  %v5862_v55 = vld [vmem:[%s6996_s9 + $0x60] ss:$16 sps:$4 sm:$0xff]   ;;  %v5855_v7 = vld [vmem:[%s6996_s9 + $0xac] ss:$16 sps:$4 sm:$0xff]  }
  0x81   :  { %5743 = vmatprep.subr.bf16.mxu1 %v6507_v1  ;;  %5758 = vmatpush3.bf16.msra.mxu0 %v5823_v14  ;;  %v5870_v56 = vld [vmem:[%s6996_s9 + $0x44] ss:$16 sps:$4 sm:$0xff]   ;;  %v5868_v57 = vld [vmem:[%s6996_s9 + $0x40] ss:$16 sps:$4 sm:$0xff]   ;;  %v5853_v8 = vld [vmem:[%s6996_s9 + $0xa8] ss:$16 sps:$4 sm:$0xff]  }
  0x82   :  { %5759 = vmatprep.subr.bf16.mxu0 %v6507_v1  ;;  %v5876_v58 = vld [vmem:[%s6996_s9 + $0x24] ss:$16 sps:$4 sm:$0xff]   ;;  %v5874_v59 = vld [vmem:[%s6996_s9 + $0x20] ss:$16 sps:$4 sm:$0xff]   ;;  %v5873_v13 = vld [vmem:[%s6996_s9 + $0x4c] ss:$16 sps:$4 sm:$0xff]  }
  0x83   :  { %v5061_v60 = vld [vmem:[#allocation8] ss:$0 sm:$0xff]  ;;  %v5871_v14 = vld [vmem:[%s6996_s9 + $0x48] ss:$16 sps:$4 sm:$0xff]  }
  0x84   :  { %5744 = vmatpush3.bf16.msra.mxu1 %v5818_v9  ;;  %v5861_v9 = vld [vmem:[%s6996_s9 + $0x8c] ss:$16 sps:$4 sm:$0xff]  }
  0x85   :  { %5745 = vmatprep.subr.bf16.mxu1 %v6507_v1  ;;  %5760 = vmatpush3.bf16.msra.mxu0 %v5824_v15  ;;  %v5879_v15 = vld [vmem:[%s6996_s9 + $0x2c] ss:$16 sps:$4 sm:$0xff]  }
  0x86   :  { %5761 = vmatprep.subr.bf16.mxu0 %v6507_v1 }
  0x88   :  { %5746 = vmatpush3.bf16.msra.mxu1 %v5819_v10  ;;  %v5859_v10 = vld [vmem:[%s6996_s9 + $0x88] ss:$16 sps:$4 sm:$0xff]  }
  0x89   :  { %5747 = vmatprep.subr.bf16.mxu1 %v6507_v1  ;;  %5762 = vmatpush3.bf16.msra.mxu0 %v5825_v16  ;;  %v5877_v16 = vld [vmem:[%s6996_s9 + $0x28] ss:$16 sps:$4 sm:$0xff]  }
  0x8a   :  { %5763 = vmatprep.subr.bf16.mxu0 %v6507_v1 }
  0x8c   :  { %5748 = vmatpush3.bf16.msra.mxu1 %v5820_v11  ;;  %v5867_v11 = vld [vmem:[%s6996_s9 + $0x6c] ss:$16 sps:$4 sm:$0xff]  }
  0x8d   :  { %5749 = vmatprep.subr.bf16.mxu1 %v6507_v1  ;;  %5764 = vmatpush3.bf16.msra.mxu0 %v5826_v17  ;;  %v5882_v17 = vld [vmem:[%s6996_s9 + $0x4] ss:$16 sps:$4 sm:$0xff]  }
  0x8e   :  { %5765 = vmatprep.subr.bf16.mxu0 %v6507_v1 }
  0x90   :  { %5750 = vmatpush3.bf16.msra.mxu1 %v5821_v12  ;;  %v5865_v12 = vld [vmem:[%s6996_s9 + $0x68] ss:$16 sps:$4 sm:$0xff]  }
  0x91   :  { %5775 = vmatprep.subr.bf16.mxu1 %v6507_v1  ;;  %5766 = vmatpush3.bf16.msra.mxu0 %v5827_v18  ;;  %v5885_v18 = vld [vmem:[%s6996_s9 + $0xc] ss:$16 sps:$4 sm:$0xff]  }
  0x92   :  { %5767 = vmatprep.subr.bf16.mxu0 %v6507_v1 }
  0x95   :  { %5768 = vmatpush3.bf16.msra.mxu0 %v5828_v27  ;;  %v1067_v27 = vld [vmem:[#allocation14 + $0x5e0] sm:$0xff] }
  0x96   :  { %5769 = vmatprep.subr.bf16.mxu0 %v6507_v1 }
  0x99   :  { %5770 = vmatpush3.bf16.msra.mxu0 %v5829_v28 }
  0x9a   :  { %789 = vmatprep.subr.bf16.mxu0 %v5840_v46  ;;  %v1047_v46 = vld [vmem:[#allocation14 + $0x540] sm:$0xff] }
 0x13b   :  { %v228_v20 = vpop.f32.mrf.mxu0 }
 0x13c   :  { %v229_v21 = vadd.f32 %v5049_v19, %v228_v20  ;;  %v5880_v19 = vld [vmem:[%s6996_s9] ss:$16 sps:$4 sm:$0xff]   ;;  %v5883_v20 = vld [vmem:[%s6996_s9 + $0x8] ss:$16 sps:$4 sm:$0xff]  }
 0x13d   :  { %v5733_v22 = vpop.f32.mrf.mxu0 }
 0x13e   :  { %v234_v23 = vmax.f32 %v229_v21, 0.0  ;;  %v6509_v21 = vmov 0   ;;  %v935_v22 = vld [vmem:[#allocation14 + $0x1c0] sm:$0xff] }
 0x13f   :  { %v231_v24 = vpop.f32.mrf.mxu0 }
 0x140   :  { %v235_v25 = vpack.c.bf16 %v234_v23, %v234_v23  ;;  %v939_v23 = vld [vmem:[#allocation14 + $0x1e0] sm:$0xff] }
 0x141   :  { %v5734_v26 = vpop.f32.mrf.mxu0  ;;  %v1063_v24 = vld [vmem:[#allocation14 + $0x5c0] sm:$0xff] }
 0x142   :  { %5752 = vmatmul.mubr.bf16.vlgmr.msra.gmra.mxu1 %v235_v25  ;;  %v5167_v25 = vcombine.low %v935_v22, %v939_v23  ;;  %v5168_v26 = vcombine.high %v935_v22, %v939_v23  ;;  %v5295_v28 = vcombine.low %v1063_v24, %v1067_v27  ;;  %v1007_v22 = vld [vmem:[#allocation14 + $0x400] sm:$0xff] }
 0x143   :  { %5791 = vmatprep.mubr.msk.bf16.mxu1 %vm6508_vm0, %v6507_v1  ;;  %5776 = vmatpush3.bf16.msra.mxu1 %v5830_v29  ;;  %v5296_v29 = vcombine.high %v1063_v24, %v1067_v27  ;;  %v1011_v23 = vld [vmem:[#allocation14 + $0x420] sm:$0xff] }
 0x144   :  { %5777 = vmatprep.subr.bf16.mxu1 %v6507_v1  ;;  %v5240_v27 = vcombine.high %v1007_v22, %v1011_v23 }
 0x147   :  { %5778 = vmatpush3.bf16.msra.mxu1 %v5831_v30  ;;  %v5070_v30 = vld [vmem:[#allocation11] ss:$0 sm:$0xff] }
 0x148   :  { %5779 = vmatprep.subr.bf16.mxu1 %v6507_v1 }
 0x14b   :  { %5780 = vmatpush3.bf16.msra.mxu1 %v5832_v31 }
 0x14c   :  { %5781 = vmatprep.subr.bf16.mxu1 %v6507_v1 }
 0x14f   :  { %5782 = vmatpush3.bf16.msra.mxu1 %v5833_v32 }
 0x150   :  { %5783 = vmatprep.subr.bf16.mxu1 %v6507_v1 }
 0x153   :  { %5784 = vmatpush3.bf16.msra.mxu1 %v5834_v33  ;;  %v927_v33 = vld [vmem:[#allocation14 + $0x180] sm:$0xff] }
 0x154   :  { %5785 = vmatprep.subr.bf16.mxu1 %v6507_v1 }
 0x157   :  { %5786 = vmatpush3.bf16.msra.mxu1 %v5835_v34 }
 0x158   :  { %5787 = vmatprep.subr.bf16.mxu1 %v6507_v1 }
 0x15b   :  { %5788 = vmatpush3.bf16.msra.mxu1 %v5836_v43  ;;  %v919_v43 = vld [vmem:[#allocation14 + $0x140] sm:$0xff] }
 0x15c   :  { %5789 = vmatprep.subr.bf16.mxu1 %v6507_v1 }
 0x15f   :  { %5790 = vmatpush3.bf16.msra.mxu1 %v5837_v44 }
 0x160   :  { %830 = vmatprep.subr.bf16.mxu1 %v5843_v47  ;;  %v1051_v47 = vld [vmem:[#allocation14 + $0x560] sm:$0xff] }
 0x202   :  { %v341_v36 = vpop.f32.mrf.mxu1 }
 0x203   :  { %v342_v37 = vadd.f32 %v5052_v35, %v341_v36  ;;  %v931_v35 = vld [vmem:[#allocation14 + $0x1a0] sm:$0xff] }
 0x204   :  { %v5753_v38 = vpop.f32.mrf.mxu1  ;;  %v1055_v36 = vld [vmem:[#allocation14 + $0x580] sm:$0xff] }
 0x205   :  { %v347_v39 = vmax.f32 %v342_v37, 0.0  ;;  %v1059_v37 = vld [vmem:[#allocation14 + $0x5a0] sm:$0xff] }
 0x206   :  { %v344_v40 = vpop.f32.mrf.mxu1 }
 0x207   :  { %v348_v41 = vpack.c.bf16 %v347_v39, %v347_v39 }
 0x208   :  { %v5754_v42 = vpop.f32.mrf.mxu1 }
 0x209   :  { %5772 = vmatmul.mubr.bf16.vlgmr.msra.gmra.mxu0 %v348_v41  ;;  %v5160_v41 = vcombine.high %v927_v33, %v931_v35  ;;  %v5288_v42 = vcombine.high %v1055_v36, %v1059_v37 }
 0x20a   :  { %790 = vmatpush1.bf16.msra.mxu0 %v5838_v45  ;;  %821 = vmatprep.mubr.bf16.mxu0 %v6509_v21  ;;  %v923_v45 = vld [vmem:[#allocation14 + $0x160] sm:$0xff] }
 0x20b   :  { %791 = vmatprep.subr.bf16.mxu0 %v5846_v48  ;;  %v5159_v48 = vcombine.low %v927_v33, %v931_v35  ;;  %v5239_v33 = vcombine.low %v1007_v22, %v1011_v23  ;;  %v943_v22 = vld [vmem:[#allocation14 + $0x200] sm:$0xff] }
 0x20c   :  { %v947_v23 = vld [vmem:[#allocation14 + $0x220] sm:$0xff] }
 0x20e   :  { %792 = vmatpush1.bf16.msra.mxu0 %v5844_v49  ;;  %v5287_v49 = vcombine.low %v1055_v36, %v1059_v37  ;;  %v991_v36 = vld [vmem:[#allocation14 + $0x380] sm:$0xff] }
 0x20f   :  { %793 = vmatprep.subr.bf16.mxu0 %v5852_v50  ;;  %v5152_v50 = vcombine.high %v919_v43, %v923_v45  ;;  %v995_v37 = vld [vmem:[#allocation14 + $0x3a0] sm:$0xff] }
 0x212   :  { %794 = vmatpush1.bf16.msra.mxu0 %v5850_v51  ;;  %v5280_v51 = vcombine.high %v1047_v46, %v1051_v47 }
 0x213   :  { %795 = vmatprep.subr.bf16.mxu0 %v5858_v52  ;;  %v911_v52 = vld [vmem:[#allocation14 + $0x100] sm:$0xff] }
 0x216   :  { %796 = vmatpush1.bf16.msra.mxu0 %v5856_v53  ;;  %v915_v53 = vld [vmem:[#allocation14 + $0x120] sm:$0xff] }
 0x217   :  { %797 = vmatprep.subr.bf16.mxu0 %v5864_v54  ;;  %v1039_v54 = vld [vmem:[#allocation14 + $0x500] sm:$0xff] }
 0x21a   :  { %798 = vmatpush1.bf16.msra.mxu0 %v5862_v55  ;;  %v1043_v55 = vld [vmem:[#allocation14 + $0x520] sm:$0xff] }
 0x21b   :  { %799 = vmatprep.subr.bf16.mxu0 %v5870_v56  ;;  %v5151_v56 = vcombine.low %v919_v43, %v923_v45  ;;  %v987_v45 = vld [vmem:[#allocation14 + $0x360] sm:$0xff] }
 0x21e   :  { %800 = vmatpush1.bf16.msra.mxu0 %v5868_v57  ;;  %v5279_v57 = vcombine.low %v1047_v46, %v1051_v47  ;;  %v1111_v46 = vld [vmem:[#allocation14 + $0x740] sm:$0xff] }
 0x21f   :  { %801 = vmatprep.subr.bf16.mxu0 %v5876_v58  ;;  %v5144_v58 = vcombine.high %v911_v52, %v915_v53  ;;  %v1115_v47 = vld [vmem:[#allocation14 + $0x760] sm:$0xff] }
 0x222   :  { %802 = vmatpush1.bf16.msra.mxu0 %v5874_v59  ;;  %v5272_v59 = vcombine.high %v1039_v54, %v1043_v55 }
 0x223   :  { %803 = vmatprep.subr.bf16.mxu0 %v5882_v17 }
 0x226   :  { %804 = vmatpush1.bf16.msra.mxu0 %v5880_v19 }
 0x227   :  { %2457 = vmatprep.subr.bf16.mxu0 %v5168_v26 }
 0x2c9   :  { %v454_v61 = vpop.f32.mrf.mxu0 }
 0x2ca   :  { %v455_v62 = vadd.f32 %v5061_v60, %v454_v61  ;;  %v903_v60 = vld [vmem:[#allocation14 + $0xc0] sm:$0xff] }
 0x2cb   :  { %v5773_v63 = vpop.f32.mrf.mxu0  ;;  %v907_v61 = vld [vmem:[#allocation14 + $0xe0] sm:$0xff] }
 0x2cc   :  { %v460_v0 = vmax.f32 %v455_v62, 0.0  ;;  %v1031_v62 = vld [vmem:[#allocation14 + $0x4c0] sm:$0xff] }
 0x2cd   :  { %v457_v1 = vpop.f32.mrf.mxu0  ;;  %v1035_v63 = vld [vmem:[#allocation14 + $0x4e0] sm:$0xff] }
 0x2ce   :  { %v461_v3 = vpack.c.bf16 %v460_v0, %v460_v0  ;;  %v5143_v0 = vcombine.low %v911_v52, %v915_v53  ;;  %v5271_v1 = vcombine.low %v1039_v54, %v1043_v55  ;;  %v975_v52 = vld [vmem:[#allocation14 + $0x300] sm:$0xff] }
 0x2cf   :  { %v5774_v5 = vpop.f32.mrf.mxu0  ;;  %v979_v53 = vld [vmem:[#allocation14 + $0x320] sm:$0xff] }
 0x2d0   :  { %5792 = vmatmul.mubr.bf16.vlgmr.msra.gmra.mxu1 %v461_v3  ;;  %v5264_v3 = vcombine.high %v1031_v62, %v1035_v63  ;;  %v899_v5 = vld [vmem:[#allocation14 + $0xa0] sm:$0xff] }
 0x2d1   :  { %831 = vmatpush1.bf16.msra.mxu1 %v5841_v2  ;;  %862 = vmatprep.mubr.bf16.mxu1 %v6509_v21  ;;  %v5136_v2 = vcombine.high %v903_v60, %v907_v61  ;;  %v883_v21 = vld [vmem:[#allocation14 + $0x20] sm:$0xff] }
 0x2d2   :  { %832 = vmatprep.subr.bf16.mxu1 %v5849_v4  ;;  %v895_v4 = vld [vmem:[#allocation14 + $0x80] sm:$0xff] }
 0x2d3   :  { %v1103_v54 = vld [vmem:[#allocation14 + $0x700] sm:$0xff] }
 0x2d4   :  { %v1107_v55 = vld [vmem:[#allocation14 + $0x720] sm:$0xff] }
 0x2d5   :  { %833 = vmatpush1.bf16.msra.mxu1 %v5847_v6  ;;  %v1023_v6 = vld [vmem:[#allocation14 + $0x480] sm:$0xff] }
 0x2d6   :  { %834 = vmatprep.subr.bf16.mxu1 %v5855_v7  ;;  %v1027_v7 = vld [vmem:[#allocation14 + $0x4a0] sm:$0xff] }
 0x2d7   :  { %v5255_v17 = vcombine.low %v1023_v6, %v1027_v7 }
 0x2d9   :  { %835 = vmatpush1.bf16.msra.mxu1 %v5853_v8  ;;  %v5135_v8 = vcombine.low %v903_v60, %v907_v61  ;;  %v967_v60 = vld [vmem:[#allocation14 + $0x2c0] sm:$0xff] }
 0x2da   :  { %836 = vmatprep.subr.bf16.mxu1 %v5861_v9  ;;  %v5263_v9 = vcombine.low %v1031_v62, %v1035_v63  ;;  %v971_v61 = vld [vmem:[#allocation14 + $0x2e0] sm:$0xff] }
 0x2db   :  { %v1095_v62 = vld [vmem:[#allocation14 + $0x6c0] sm:$0xff] }
 0x2dc   :  { %v1099_v63 = vld [vmem:[#allocation14 + $0x6e0] sm:$0xff] }
 0x2dd   :  { %837 = vmatpush1.bf16.msra.mxu1 %v5859_v10  ;;  %v5128_v10 = vcombine.high %v895_v4, %v899_v5 }
 0x2de   :  { %838 = vmatprep.subr.bf16.mxu1 %v5867_v11  ;;  %v5256_v11 = vcombine.high %v1023_v6, %v1027_v7  ;;  %v1087_v6 = vld [vmem:[#allocation14 + $0x680] sm:$0xff] }
 0x2df   :  { %v1091_v7 = vld [vmem:[#allocation14 + $0x6a0] sm:$0xff] }
 0x2e1   :  { %839 = vmatpush1.bf16.msra.mxu1 %v5865_v12  ;;  %v887_v12 = vld [vmem:[#allocation14 + $0x40] sm:$0xff] }
 0x2e2   :  { %840 = vmatprep.subr.bf16.mxu1 %v5873_v13  ;;  %v891_v13 = vld [vmem:[#allocation14 + $0x60] sm:$0xff] }
 0x2e3   :  { %v5119_v24 = vcombine.low %v887_v12, %v891_v13 }
 0x2e5   :  { %841 = vmatpush1.bf16.msra.mxu1 %v5871_v14  ;;  %v1015_v14 = vld [vmem:[#allocation14 + $0x440] sm:$0xff] }
 0x2e6   :  { %842 = vmatprep.subr.bf16.mxu1 %v5879_v15  ;;  %v1019_v15 = vld [vmem:[#allocation14 + $0x460] sm:$0xff] }
 0x2e7   :  { %v5248_v19 = vcombine.high %v1015_v14, %v1019_v15 }
 0x2e9   :  { %843 = vmatpush1.bf16.msra.mxu1 %v5877_v16  ;;  %v5127_v16 = vcombine.low %v895_v4, %v899_v5  ;;  %v959_v4 = vld [vmem:[#allocation14 + $0x280] sm:$0xff] }
 0x2ea   :  { %844 = vmatprep.subr.bf16.mxu1 %v5885_v18  ;;  %v5120_v18 = vcombine.high %v887_v12, %v891_v13  ;;  %v963_v5 = vld [vmem:[#allocation14 + $0x2a0] sm:$0xff]  ;;  %v5319_v13 = vcombine.low %v1087_v6, %v1091_v7 }
 0x2eb   :  { %v5191_v12 = vcombine.low %v959_v4, %v963_v5 }
 0x2ed   :  { %845 = vmatpush1.bf16.msra.mxu1 %v5883_v20  ;;  %v879_v20 = vld [vmem:[#allocation14] sm:$0xff] }
 0x2ee   :  { %2498 = vmatprep.subr.bf16.mxu1 %v5296_v29  ;;  %v5112_v26 = vcombine.high %v879_v20, %v883_v21  ;;  %v1003_v29 = vld [vmem:[#allocation14 + $0x3e0] sm:$0xff] }
 0x390   :  { %v567_v31 = vpop.f32.mrf.mxu1 }
 0x391   :  { %v568_v32 = vadd.f32 %v5070_v30, %v567_v31  ;;  %v1127_v30 = vld [vmem:[#allocation14 + $0x7c0] sm:$0xff] }
 0x392   :  { %v5793_v34 = vpop.f32.mrf.mxu1  ;;  %v1131_v31 = vld [vmem:[#allocation14 + $0x7e0] sm:$0xff] }
 0x393   :  { %v573_v38 = vmax.f32 %v568_v32, 0.0  ;;  %v5111_v32 = vcombine.low %v879_v20, %v883_v21  ;;  %v5360_v35 = vcombine.high %v1127_v30, %v1131_v31 }
 0x394   :  { %v570_v39 = vpop.f32.mrf.mxu1 }
 0x395   :  { %v574_v40 = vpack.c.bf16 %v573_v38, %v573_v38  ;;  %v1119_v38 = vld [vmem:[#allocation14 + $0x780] sm:$0xff] }
 0x396   :  { %v5794_v44 = vpop.f32.mrf.mxu1  ;;  %v1123_v39 = vld [vmem:[#allocation14 + $0x7a0] sm:$0xff] }
 0x397   :  { %822 = vmatmul.mubr.bf16.vlgmr.msra.gmra.mxu0 %v574_v40  ;;  %863 = vmatmul.mubr.bf16.vlgmr.msra.gmra.mxu1 %v574_v40  ;;  %v5352_v43 = vcombine.high %v1119_v38, %v1123_v39  ;;  %v983_v44 = vld [vmem:[#allocation14 + $0x340] sm:$0xff] }
 0x398   :  { %2458 = vmatpush1.bf16.msra.mxu0 %v5167_v25  ;;  %2499 = vmatpush1.bf16.msra.mxu1 %v5295_v28  ;;  %v5247_v25 = vcombine.low %v1015_v14, %v1019_v15  ;;  %v999_v28 = vld [vmem:[#allocation14 + $0x3c0] sm:$0xff] }
 0x399   :  { %2459 = vmatprep.subr.bf16.mxu0 %v5160_v41  ;;  %2500 = vmatprep.subr.bf16.mxu1 %v5288_v42  ;;  %v5232_v34 = vcombine.high %v999_v28, %v1003_v29  ;;  %v5231_v40 = vcombine.low %v999_v28, %v1003_v29  ;;  %v5359_v41 = vcombine.low %v1127_v30, %v1131_v31  ;;  %v951_v14 = vld [vmem:[#allocation14 + $0x240] sm:$0xff]  ;;  %v936_v30 = vld [vmem:[#allocation14 + $0x1c8] sm:$0xff] }
 0x39a   :  { %v5224_v42 = vcombine.high %v991_v36, %v995_v37  ;;  %v955_v15 = vld [vmem:[#allocation14 + $0x260] sm:$0xff]  ;;  %v940_v31 = vld [vmem:[#allocation14 + $0x1e8] sm:$0xff] }
 0x39c   :  { %2460 = vmatpush1.bf16.msra.mxu0 %v5159_v48  ;;  %2501 = vmatpush1.bf16.msra.mxu1 %v5287_v49  ;;  %v5223_v48 = vcombine.low %v991_v36, %v995_v37  ;;  %v5351_v49 = vcombine.low %v1119_v38, %v1123_v39  ;;  %v609_v38 = vlaneseq }
 0x39d   :  { %2461 = vmatprep.subr.bf16.mxu0 %v5152_v50  ;;  %2502 = vmatprep.subr.bf16.mxu1 %v5280_v51  ;;  %v5216_v50 = vcombine.high %v983_v44, %v987_v45  ;;  %v5344_v51 = vcombine.high %v1111_v46, %v1115_v47 }
 0x39e   :  { %v6768_v39 = vshrl.u32 %v609_v38, 7  ;;  %v1028_v38 = vld [vmem:[#allocation14 + $0x4a8] sm:$0xff] }
 0x3a0   :  { %2462 = vmatpush1.bf16.msra.mxu0 %v5151_v56  ;;  %2503 = vmatpush1.bf16.msra.mxu1 %v5279_v57  ;;  %v5215_v56 = vcombine.low %v983_v44, %v987_v45  ;;  %v5343_v57 = vcombine.low %v1111_v46, %v1115_v47  ;;  %v6780_v44 = vsub.s32 3, %v6768_v39 }
 0x3a1   :  { %2463 = vmatprep.subr.bf16.mxu0 %v5144_v58  ;;  %2504 = vmatprep.subr.bf16.mxu1 %v5272_v59  ;;  %v5208_v58 = vcombine.high %v975_v52, %v979_v53  ;;  %v5336_v59 = vcombine.high %v1103_v54, %v1107_v55 }
 0x3a4   :  { %2464 = vmatpush1.bf16.msra.mxu0 %v5143_v0  ;;  %2505 = vmatpush1.bf16.msra.mxu1 %v5271_v1  ;;  %v5207_v0 = vcombine.low %v975_v52, %v979_v53  ;;  %v5335_v1 = vcombine.low %v1103_v54, %v1107_v55 }
 0x3a5   :  { %2465 = vmatprep.subr.bf16.mxu0 %v5136_v2  ;;  %2506 = vmatprep.subr.bf16.mxu1 %v5264_v3  ;;  %v5200_v2 = vcombine.high %v967_v60, %v971_v61  ;;  %v5328_v3 = vcombine.high %v1095_v62, %v1099_v63 }
 0x3a8   :  { %2466 = vmatpush1.bf16.msra.mxu0 %v5135_v8  ;;  %2507 = vmatpush1.bf16.msra.mxu1 %v5263_v9  ;;  %v5199_v8 = vcombine.low %v967_v60, %v971_v61  ;;  %v5327_v9 = vcombine.low %v1095_v62, %v1099_v63  ;;  %v928_v63 = vld [vmem:[#allocation14 + $0x188] sm:$0xff] }
 0x3a9   :  { %2467 = vmatprep.subr.bf16.mxu0 %v5128_v10  ;;  %2508 = vmatprep.subr.bf16.mxu1 %v5256_v11  ;;  %v5192_v10 = vcombine.high %v959_v4, %v963_v5  ;;  %v5320_v11 = vcombine.high %v1087_v6, %v1091_v7  ;;  %v1060_v4 = vld [vmem:[#allocation14 + $0x5a8] sm:$0xff] }
 0x3ac   :  { %2468 = vmatpush1.bf16.msra.mxu0 %v5127_v16  ;;  %2509 = vmatpush1.bf16.msra.mxu1 %v5255_v17  ;;  %v1079_v16 = vld [vmem:[#allocation14 + $0x640] sm:$0xff]  ;;  %v5184_v17 = vcombine.high %v951_v14, %v955_v15 }
 0x3ad   :  { %2469 = vmatprep.subr.bf16.mxu0 %v5120_v18  ;;  %2510 = vmatprep.subr.bf16.mxu1 %v5248_v19  ;;  %v1083_v18 = vld [vmem:[#allocation14 + $0x660] sm:$0xff]  ;;  %v5183_v19 = vcombine.low %v951_v14, %v955_v15  ;;  %v1052_v14 = vld [vmem:[#allocation14 + $0x568] sm:$0xff] }
 0x3ae   :  { %v5311_v20 = vcombine.low %v1079_v16, %v1083_v18  ;;  %v5312_v21 = vcombine.high %v1079_v16, %v1083_v18 }
 0x3b0   :  { %2470 = vmatpush1.bf16.msra.mxu0 %v5119_v24  ;;  %2511 = vmatpush1.bf16.msra.mxu1 %v5247_v25  ;;  %v1071_v24 = vld [vmem:[#allocation14 + $0x600] sm:$0xff]  ;;  %v5176_v25 = vcombine.high %v943_v22, %v947_v23 }
 0x3b1   :  { %2471 = vmatprep.subr.bf16.mxu0 %v5112_v26  ;;  %2512 = vmatprep.subr.bf16.mxu1 %v5240_v27  ;;  %v1075_v26 = vld [vmem:[#allocation14 + $0x620] sm:$0xff]  ;;  %v5175_v27 = vcombine.low %v943_v22, %v947_v23  ;;  %v1044_v22 = vld [vmem:[#allocation14 + $0x528] sm:$0xff] }
 0x3b2   :  { %v5303_v28 = vcombine.low %v1071_v24, %v1075_v26  ;;  %v5304_v29 = vcombine.high %v1071_v24, %v1075_v26 }
 0x3b4   :  { %2472 = vmatpush1.bf16.msra.mxu0 %v5111_v32  ;;  %2513 = vmatpush1.bf16.msra.mxu1 %v5239_v33  ;;  %v1064_v32 = vld [vmem:[#allocation14 + $0x5c8] sm:$0xff]  ;;  %v5170_v33 = vcombine.high %v936_v30, %v940_v31 }
 0x3b5   :  { %2473 = vmatprep.subr.bf16.mxu0 %v5232_v34  ;;  %2514 = vmatprep.subr.bf16.mxu1 %v5360_v35  ;;  %v1068_v34 = vld [vmem:[#allocation14 + $0x5e8] sm:$0xff]  ;;  %v5169_v35 = vcombine.low %v936_v30, %v940_v31 }
 0x3b6   :  { %v5297_v36 = vcombine.low %v1064_v32, %v1068_v34  ;;  %v5298_v37 = vcombine.high %v1064_v32, %v1068_v34  ;;  %v1036_v30 = vld [vmem:[#allocation14 + $0x4e8] sm:$0xff] }
 0x3b8   :  { %2474 = vmatpush2.bf16.msra.mxu0 %v5231_v40  ;;  %2515 = vmatpush2.bf16.msra.mxu1 %v5359_v41  ;;  %v6771_v40 = vsub.s32 0, %v6768_v39  ;;  %v6774_v41 = vsub.s32 2, %v6768_v39 }
 0x3b9   :  { %2475 = vmatprep.subr.bf16.mxu0 %v5224_v42  ;;  %2516 = vmatprep.subr.bf16.mxu1 %v5352_v43  ;;  %v607_v42 = vld [vmem:[#allocation13] sm:$0xf]  ;;  %v6777_v43 = vsub.s32 1, %v6768_v39 }
 0x3ba   :  { %v612_v45 = vrot.slane %v607_v42, %v6771_v40  ;;  %v620_v46 = vrot.slane %v607_v42, %v6774_v41 }
 0x3bb   :  { %v616_v47 = vrot.slane %v607_v42, %v6777_v43 }
 0x3bc   :  { %2476 = vmatpush2.bf16.msra.mxu0 %v5223_v48  ;;  %2517 = vmatpush2.bf16.msra.mxu1 %v5351_v49  ;;  %v624_v48 = vrot.slane %v607_v42, %v6780_v44 }
 0x3bd   :  { %2477 = vmatprep.subr.bf16.mxu0 %v5216_v50  ;;  %2518 = vmatprep.subr.bf16.mxu1 %v5344_v51 }
 0x3c0   :  { %2478 = vmatpush2.bf16.msra.mxu0 %v5215_v56  ;;  %2519 = vmatpush2.bf16.msra.mxu1 %v5343_v57 }
 0x3c1   :  { %2479 = vmatprep.subr.bf16.mxu0 %v5208_v58  ;;  %2520 = vmatprep.subr.bf16.mxu1 %v5336_v59 }
 0x3c4   :  { %2480 = vmatpush2.bf16.msra.mxu0 %v5207_v0  ;;  %2521 = vmatpush2.bf16.msra.mxu1 %v5335_v1 }
 0x3c5   :  { %2481 = vmatprep.subr.bf16.mxu0 %v5200_v2  ;;  %2522 = vmatprep.subr.bf16.mxu1 %v5328_v3  ;;  %v932_v2 = vld [vmem:[#allocation14 + $0x1a8] sm:$0xff] }
 0x3c6   :  { %v1056_v3 = vld [vmem:[#allocation14 + $0x588] sm:$0xff]  ;;  %v5161_v15 = vcombine.low %v928_v63, %v932_v2 }
 0x3c7   :  { %v5289_v16 = vcombine.low %v1056_v3, %v1060_v4 }
 0x3c8   :  { %2482 = vmatpush2.bf16.msra.mxu0 %v5199_v8  ;;  %2523 = vmatpush2.bf16.msra.mxu1 %v5327_v9  ;;  %v920_v9 = vld [vmem:[#allocation14 + $0x148] sm:$0xff] }
 0x3c9   :  { %2483 = vmatprep.subr.bf16.mxu0 %v5192_v10  ;;  %2524 = vmatprep.subr.bf16.mxu1 %v5320_v11  ;;  %v5162_v10 = vcombine.high %v928_v63, %v932_v2  ;;  %v5290_v11 = vcombine.high %v1056_v3, %v1060_v4  ;;  %v1128_v2 = vld [vmem:[#allocation14 + $0x7c8] sm:$0xff] }
 0x3ca   :  { %v1132_v3 = vld [vmem:[#allocation14 + $0x7e8] sm:$0xff] }
 0x3cc   :  { %2484 = vmatpush2.bf16.msra.mxu0 %v5191_v12  ;;  %2525 = vmatpush2.bf16.msra.mxu1 %v5319_v13  ;;  %v924_v12 = vld [vmem:[#allocation14 + $0x168] sm:$0xff] }
 0x3cd   :  { %2485 = vmatprep.subr.bf16.mxu0 %v5184_v17  ;;  %2526 = vmatprep.subr.bf16.mxu1 %v5312_v21  ;;  %v1048_v13 = vld [vmem:[#allocation14 + $0x548] sm:$0xff]  ;;  %v5154_v17 = vcombine.high %v920_v9, %v924_v12  ;;  %v5153_v23 = vcombine.low %v920_v9, %v924_v12 }
 0x3ce   :  { %v5282_v18 = vcombine.high %v1048_v13, %v1052_v14  ;;  %v1040_v21 = vld [vmem:[#allocation14 + $0x508] sm:$0xff]  ;;  %v5281_v24 = vcombine.low %v1048_v13, %v1052_v14 }
 0x3cf   :  { %v5274_v26 = vcombine.high %v1040_v21, %v1044_v22  ;;  %v5273_v32 = vcombine.low %v1040_v21, %v1044_v22  ;;  %v992_v12 = vld [vmem:[#allocation14 + $0x388] sm:$0xff] }
 0x3d0   :  { %2486 = vmatpush2.bf16.msra.mxu0 %v5183_v19  ;;  %2527 = vmatpush2.bf16.msra.mxu1 %v5311_v20  ;;  %v912_v19 = vld [vmem:[#allocation14 + $0x108] sm:$0xff] }
 0x3d1   :  { %2487 = vmatprep.subr.bf16.mxu0 %v5176_v25  ;;  %2528 = vmatprep.subr.bf16.mxu1 %v5304_v29  ;;  %v916_v20 = vld [vmem:[#allocation14 + $0x128] sm:$0xff] }
 0x3d2   :  { %v5146_v25 = vcombine.high %v912_v19, %v916_v20  ;;  %v1032_v29 = vld [vmem:[#allocation14 + $0x4c8] sm:$0xff]  ;;  %v5145_v31 = vcombine.low %v912_v19, %v916_v20 }
 0x3d3   :  { %v5266_v34 = vcombine.high %v1032_v29, %v1036_v30  ;;  %v996_v13 = vld [vmem:[#allocation14 + $0x3a8] sm:$0xff] }
 0x3d4   :  { %2488 = vmatpush2.bf16.msra.mxu0 %v5175_v27  ;;  %2529 = vmatpush2.bf16.msra.mxu1 %v5303_v28  ;;  %v904_v27 = vld [vmem:[#allocation14 + $0xc8] sm:$0xff] }
 0x3d5   :  { %2539 = vmatprep.subr.bf16.mxu0 %v5170_v33  ;;  %2580 = vmatprep.subr.bf16.mxu1 %v5298_v37  ;;  %v908_v28 = vld [vmem:[#allocation14 + $0xe8] sm:$0xff] }
 0x3d6   :  { %v5138_v33 = vcombine.high %v904_v27, %v908_v28  ;;  %v1024_v37 = vld [vmem:[#allocation14 + $0x488] sm:$0xff]  ;;  %v5137_v42 = vcombine.low %v904_v27, %v908_v28 }
 0x3d7   :  { %v1120_v14 = vld [vmem:[#allocation14 + $0x788] sm:$0xff] }
 0x3d8   :  { %v984_v20 = vld [vmem:[#allocation14 + $0x348] sm:$0xff] }
 0x3d9   :  { %v988_v21 = vld [vmem:[#allocation14 + $0x368] sm:$0xff] }
 0x3da   :  { %v1112_v22 = vld [vmem:[#allocation14 + $0x748] sm:$0xff] }
 0x3db   :  { %v976_v28 = vld [vmem:[#allocation14 + $0x308] sm:$0xff] }
 0x457   :  { %v823_v49 = vpop.f32.mrf.mxu0  ;;  %v864_v50 = vpop.f32.mrf.mxu1 }
 0x458   :  { %v824_v51 = vadd.f32 %v823_v49, %v612_v45  ;;  %v865_v52 = vadd.f32 %v864_v50, %v620_v46  ;;  %v5265_v45 = vcombine.low %v1032_v29, %v1036_v30  ;;  %v892_v49 = vld [vmem:[#allocation14 + $0x68] sm:$0xff] }
 0x459   :  { %v825_v53 = vpop.f32.mrf.mxu0  ;;  %v866_v54 = vpop.f32.mrf.mxu1  ;;  %v1016_v50 = vld [vmem:[#allocation14 + $0x448] sm:$0xff] }
 0x45a   :  { %v826_v55 = vadd.f32 %v825_v53, %v616_v47  ;;  %v867_v56 = vadd.f32 %v866_v54, %v624_v48  ;;  %v871_v57 = vmax.f32 %v824_v51, 0.0  ;;  %v873_v58 = vmax.f32 %v865_v52, 0.0  ;;  %v888_v48 = vld [vmem:[#allocation14 + $0x48] sm:$0xff] }
 0x45b   :  { %v827_v59 = vpop.f32.mrf.mxu0  ;;  %v868_v60 = vpop.f32.mrf.mxu1  ;;  %v5258_v47 = vcombine.high %v1024_v37, %v1028_v38  ;;  %v1020_v51 = vld [vmem:[#allocation14 + $0x468] sm:$0xff]  ;;  %v5257_v53 = vcombine.low %v1024_v37, %v1028_v38  ;;  %v5122_v54 = vcombine.high %v888_v48, %v892_v49 }
 0x45c   :  { %v872_v61 = vmax.f32 %v826_v55, 0.0  ;;  %v874_v62 = vmax.f32 %v867_v56, 0.0  ;;  %v6790_v7 = vpack.c.bf16 %v871_v57, %v871_v57  ;;  %v6792_v8 = vpack.c.bf16 %v873_v58, %v873_v58  ;;  %v880_v56 = vld [vmem:[#allocation14 + $0x8] sm:$0xff] }
 0x45d   :  { %v828_v0 = vpop.f32.mrf.mxu0  ;;  %v869_v1 = vpop.f32.mrf.mxu1  ;;  %v5250_v55 = vcombine.high %v1016_v50, %v1020_v51  ;;  %v884_v57 = vld [vmem:[#allocation14 + $0x28] sm:$0xff]  ;;  %v5121_v60 = vcombine.low %v888_v48, %v892_v49 }
 0x45e   :  { %v6786_v5 = vpack.c.bf16 %v872_v61, %v872_v61  ;;  %v6788_v6 = vpack.c.bf16 %v874_v62, %v874_v62  ;;  %v1008_v58 = vld [vmem:[#allocation14 + $0x408] sm:$0xff]  ;;  %v5249_v61 = vcombine.low %v1016_v50, %v1020_v51  ;;  %v5114_v62 = vcombine.high %v880_v56, %v884_v57 }
 0x45f   :  { %v1012_v59 = vld [vmem:[#allocation14 + $0x428] sm:$0xff]  ;;  %v5113_v4 = vcombine.low %v880_v56, %v884_v57 }
 0x460   :  { %2489 = vmatprep.mubr.bf16.mxu0 %v6786_v5  ;;  %2530 = vmatprep.mubr.bf16.mxu1 %v6788_v6  ;;  %v5242_v63 = vcombine.high %v1008_v58, %v1012_v59  ;;  %v1000_v0 = vld [vmem:[#allocation14 + $0x3c8] sm:$0xff]  ;;  %v5241_v9 = vcombine.low %v1008_v58, %v1012_v59 }
 0x461   :  { %2490 = vmatmul.mubr.bf16.vlgmr.msra.gmra.mxu0 %v6790_v7  ;;  %2531 = vmatmul.mubr.bf16.vlgmr.msra.gmra.mxu1 %v6792_v8  ;;  %v1004_v1 = vld [vmem:[#allocation14 + $0x3e8] sm:$0xff] }
 0x462   :  { %2540 = vmatpush1.bf16.msra.mxu0 %v5169_v35  ;;  %2581 = vmatpush1.bf16.msra.mxu1 %v5297_v36  ;;  %v896_v35 = vld [vmem:[#allocation14 + $0x88] sm:$0xff] }
 0x463   :  { %2571 = vmatprep.mubr.bf16.mxu0 %v6786_v5  ;;  %2612 = vmatprep.mubr.bf16.mxu1 %v6788_v6  ;;  %v900_v36 = vld [vmem:[#allocation14 + $0xa8] sm:$0xff] }
 0x464   :  { %2541 = vmatprep.subr.bf16.mxu0 %v5162_v10  ;;  %2582 = vmatprep.subr.bf16.mxu1 %v5290_v11  ;;  %v5130_v46 = vcombine.high %v896_v35, %v900_v36  ;;  %v5129_v52 = vcombine.low %v896_v35, %v900_v36  ;;  %v5234_v10 = vcombine.high %v1000_v0, %v1004_v1  ;;  %v980_v29 = vld [vmem:[#allocation14 + $0x328] sm:$0xff] }
 0x465   :  { %v5362_v11 = vcombine.high %v1128_v2, %v1132_v3  ;;  %v1104_v30 = vld [vmem:[#allocation14 + $0x708] sm:$0xff] }
 0x466   :  { %2542 = vmatpush1.bf16.msra.mxu0 %v5161_v15  ;;  %2583 = vmatpush1.bf16.msra.mxu1 %v5289_v16  ;;  %v1124_v15 = vld [vmem:[#allocation14 + $0x7a8] sm:$0xff]  ;;  %v5233_v16 = vcombine.low %v1000_v0, %v1004_v1 }
 0x467   :  { %2543 = vmatprep.subr.bf16.mxu0 %v5154_v17  ;;  %2584 = vmatprep.subr.bf16.mxu1 %v5282_v18  ;;  %v5361_v17 = vcombine.low %v1128_v2, %v1132_v3  ;;  %v5226_v18 = vcombine.high %v992_v12, %v996_v13  ;;  %v5354_v19 = vcombine.high %v1120_v14, %v1124_v15  ;;  %v968_v36 = vld [vmem:[#allocation14 + $0x2c8] sm:$0xff] }
 0x468   :  { %v972_v37 = vld [vmem:[#allocation14 + $0x2e8] sm:$0xff] }
 0x469   :  { %v1096_v38 = vld [vmem:[#allocation14 + $0x6c8] sm:$0xff] }
 0x46a   :  { %2544 = vmatpush1.bf16.msra.mxu0 %v5153_v23  ;;  %2585 = vmatpush1.bf16.msra.mxu1 %v5281_v24  ;;  %v1116_v23 = vld [vmem:[#allocation14 + $0x768] sm:$0xff]  ;;  %v5225_v24 = vcombine.low %v992_v12, %v996_v13  ;;  %v937_v13 = vld [vmem:[#allocation14 + $0x1d0] sm:$0xff] }
 0x46b   :  { %2545 = vmatprep.subr.bf16.mxu0 %v5146_v25  ;;  %2586 = vmatprep.subr.bf16.mxu1 %v5274_v26  ;;  %v5353_v25 = vcombine.low %v1120_v14, %v1124_v15  ;;  %v5218_v26 = vcombine.high %v984_v20, %v988_v21  ;;  %v5346_v27 = vcombine.high %v1112_v22, %v1116_v23  ;;  %v960_v49 = vld [vmem:[#allocation14 + $0x288] sm:$0xff]  ;;  %v941_v14 = vld [vmem:[#allocation14 + $0x1f0] sm:$0xff] }
 0x46c   :  { %v964_v50 = vld [vmem:[#allocation14 + $0x2a8] sm:$0xff]  ;;  %v1065_v15 = vld [vmem:[#allocation14 + $0x5d0] sm:$0xff] }
 0x46d   :  { %v1088_v51 = vld [vmem:[#allocation14 + $0x688] sm:$0xff] }
 0x46e   :  { %2546 = vmatpush1.bf16.msra.mxu0 %v5145_v31  ;;  %2587 = vmatpush1.bf16.msra.mxu1 %v5273_v32  ;;  %v1108_v31 = vld [vmem:[#allocation14 + $0x728] sm:$0xff]  ;;  %v5217_v32 = vcombine.low %v984_v20, %v988_v21  ;;  %v929_v21 = vld [vmem:[#allocation14 + $0x190] sm:$0xff] }
 0x46f   :  { %2547 = vmatprep.subr.bf16.mxu0 %v5138_v33  ;;  %2588 = vmatprep.subr.bf16.mxu1 %v5266_v34  ;;  %v5345_v33 = vcombine.low %v1112_v22, %v1116_v23  ;;  %v5210_v34 = vcombine.high %v976_v28, %v980_v29  ;;  %v5338_v35 = vcombine.high %v1104_v30, %v1108_v31  ;;  %v952_v57 = vld [vmem:[#allocation14 + $0x248] sm:$0xff]  ;;  %v933_v22 = vld [vmem:[#allocation14 + $0x1b0] sm:$0xff] }
 0x470   :  { %v956_v58 = vld [vmem:[#allocation14 + $0x268] sm:$0xff]  ;;  %v1057_v23 = vld [vmem:[#allocation14 + $0x590] sm:$0xff] }
 0x471   :  { %v1080_v59 = vld [vmem:[#allocation14 + $0x648] sm:$0xff] }
 0x472   :  { %2548 = vmatpush1.bf16.msra.mxu0 %v5137_v42  ;;  %2589 = vmatpush1.bf16.msra.mxu1 %v5265_v45  ;;  %v1100_v42 = vld [vmem:[#allocation14 + $0x6e8] sm:$0xff]  ;;  %v5209_v45 = vcombine.low %v976_v28, %v980_v29  ;;  %v921_v29 = vld [vmem:[#allocation14 + $0x150] sm:$0xff] }
 0x473   :  { %2549 = vmatprep.subr.bf16.mxu0 %v5130_v46  ;;  %2590 = vmatprep.subr.bf16.mxu1 %v5258_v47  ;;  %v5337_v46 = vcombine.low %v1104_v30, %v1108_v31  ;;  %v5202_v47 = vcombine.high %v968_v36, %v972_v37  ;;  %v5330_v48 = vcombine.high %v1096_v38, %v1100_v42  ;;  %v944_v1 = vld [vmem:[#allocation14 + $0x208] sm:$0xff]  ;;  %v925_v30 = vld [vmem:[#allocation14 + $0x170] sm:$0xff] }
 0x474   :  { %v948_v2 = vld [vmem:[#allocation14 + $0x228] sm:$0xff]  ;;  %v1049_v31 = vld [vmem:[#allocation14 + $0x550] sm:$0xff] }
 0x475   :  { %v1072_v3 = vld [vmem:[#allocation14 + $0x608] sm:$0xff] }
 0x476   :  { %2550 = vmatpush1.bf16.msra.mxu0 %v5129_v52  ;;  %2591 = vmatpush1.bf16.msra.mxu1 %v5257_v53  ;;  %v1092_v52 = vld [vmem:[#allocation14 + $0x6a8] sm:$0xff]  ;;  %v5201_v53 = vcombine.low %v968_v36, %v972_v37  ;;  %v913_v37 = vld [vmem:[#allocation14 + $0x110] sm:$0xff] }
 0x477   :  { %2551 = vmatprep.subr.bf16.mxu0 %v5122_v54  ;;  %2592 = vmatprep.subr.bf16.mxu1 %v5250_v55  ;;  %v5329_v54 = vcombine.low %v1096_v38, %v1100_v42  ;;  %v5194_v55 = vcombine.high %v960_v49, %v964_v50  ;;  %v5322_v56 = vcombine.high %v1088_v51, %v1092_v52  ;;  %v917_v38 = vld [vmem:[#allocation14 + $0x130] sm:$0xff] }
 0x478   :  { %v1041_v42 = vld [vmem:[#allocation14 + $0x510] sm:$0xff] }
 0x47a   :  { %2552 = vmatpush1.bf16.msra.mxu0 %v5121_v60  ;;  %2593 = vmatpush1.bf16.msra.mxu1 %v5249_v61  ;;  %v1084_v60 = vld [vmem:[#allocation14 + $0x668] sm:$0xff]  ;;  %v5193_v61 = vcombine.low %v960_v49, %v964_v50  ;;  %v905_v50 = vld [vmem:[#allocation14 + $0xd0] sm:$0xff] }
 0x47b   :  { %2553 = vmatprep.subr.bf16.mxu0 %v5114_v62  ;;  %2594 = vmatprep.subr.bf16.mxu1 %v5242_v63  ;;  %v5321_v62 = vcombine.low %v1088_v51, %v1092_v52  ;;  %v5186_v63 = vcombine.high %v952_v57, %v956_v58  ;;  %v5314_v0 = vcombine.high %v1080_v59, %v1084_v60  ;;  %v909_v51 = vld [vmem:[#allocation14 + $0xf0] sm:$0xff] }
 0x47c   :  { %v1033_v52 = vld [vmem:[#allocation14 + $0x4d0] sm:$0xff] }
 0x47e   :  { %2554 = vmatpush1.bf16.msra.mxu0 %v5113_v4  ;;  %2595 = vmatpush1.bf16.msra.mxu1 %v5241_v9  ;;  %v1076_v4 = vld [vmem:[#allocation14 + $0x628] sm:$0xff]  ;;  %v5185_v9 = vcombine.low %v952_v57, %v956_v58  ;;  %v897_v58 = vld [vmem:[#allocation14 + $0x90] sm:$0xff] }
 0x47f   :  { %2555 = vmatprep.subr.bf16.mxu0 %v5234_v10  ;;  %2596 = vmatprep.subr.bf16.mxu1 %v5362_v11  ;;  %v5313_v10 = vcombine.low %v1080_v59, %v1084_v60  ;;  %v5178_v11 = vcombine.high %v944_v1, %v948_v2  ;;  %v5306_v12 = vcombine.high %v1072_v3, %v1076_v4  ;;  %v901_v59 = vld [vmem:[#allocation14 + $0xb0] sm:$0xff] }
 0x480   :  { %v1025_v60 = vld [vmem:[#allocation14 + $0x490] sm:$0xff] }
 0x482   :  { %2556 = vmatpush2.bf16.msra.mxu0 %v5233_v16  ;;  %2597 = vmatpush2.bf16.msra.mxu1 %v5361_v17  ;;  %v1069_v16 = vld [vmem:[#allocation14 + $0x5f0] sm:$0xff]  ;;  %v5177_v17 = vcombine.low %v944_v1, %v948_v2 }
 0x483   :  { %2557 = vmatprep.subr.bf16.mxu0 %v5226_v18  ;;  %2598 = vmatprep.subr.bf16.mxu1 %v5354_v19  ;;  %v5305_v18 = vcombine.low %v1072_v3, %v1076_v4  ;;  %v5172_v19 = vcombine.high %v937_v13, %v941_v14  ;;  %v5300_v20 = vcombine.high %v1065_v15, %v1069_v16  ;;  %v889_v2 = vld [vmem:[#allocation14 + $0x50] sm:$0xff] }
 0x484   :  { %v893_v3 = vld [vmem:[#allocation14 + $0x70] sm:$0xff] }
 0x485   :  { %v1017_v4 = vld [vmem:[#allocation14 + $0x450] sm:$0xff] }
 0x486   :  { %2558 = vmatpush2.bf16.msra.mxu0 %v5225_v24  ;;  %2599 = vmatpush2.bf16.msra.mxu1 %v5353_v25  ;;  %v1061_v24 = vld [vmem:[#allocation14 + $0x5b0] sm:$0xff]  ;;  %v5171_v25 = vcombine.low %v937_v13, %v941_v14 }
 0x487   :  { %2559 = vmatprep.subr.bf16.mxu0 %v5218_v26  ;;  %2600 = vmatprep.subr.bf16.mxu1 %v5346_v27  ;;  %v5299_v26 = vcombine.low %v1065_v15, %v1069_v16  ;;  %v5164_v27 = vcombine.high %v929_v21, %v933_v22  ;;  %v5292_v28 = vcombine.high %v1057_v23, %v1061_v24  ;;  %v881_v14 = vld [vmem:[#allocation14 + $0x10] sm:$0xff] }
 0x488   :  { %v885_v15 = vld [vmem:[#allocation14 + $0x30] sm:$0xff] }
 0x489   :  { %v1009_v16 = vld [vmem:[#allocation14 + $0x410] sm:$0xff] }
 0x48a   :  { %2560 = vmatpush2.bf16.msra.mxu0 %v5217_v32  ;;  %2601 = vmatpush2.bf16.msra.mxu1 %v5345_v33  ;;  %v1053_v32 = vld [vmem:[#allocation14 + $0x570] sm:$0xff]  ;;  %v5163_v33 = vcombine.low %v929_v21, %v933_v22 }
 0x48b   :  { %2561 = vmatprep.subr.bf16.mxu0 %v5210_v34  ;;  %2602 = vmatprep.subr.bf16.mxu1 %v5338_v35  ;;  %v5291_v34 = vcombine.low %v1057_v23, %v1061_v24  ;;  %v5156_v35 = vcombine.high %v921_v29, %v925_v30  ;;  %v5284_v36 = vcombine.high %v1049_v31, %v1053_v32  ;;  %v1001_v22 = vld [vmem:[#allocation14 + $0x3d0] sm:$0xff] }
 0x48c   :  { %v1005_v23 = vld [vmem:[#allocation14 + $0x3f0] sm:$0xff] }
 0x48d   :  { %v1129_v24 = vld [vmem:[#allocation14 + $0x7d0] sm:$0xff] }
 0x48e   :  { %2562 = vmatpush2.bf16.msra.mxu0 %v5209_v45  ;;  %2603 = vmatpush2.bf16.msra.mxu1 %v5337_v46  ;;  %v1045_v45 = vld [vmem:[#allocation14 + $0x530] sm:$0xff]  ;;  %v5155_v46 = vcombine.low %v921_v29, %v925_v30 }
 0x48f   :  { %2563 = vmatprep.subr.bf16.mxu0 %v5202_v47  ;;  %2604 = vmatprep.subr.bf16.mxu1 %v5330_v48  ;;  %v5283_v47 = vcombine.low %v1049_v31, %v1053_v32  ;;  %v5148_v48 = vcombine.high %v913_v37, %v917_v38  ;;  %v5276_v49 = vcombine.high %v1041_v42, %v1045_v45  ;;  %v993_v30 = vld [vmem:[#allocation14 + $0x390] sm:$0xff] }
 0x490   :  { %v997_v31 = vld [vmem:[#allocation14 + $0x3b0] sm:$0xff] }
 0x491   :  { %v1121_v32 = vld [vmem:[#allocation14 + $0x790] sm:$0xff] }
 0x492   :  { %2564 = vmatpush2.bf16.msra.mxu0 %v5201_v53  ;;  %2605 = vmatpush2.bf16.msra.mxu1 %v5329_v54  ;;  %v1037_v53 = vld [vmem:[#allocation14 + $0x4f0] sm:$0xff]  ;;  %v5147_v54 = vcombine.low %v913_v37, %v917_v38 }
 0x493   :  { %2565 = vmatprep.subr.bf16.mxu0 %v5194_v55  ;;  %2606 = vmatprep.subr.bf16.mxu1 %v5322_v56  ;;  %v5275_v55 = vcombine.low %v1041_v42, %v1045_v45  ;;  %v5140_v56 = vcombine.high %v905_v50, %v909_v51  ;;  %v5268_v57 = vcombine.high %v1033_v52, %v1037_v53  ;;  %v985_v38 = vld [vmem:[#allocation14 + $0x350] sm:$0xff] }
 0x494   :  { %v989_v42 = vld [vmem:[#allocation14 + $0x370] sm:$0xff] }
 0x495   :  { %v1113_v45 = vld [vmem:[#allocation14 + $0x750] sm:$0xff] }
 0x496   :  { %2566 = vmatpush2.bf16.msra.mxu0 %v5193_v61  ;;  %2607 = vmatpush2.bf16.msra.mxu1 %v5321_v62  ;;  %v1029_v61 = vld [vmem:[#allocation14 + $0x4b0] sm:$0xff]  ;;  %v5139_v62 = vcombine.low %v905_v50, %v909_v51 }
 0x497   :  { %2567 = vmatprep.subr.bf16.mxu0 %v5186_v63  ;;  %2608 = vmatprep.subr.bf16.mxu1 %v5314_v0  ;;  %v5267_v63 = vcombine.low %v1033_v52, %v1037_v53  ;;  %v5132_v0 = vcombine.high %v897_v58, %v901_v59  ;;  %v5260_v1 = vcombine.high %v1025_v60, %v1029_v61  ;;  %v977_v51 = vld [vmem:[#allocation14 + $0x310] sm:$0xff] }
 0x498   :  { %v981_v52 = vld [vmem:[#allocation14 + $0x330] sm:$0xff] }
 0x499   :  { %v1105_v53 = vld [vmem:[#allocation14 + $0x710] sm:$0xff] }
 0x49a   :  { %2568 = vmatpush2.bf16.msra.mxu0 %v5185_v9  ;;  %2609 = vmatpush2.bf16.msra.mxu1 %v5313_v10  ;;  %v1021_v9 = vld [vmem:[#allocation14 + $0x470] sm:$0xff]  ;;  %v5131_v10 = vcombine.low %v897_v58, %v901_v59 }
 0x49b   :  { %2569 = vmatprep.subr.bf16.mxu0 %v5178_v11  ;;  %2610 = vmatprep.subr.bf16.mxu1 %v5306_v12  ;;  %v5259_v11 = vcombine.low %v1025_v60, %v1029_v61  ;;  %v5124_v12 = vcombine.high %v889_v2, %v893_v3  ;;  %v5252_v13 = vcombine.high %v1017_v4, %v1021_v9  ;;  %v969_v59 = vld [vmem:[#allocation14 + $0x2d0] sm:$0xff] }
 0x49c   :  { %v973_v60 = vld [vmem:[#allocation14 + $0x2f0] sm:$0xff] }
 0x49d   :  { %v1097_v61 = vld [vmem:[#allocation14 + $0x6d0] sm:$0xff] }
 0x49e   :  { %2570 = vmatpush2.bf16.msra.mxu0 %v5177_v17  ;;  %2611 = vmatpush2.bf16.msra.mxu1 %v5305_v18  ;;  %v1013_v17 = vld [vmem:[#allocation14 + $0x430] sm:$0xff]  ;;  %v5123_v18 = vcombine.low %v889_v2, %v893_v3 }
 0x49f   :  { %2621 = vmatprep.subr.bf16.mxu0 %v5172_v19  ;;  %2662 = vmatprep.subr.bf16.mxu1 %v5300_v20  ;;  %v5251_v19 = vcombine.low %v1017_v4, %v1021_v9  ;;  %v5116_v20 = vcombine.high %v881_v14, %v885_v15  ;;  %v5244_v21 = vcombine.high %v1009_v16, %v1013_v17  ;;  %v961_v3 = vld [vmem:[#allocation14 + $0x290] sm:$0xff] }
 0x4a0   :  { %v965_v4 = vld [vmem:[#allocation14 + $0x2b0] sm:$0xff] }
 0x4a1   :  { %2572 = vmatmul.mubr.bf16.vlgmr.msra.gmra.mxu0 %v6790_v7  ;;  %2613 = vmatmul.mubr.bf16.vlgmr.msra.gmra.mxu1 %v6792_v8  ;;  %v1089_v9 = vld [vmem:[#allocation14 + $0x690] sm:$0xff] }
 0x4a2   :  { %2622 = vmatpush1.bf16.msra.mxu0 %v5171_v25  ;;  %2653 = vmatprep.mubr.bf16.mxu0 %v6786_v5  ;;  %v1133_v25 = vld [vmem:[#allocation14 + $0x7f0] sm:$0xff] }
 0x4a3   :  { %2663 = vmatpush1.bf16.msra.mxu1 %v5299_v26  ;;  %2694 = vmatprep.mubr.bf16.mxu1 %v6788_v6  ;;  %v5115_v26 = vcombine.low %v881_v14, %v885_v15  ;;  %v5364_v29 = vcombine.high %v1129_v24, %v1133_v25  ;;  %v953_v15 = vld [vmem:[#allocation14 + $0x250] sm:$0xff] }
 0x4a4   :  { %2623 = vmatprep.subr.bf16.mxu0 %v5164_v27  ;;  %2664 = vmatprep.subr.bf16.mxu1 %v5292_v28  ;;  %v5243_v27 = vcombine.low %v1009_v16, %v1013_v17  ;;  %v5236_v28 = vcombine.high %v1001_v22, %v1005_v23  ;;  %v957_v16 = vld [vmem:[#allocation14 + $0x270] sm:$0xff] }
 0x4a5   :  { %v1081_v17 = vld [vmem:[#allocation14 + $0x650] sm:$0xff] }
 0x4a6   :  { %2624 = vmatpush1.bf16.msra.mxu0 %v5163_v33  ;;  %v1125_v33 = vld [vmem:[#allocation14 + $0x7b0] sm:$0xff] }
 0x4a7   :  { %2665 = vmatpush1.bf16.msra.mxu1 %v5291_v34  ;;  %2625 = vmatprep.subr.bf16.mxu0 %v5156_v35  ;;  %v5235_v34 = vcombine.low %v1001_v22, %v1005_v23  ;;  %v5363_v35 = vcombine.low %v1129_v24, %v1133_v25  ;;  %v5356_v37 = vcombine.high %v1121_v32, %v1125_v33  ;;  %v945_v23 = vld [vmem:[#allocation14 + $0x210] sm:$0xff] }
 0x4a8   :  { %2666 = vmatprep.subr.bf16.mxu1 %v5284_v36  ;;  %v5228_v36 = vcombine.high %v993_v30, %v997_v31  ;;  %v949_v24 = vld [vmem:[#allocation14 + $0x230] sm:$0xff] }
 0x4a9   :  { %v1073_v25 = vld [vmem:[#allocation14 + $0x610] sm:$0xff] }
 0x4aa   :  { %2626 = vmatpush1.bf16.msra.mxu0 %v5155_v46  ;;  %v1117_v46 = vld [vmem:[#allocation14 + $0x770] sm:$0xff] }
 0x4ab   :  { %2667 = vmatpush1.bf16.msra.mxu1 %v5283_v47  ;;  %2627 = vmatprep.subr.bf16.mxu0 %v5148_v48  ;;  %v5227_v47 = vcombine.low %v993_v30, %v997_v31  ;;  %v5355_v48 = vcombine.low %v1121_v32, %v1125_v33  ;;  %v5348_v50 = vcombine.high %v1113_v45, %v1117_v46  ;;  %v938_v31 = vld [vmem:[#allocation14 + $0x1d8] sm:$0xff] }
 0x4ac   :  { %2668 = vmatprep.subr.bf16.mxu1 %v5276_v49  ;;  %v5220_v49 = vcombine.high %v985_v38, %v989_v42  ;;  %v942_v32 = vld [vmem:[#allocation14 + $0x1f8] sm:$0xff] }
 0x4ad   :  { %v1066_v33 = vld [vmem:[#allocation14 + $0x5d8] sm:$0xff] }
 0x4ae   :  { %2628 = vmatpush1.bf16.msra.mxu0 %v5147_v54  ;;  %v1109_v54 = vld [vmem:[#allocation14 + $0x730] sm:$0xff] }
 0x4af   :  { %2669 = vmatpush1.bf16.msra.mxu1 %v5275_v55  ;;  %2629 = vmatprep.subr.bf16.mxu0 %v5140_v56  ;;  %v5219_v55 = vcombine.low %v985_v38, %v989_v42  ;;  %v5347_v56 = vcombine.low %v1113_v45, %v1117_v46  ;;  %v5340_v58 = vcombine.high %v1105_v53, %v1109_v54  ;;  %v930_v42 = vld [vmem:[#allocation14 + $0x198] sm:$0xff] }
 0x4b0   :  { %2670 = vmatprep.subr.bf16.mxu1 %v5268_v57  ;;  %v5212_v57 = vcombine.high %v977_v51, %v981_v52  ;;  %v934_v45 = vld [vmem:[#allocation14 + $0x1b8] sm:$0xff]  ;;  %v5173_v46 = vcombine.low %v938_v31, %v942_v32 }
 0x4b2   :  { %2630 = vmatpush1.bf16.msra.mxu0 %v5139_v62  ;;  %v1101_v62 = vld [vmem:[#allocation14 + $0x6f0] sm:$0xff] }
 0x4b3   :  { %2671 = vmatpush1.bf16.msra.mxu1 %v5267_v63  ;;  %2631 = vmatprep.subr.bf16.mxu0 %v5132_v0  ;;  %v5211_v63 = vcombine.low %v977_v51, %v981_v52  ;;  %v5339_v0 = vcombine.low %v1105_v53, %v1109_v54  ;;  %v5332_v2 = vcombine.high %v1097_v61, %v1101_v62  ;;  %v922_v51 = vld [vmem:[#allocation14 + $0x158] sm:$0xff] }
 0x4b4   :  { %2672 = vmatprep.subr.bf16.mxu1 %v5260_v1  ;;  %v5204_v1 = vcombine.high %v969_v59, %v973_v60  ;;  %v926_v52 = vld [vmem:[#allocation14 + $0x178] sm:$0xff] }
 0x4b5   :  { %v1050_v54 = vld [vmem:[#allocation14 + $0x558] sm:$0xff] }
 0x4b6   :  { %2632 = vmatpush1.bf16.msra.mxu0 %v5131_v10  ;;  %v1093_v10 = vld [vmem:[#allocation14 + $0x6b0] sm:$0xff] }
 0x4b7   :  { %2673 = vmatpush1.bf16.msra.mxu1 %v5259_v11  ;;  %2633 = vmatprep.subr.bf16.mxu0 %v5124_v12  ;;  %v5203_v11 = vcombine.low %v969_v59, %v973_v60  ;;  %v5331_v12 = vcombine.low %v1097_v61, %v1101_v62  ;;  %v5324_v14 = vcombine.high %v1089_v9, %v1093_v10  ;;  %v914_v60 = vld [vmem:[#allocation14 + $0x118] sm:$0xff] }
 0x4b8   :  { %2674 = vmatprep.subr.bf16.mxu1 %v5252_v13  ;;  %v5196_v13 = vcombine.high %v961_v3, %v965_v4  ;;  %v918_v61 = vld [vmem:[#allocation14 + $0x138] sm:$0xff] }
 0x4b9   :  { %v1042_v62 = vld [vmem:[#allocation14 + $0x518] sm:$0xff] }
 0x4ba   :  { %2634 = vmatpush1.bf16.msra.mxu0 %v5123_v18  ;;  %v1085_v18 = vld [vmem:[#allocation14 + $0x670] sm:$0xff] }
 0x4bb   :  { %2675 = vmatpush1.bf16.msra.mxu1 %v5251_v19  ;;  %2635 = vmatprep.subr.bf16.mxu0 %v5116_v20  ;;  %v5195_v19 = vcombine.low %v961_v3, %v965_v4  ;;  %v5323_v20 = vcombine.low %v1089_v9, %v1093_v10  ;;  %v5316_v22 = vcombine.high %v1081_v17, %v1085_v18  ;;  %v906_v3 = vld [vmem:[#allocation14 + $0xd8] sm:$0xff] }
 0x4bc   :  { %2676 = vmatprep.subr.bf16.mxu1 %v5244_v21  ;;  %v5188_v21 = vcombine.high %v953_v15, %v957_v16  ;;  %v910_v4 = vld [vmem:[#allocation14 + $0xf8] sm:$0xff] }
 0x4bd   :  { %v1034_v9 = vld [vmem:[#allocation14 + $0x4d8] sm:$0xff] }
 0x4be   :  { %2636 = vmatpush1.bf16.msra.mxu0 %v5115_v26  ;;  %v1077_v26 = vld [vmem:[#allocation14 + $0x630] sm:$0xff]  ;;  %v1038_v10 = vld [vmem:[#allocation14 + $0x4f8] sm:$0xff] }
 0x4bf   :  { %2677 = vmatpush1.bf16.msra.mxu1 %v5243_v27  ;;  %2637 = vmatprep.subr.bf16.mxu0 %v5236_v28  ;;  %v5187_v27 = vcombine.low %v953_v15, %v957_v16  ;;  %v5315_v28 = vcombine.low %v1081_v17, %v1085_v18  ;;  %v5308_v30 = vcombine.high %v1073_v25, %v1077_v26  ;;  %v902_v15 = vld [vmem:[#allocation14 + $0xb8] sm:$0xff] }
 0x4c0   :  { %2678 = vmatprep.subr.bf16.mxu1 %v5364_v29  ;;  %v5180_v29 = vcombine.high %v945_v23, %v949_v24  ;;  %v1026_v16 = vld [vmem:[#allocation14 + $0x498] sm:$0xff]  ;;  %v5141_v18 = vcombine.low %v906_v3, %v910_v4 }
 0x4c1   :  { %v1030_v17 = vld [vmem:[#allocation14 + $0x4b8] sm:$0xff] }
 0x4c2   :  { %2638 = vmatpush2.bf16.msra.mxu0 %v5235_v34  ;;  %v1070_v34 = vld [vmem:[#allocation14 + $0x5f8] sm:$0xff] }
 0x4c3   :  { %2679 = vmatpush2.bf16.msra.mxu1 %v5363_v35  ;;  %2639 = vmatprep.subr.bf16.mxu0 %v5228_v36  ;;  %v5179_v35 = vcombine.low %v945_v23, %v949_v24  ;;  %v5307_v36 = vcombine.low %v1073_v25, %v1077_v26  ;;  %v5302_v38 = vcombine.high %v1066_v33, %v1070_v34  ;;  %v894_v23 = vld [vmem:[#allocation14 + $0x78] sm:$0xff] }
 0x4c4   :  { %2680 = vmatprep.subr.bf16.mxu1 %v5356_v37  ;;  %v5174_v37 = vcombine.high %v938_v31, %v942_v32  ;;  %v1018_v24 = vld [vmem:[#allocation14 + $0x458] sm:$0xff] }
 0x4c5   :  { %v1022_v25 = vld [vmem:[#allocation14 + $0x478] sm:$0xff] }
 0x4c6   :  { %2640 = vmatpush2.bf16.msra.mxu0 %v5227_v47  ;;  %v1058_v47 = vld [vmem:[#allocation14 + $0x598] sm:$0xff] }
 0x4c7   :  { %2681 = vmatpush2.bf16.msra.mxu1 %v5355_v48  ;;  %2641 = vmatprep.subr.bf16.mxu0 %v5220_v49  ;;  %v1062_v48 = vld [vmem:[#allocation14 + $0x5b8] sm:$0xff]  ;;  %v5301_v49 = vcombine.low %v1066_v33, %v1070_v34 }
 0x4c8   :  { %2682 = vmatprep.subr.bf16.mxu1 %v5348_v50  ;;  %v5166_v50 = vcombine.high %v930_v42, %v934_v45  ;;  %v5294_v53 = vcombine.high %v1058_v47, %v1062_v48  ;;  %v886_v31 = vld [vmem:[#allocation14 + $0x38] sm:$0xff] }
 0x4c9   :  { %v1010_v32 = vld [vmem:[#allocation14 + $0x418] sm:$0xff] }
 0x4ca   :  { %2642 = vmatpush2.bf16.msra.mxu0 %v5219_v55  ;;  %v1054_v55 = vld [vmem:[#allocation14 + $0x578] sm:$0xff] }
 0x4cb   :  { %2683 = vmatpush2.bf16.msra.mxu1 %v5347_v56  ;;  %2643 = vmatprep.subr.bf16.mxu0 %v5212_v57  ;;  %v5165_v56 = vcombine.low %v930_v42, %v934_v45  ;;  %v5293_v57 = vcombine.low %v1058_v47, %v1062_v48  ;;  %v5286_v59 = vcombine.high %v1050_v54, %v1054_v55  ;;  %v1014_v33 = vld [vmem:[#allocation14 + $0x438] sm:$0xff] }
 0x4cc   :  { %2684 = vmatprep.subr.bf16.mxu1 %v5340_v58  ;;  %v5158_v58 = vcombine.high %v922_v51, %v926_v52  ;;  %v1006_v42 = vld [vmem:[#allocation14 + $0x3f8] sm:$0xff]  ;;  %v5245_v48 = vcombine.low %v1010_v32, %v1014_v33 }
 0x4cd   :  { %v1130_v45 = vld [vmem:[#allocation14 + $0x7d8] sm:$0xff] }
 0x4ce   :  { %2644 = vmatpush2.bf16.msra.mxu0 %v5211_v63  ;;  %v1046_v63 = vld [vmem:[#allocation14 + $0x538] sm:$0xff] }
 0x4cf   :  { %2685 = vmatpush2.bf16.msra.mxu1 %v5339_v0  ;;  %2645 = vmatprep.subr.bf16.mxu0 %v5204_v1  ;;  %v5157_v0 = vcombine.low %v922_v51, %v926_v52  ;;  %v5285_v1 = vcombine.low %v1050_v54, %v1054_v55  ;;  %v994_v51 = vld [vmem:[#allocation14 + $0x398] sm:$0xff] }
 0x4d0   :  { %2686 = vmatprep.subr.bf16.mxu1 %v5332_v2  ;;  %v5150_v2 = vcombine.high %v914_v60, %v918_v61  ;;  %v998_v52 = vld [vmem:[#allocation14 + $0x3b8] sm:$0xff] }
 0x4d1   :  { %v1126_v54 = vld [vmem:[#allocation14 + $0x7b8] sm:$0xff] }
 0x4d2   :  { %2646 = vmatpush2.bf16.msra.mxu0 %v5203_v11  ;;  %v5277_v11 = vcombine.low %v1042_v62, %v1046_v63 }
 0x4d3   :  { %2687 = vmatpush2.bf16.msra.mxu1 %v5331_v12  ;;  %2647 = vmatprep.subr.bf16.mxu0 %v5196_v13  ;;  %v5142_v12 = vcombine.high %v906_v3, %v910_v4  ;;  %v5270_v13 = vcombine.high %v1034_v9, %v1038_v10  ;;  %v982_v3 = vld [vmem:[#allocation14 + $0x338] sm:$0xff] }
 0x4d4   :  { %2688 = vmatprep.subr.bf16.mxu1 %v5324_v14  ;;  %v898_v14 = vld [vmem:[#allocation14 + $0x98] sm:$0xff] }
 0x4d5   :  { %v5133_v26 = vcombine.low %v898_v14, %v902_v15  ;;  %v1106_v4 = vld [vmem:[#allocation14 + $0x718] sm:$0xff] }
 0x4d6   :  { %2648 = vmatpush2.bf16.msra.mxu0 %v5195_v19  ;;  %v5269_v19 = vcombine.low %v1034_v9, %v1038_v10  ;;  %v1110_v9 = vld [vmem:[#allocation14 + $0x738] sm:$0xff] }
 0x4d7   :  { %2689 = vmatpush2.bf16.msra.mxu1 %v5323_v20  ;;  %2649 = vmatprep.subr.bf16.mxu0 %v5188_v21  ;;  %v5134_v20 = vcombine.high %v898_v14, %v902_v15  ;;  %v5262_v21 = vcombine.high %v1026_v16, %v1030_v17  ;;  %v974_v14 = vld [vmem:[#allocation14 + $0x2f8] sm:$0xff] }
 0x4d8   :  { %2690 = vmatprep.subr.bf16.mxu1 %v5316_v22  ;;  %v890_v22 = vld [vmem:[#allocation14 + $0x58] sm:$0xff] }
 0x4d9   :  { %v5125_v34 = vcombine.low %v890_v22, %v894_v23  ;;  %v1098_v15 = vld [vmem:[#allocation14 + $0x6d8] sm:$0xff] }
 0x4da   :  { %2650 = vmatpush2.bf16.msra.mxu0 %v5187_v27  ;;  %v5261_v27 = vcombine.low %v1026_v16, %v1030_v17  ;;  %v1102_v16 = vld [vmem:[#allocation14 + $0x6f8] sm:$0xff] }
 0x4db   :  { %2691 = vmatpush2.bf16.msra.mxu1 %v5315_v28  ;;  %2651 = vmatprep.subr.bf16.mxu0 %v5180_v29  ;;  %v5126_v28 = vcombine.high %v890_v22, %v894_v23  ;;  %v5254_v29 = vcombine.high %v1018_v24, %v1022_v25  ;;  %v966_v22 = vld [vmem:[#allocation14 + $0x2b8] sm:$0xff] }
 0x4dc   :  { %2692 = vmatprep.subr.bf16.mxu1 %v5308_v30  ;;  %v882_v30 = vld [vmem:[#allocation14 + $0x18] sm:$0xff] }
 0x4dd   :  { %v5117_v47 = vcombine.low %v882_v30, %v886_v31  ;;  %v1090_v23 = vld [vmem:[#allocation14 + $0x698] sm:$0xff] }
 0x4de   :  { %2652 = vmatpush2.bf16.msra.mxu0 %v5179_v35  ;;  %v5253_v35 = vcombine.low %v1018_v24, %v1022_v25  ;;  %v1094_v24 = vld [vmem:[#allocation14 + $0x6b8] sm:$0xff] }
 0x4df   :  { %2693 = vmatpush2.bf16.msra.mxu1 %v5307_v36  ;;  %2703 = vmatprep.subr.bf16.mxu0 %v5174_v37  ;;  %v5118_v36 = vcombine.high %v882_v30, %v886_v31  ;;  %v5246_v37 = vcombine.high %v1010_v32, %v1014_v33  ;;  %v958_v30 = vld [vmem:[#allocation14 + $0x278] sm:$0xff] }
 0x4e0   :  { %2744 = vmatprep.subr.bf16.mxu1 %v5302_v38  ;;  %v1002_v38 = vld [vmem:[#allocation14 + $0x3d8] sm:$0xff] }
 0x4e1   :  { %2654 = vmatmul.mubr.bf16.vlgmr.msra.gmra.mxu0 %v6790_v7  ;;  %v5237_v55 = vcombine.low %v1002_v38, %v1006_v42  ;;  %v1082_v31 = vld [vmem:[#allocation14 + $0x658] sm:$0xff] }
 0x4e2   :  { %2695 = vmatmul.mubr.bf16.vlgmr.msra.gmra.mxu1 %v6792_v8  ;;  %2704 = vmatpush1.bf16.msra.mxu0 %v5173_v46  ;;  %v1134_v46 = vld [vmem:[#allocation14 + $0x7f8] sm:$0xff] }
 0x4e3   :  { %2735 = vmatprep.mubr.bf16.mxu0 %v6786_v5  ;;  %2745 = vmatpush1.bf16.msra.mxu1 %v5301_v49  ;;  %v5278_v5 = vcombine.high %v1042_v62, %v1046_v63  ;;  %v5238_v49 = vcombine.high %v1002_v38, %v1006_v42  ;;  %v1118_v62 = vld [vmem:[#allocation14 + $0x778] sm:$0xff]  ;;  %v5229_v63 = vcombine.low %v994_v51, %v998_v52 }
 0x4e4   :  { %2776 = vmatprep.mubr.bf16.mxu1 %v6788_v6  ;;  %2705 = vmatprep.subr.bf16.mxu0 %v5166_v50  ;;  %v5149_v6 = vcombine.low %v914_v60, %v918_v61  ;;  %v5366_v50 = vcombine.high %v1130_v45, %v1134_v46  ;;  %v990_v60 = vld [vmem:[#allocation14 + $0x378] sm:$0xff] }
 0x4e5   :  { %2746 = vmatprep.subr.bf16.mxu1 %v5294_v53  ;;  %v1122_v53 = vld [vmem:[#allocation14 + $0x798] sm:$0xff] }
 0x4e6   :  { %2706 = vmatpush1.bf16.msra.mxu0 %v5165_v56  ;;  %v5365_v56 = vcombine.low %v1130_v45, %v1134_v46  ;;  %v1114_v61 = vld [vmem:[#allocation14 + $0x758] sm:$0xff] }
 0x4e7   :  { %2747 = vmatpush1.bf16.msra.mxu1 %v5293_v57  ;;  %2707 = vmatprep.subr.bf16.mxu0 %v5158_v58  ;;  %v5230_v57 = vcombine.high %v994_v51, %v998_v52  ;;  %v5358_v58 = vcombine.high %v1122_v53, %v1126_v54  ;;  %v1086_v32 = vld [vmem:[#allocation14 + $0x678] sm:$0xff]  ;;  %v5888_v52 = vld [vmem:[#allocation16 + $0xe4] ss:$16 sps:$4 sm:$0xff]  }
 0x4e8   :  { %2748 = vmatprep.subr.bf16.mxu1 %v5286_v59  ;;  %v986_v59 = vld [vmem:[#allocation14 + $0x358] sm:$0xff] }
 0x4e9   :  { %v5221_v10 = vcombine.low %v986_v59, %v990_v60  ;;  %v950_v38 = vld [vmem:[#allocation14 + $0x238] sm:$0xff] }
 0x4ea   :  { %2708 = vmatpush1.bf16.msra.mxu0 %v5157_v0  ;;  %v5357_v0 = vcombine.low %v1122_v53, %v1126_v54  ;;  %v1074_v42 = vld [vmem:[#allocation14 + $0x618] sm:$0xff]  ;;  %v5900_v53 = vld [vmem:[#allocation16 + $0x2e4] ss:$16 sps:$4 sm:$0xff]   ;;  %v5886_v54 = vld [vmem:[#allocation16 + $0xe0] ss:$16 sps:$4 sm:$0xff]  }
 0x4eb   :  { %2749 = vmatpush1.bf16.msra.mxu1 %v5285_v1  ;;  %2709 = vmatprep.subr.bf16.mxu0 %v5150_v2  ;;  %v5222_v1 = vcombine.high %v986_v59, %v990_v60  ;;  %v5350_v2 = vcombine.high %v1114_v61, %v1118_v62  ;;  %v1078_v45 = vld [vmem:[#allocation14 + $0x638] sm:$0xff]  ;;  %v5906_v59 = vld [vmem:[#allocation16 + $0x2c4] ss:$16 sps:$4 sm:$0xff]  }
 0x4ec   :  { %2750 = vmatprep.subr.bf16.mxu1 %v5278_v5  ;;  %v978_v5 = vld [vmem:[#allocation14 + $0x318] sm:$0xff]  ;;  %v5309_v51 = vcombine.low %v1074_v42, %v1078_v45 }
 0x4ed   :  { %v5213_v17 = vcombine.low %v978_v5, %v982_v3 }
 0x4ee   :  { %2710 = vmatpush1.bf16.msra.mxu0 %v5149_v6  ;;  %v5349_v6 = vcombine.low %v1114_v61, %v1118_v62  ;;  %v5889_v62 = vld [vmem:[#allocation16 + $0xc0] ss:$16 sps:$4 sm:$0xff]  }
 0x4ef   :  { %2751 = vmatpush1.bf16.msra.mxu1 %v5277_v11  ;;  %2711 = vmatprep.subr.bf16.mxu0 %v5142_v12  ;;  %v5214_v11 = vcombine.high %v978_v5, %v982_v3  ;;  %v5342_v12 = vcombine.high %v1106_v4, %v1110_v9  ;;  %v5912_v3 = vld [vmem:[#allocation16 + $0x2a4] ss:$16 sps:$4 sm:$0xff]  }
 0x4f0   :  { %2752 = vmatprep.subr.bf16.mxu1 %v5270_v13  ;;  %v970_v13 = vld [vmem:[#allocation14 + $0x2d8] sm:$0xff] }
 0x4f1   :  { %v5205_v25 = vcombine.low %v970_v13, %v974_v14 }
 0x4f2   :  { %2712 = vmatpush1.bf16.msra.mxu0 %v5141_v18  ;;  %v5341_v18 = vcombine.low %v1106_v4, %v1110_v9 }
 0x4f3   :  { %2753 = vmatpush1.bf16.msra.mxu1 %v5269_v19  ;;  %2713 = vmatprep.subr.bf16.mxu0 %v5134_v20  ;;  %v5206_v19 = vcombine.high %v970_v13, %v974_v14  ;;  %v5334_v20 = vcombine.high %v1098_v15, %v1102_v16  ;;  %v5918_v14 = vld [vmem:[#allocation16 + $0x284] ss:$16 sps:$4 sm:$0xff]  }
 0x4f4   :  { %2754 = vmatprep.subr.bf16.mxu1 %v5262_v21  ;;  %v962_v21 = vld [vmem:[#allocation14 + $0x298] sm:$0xff] }
 0x4f5   :  { %v5197_v33 = vcombine.low %v962_v21, %v966_v22 }
 0x4f6   :  { %2714 = vmatpush1.bf16.msra.mxu0 %v5133_v26  ;;  %v5333_v26 = vcombine.low %v1098_v15, %v1102_v16  ;;  %v5895_v16 = vld [vmem:[#allocation16 + $0x80] ss:$16 sps:$4 sm:$0xff]  }
 0x4f7   :  { %2755 = vmatpush1.bf16.msra.mxu1 %v5261_v27  ;;  %2715 = vmatprep.subr.bf16.mxu0 %v5126_v28  ;;  %v5198_v27 = vcombine.high %v962_v21, %v966_v22  ;;  %v5326_v28 = vcombine.high %v1090_v23, %v1094_v24  ;;  %v5909_v21 = vld [vmem:[#allocation16 + $0x44] ss:$16 sps:$4 sm:$0xff]   ;;  %v5922_v22 = vld [vmem:[#allocation16 + $0x260] ss:$16 sps:$4 sm:$0xff]  }
 0x4f8   :  { %2756 = vmatprep.subr.bf16.mxu1 %v5254_v29  ;;  %v954_v29 = vld [vmem:[#allocation14 + $0x258] sm:$0xff] }
 0x4f9   :  { %v5189_v46 = vcombine.low %v954_v29, %v958_v30 }
 0x4fa   :  { %2716 = vmatpush1.bf16.msra.mxu0 %v5125_v34  ;;  %v5325_v34 = vcombine.low %v1090_v23, %v1094_v24  ;;  %v5930_v23 = vld [vmem:[#allocation16 + $0x244] ss:$16 sps:$4 sm:$0xff]   ;;  %v5907_v24 = vld [vmem:[#allocation16 + $0x40] ss:$16 sps:$4 sm:$0xff]  }
 0x4fb   :  { %2757 = vmatpush1.bf16.msra.mxu1 %v5253_v35  ;;  %2717 = vmatprep.subr.bf16.mxu0 %v5118_v36  ;;  %v5190_v35 = vcombine.high %v954_v29, %v958_v30  ;;  %v5318_v36 = vcombine.high %v1082_v31, %v1086_v32  ;;  %v5921_v29 = vld [vmem:[#allocation16 + $0x4] ss:$16 sps:$4 sm:$0xff]   ;;  %v5934_v30 = vld [vmem:[#allocation16 + $0x220] ss:$16 sps:$4 sm:$0xff]  }
 0x4fc   :  { %2758 = vmatprep.subr.bf16.mxu1 %v5246_v37  ;;  %v946_v37 = vld [vmem:[#allocation14 + $0x218] sm:$0xff] }
 0x4fe   :  { %2718 = vmatpush1.bf16.msra.mxu0 %v5117_v47  ;;  %v5317_v47 = vcombine.low %v1082_v31, %v1086_v32  ;;  %v5942_v31 = vld [vmem:[#allocation16 + $0x204] ss:$16 sps:$4 sm:$0xff]   ;;  %v5919_v32 = vld [vmem:[#allocation16] ss:$16 sps:$4 sm:$0xff]  }
 0x4ff   :  { %2759 = vmatpush1.bf16.msra.mxu1 %v5245_v48  ;;  %2719 = vmatprep.subr.bf16.mxu0 %v5238_v49  ;;  %v5182_v48 = vcombine.high %v946_v37, %v950_v38  ;;  %v5310_v49 = vcombine.high %v1074_v42, %v1078_v45  ;;  %v5954_v42 = vld [vmem:[#allocation16 + $0x3c4] ss:$16 sps:$4 sm:$0xff]   ;;  %v5931_v45 = vld [vmem:[#allocation16 + $0x1c0] ss:$16 sps:$4 sm:$0xff]  }
 0x500   :  { %2760 = vmatprep.subr.bf16.mxu1 %v5366_v50  ;;  %v5181_v50 = vcombine.low %v946_v37, %v950_v38  ;;  %v5933_v37 = vld [vmem:[#allocation16 + $0x1c4] ss:$16 sps:$4 sm:$0xff]   ;;  %v5946_v38 = vld [vmem:[#allocation16 + $0x3e0] ss:$16 sps:$4 sm:$0xff]  }
 0x502   :  { %2720 = vmatpush2.bf16.msra.mxu0 %v5237_v55  ;;  %v6811_v55 = vld [vmem:[%s6999_s12] sm:$0xff] }
 0x503   :  { %2761 = vmatpush2.bf16.msra.mxu1 %v5365_v56  ;;  %2721 = vmatprep.subr.bf16.mxu0 %v5230_v57  ;;  %v5891_v56 = vld [vmem:[#allocation16 + $0xc4] ss:$16 sps:$4 sm:$0xff]   ;;  %v5898_v57 = vld [vmem:[#allocation16 + $0x2e0] ss:$16 sps:$4 sm:$0xff]  }
 0x504   :  { %2762 = vmatprep.subr.bf16.mxu1 %v5358_v58  ;;  %v1144_v58 = vrot.slane %v6811_v55, %v6777_v43 }
 0x506   :  { %2722 = vmatpush2.bf16.msra.mxu0 %v5229_v63 }
 0x507   :  { %2763 = vmatpush2.bf16.msra.mxu1 %v5357_v0  ;;  %2723 = vmatprep.subr.bf16.mxu0 %v5222_v1  ;;  %v5894_v1 = vld [vmem:[#allocation16 + $0xa4] ss:$16 sps:$4 sm:$0xff]  }
 0x508   :  { %2764 = vmatprep.subr.bf16.mxu1 %v5350_v2  ;;  %v5904_v2 = vld [vmem:[#allocation16 + $0x2c0] ss:$16 sps:$4 sm:$0xff]  }
 0x50a   :  { %2724 = vmatpush2.bf16.msra.mxu0 %v5221_v10  ;;  %v5892_v10 = vld [vmem:[#allocation16 + $0xa0] ss:$16 sps:$4 sm:$0xff]  }
 0x50b   :  { %2765 = vmatpush2.bf16.msra.mxu1 %v5349_v6  ;;  %2725 = vmatprep.subr.bf16.mxu0 %v5214_v11 }
 0x50c   :  { %2766 = vmatprep.subr.bf16.mxu1 %v5342_v12  ;;  %v5910_v12 = vld [vmem:[#allocation16 + $0x2a0] ss:$16 sps:$4 sm:$0xff]  }
 0x50e   :  { %2726 = vmatpush2.bf16.msra.mxu0 %v5213_v17  ;;  %v5903_v17 = vld [vmem:[#allocation16 + $0x64] ss:$16 sps:$4 sm:$0xff]  }
 0x50f   :  { %2767 = vmatpush2.bf16.msra.mxu1 %v5341_v18  ;;  %2727 = vmatprep.subr.bf16.mxu0 %v5206_v19  ;;  %v5916_v18 = vld [vmem:[#allocation16 + $0x280] ss:$16 sps:$4 sm:$0xff]   ;;  %v5924_v19 = vld [vmem:[#allocation16 + $0x264] ss:$16 sps:$4 sm:$0xff]  }
 0x510   :  { %2768 = vmatprep.subr.bf16.mxu1 %v5334_v20  ;;  %v5901_v20 = vld [vmem:[#allocation16 + $0x60] ss:$16 sps:$4 sm:$0xff]  }
 0x512   :  { %2728 = vmatpush2.bf16.msra.mxu0 %v5205_v25  ;;  %v5915_v25 = vld [vmem:[#allocation16 + $0x24] ss:$16 sps:$4 sm:$0xff]  }
 0x513   :  { %2769 = vmatpush2.bf16.msra.mxu1 %v5333_v26  ;;  %2729 = vmatprep.subr.bf16.mxu0 %v5198_v27  ;;  %v5928_v26 = vld [vmem:[#allocation16 + $0x240] ss:$16 sps:$4 sm:$0xff]   ;;  %v5936_v27 = vld [vmem:[#allocation16 + $0x224] ss:$16 sps:$4 sm:$0xff]  }
 0x514   :  { %2770 = vmatprep.subr.bf16.mxu1 %v5326_v28  ;;  %v5913_v28 = vld [vmem:[#allocation16 + $0x20] ss:$16 sps:$4 sm:$0xff]  }
 0x516   :  { %2730 = vmatpush2.bf16.msra.mxu0 %v5197_v33  ;;  %v5927_v33 = vld [vmem:[#allocation16 + $0x1e4] ss:$16 sps:$4 sm:$0xff]  }
 0x517   :  { %2771 = vmatpush2.bf16.msra.mxu1 %v5325_v34  ;;  %2731 = vmatprep.subr.bf16.mxu0 %v5190_v35  ;;  %v5940_v34 = vld [vmem:[#allocation16 + $0x200] ss:$16 sps:$4 sm:$0xff]   ;;  %v5948_v35 = vld [vmem:[#allocation16 + $0x3e4] ss:$16 sps:$4 sm:$0xff]  }
 0x518   :  { %2772 = vmatprep.subr.bf16.mxu1 %v5318_v36  ;;  %v5925_v36 = vld [vmem:[#allocation16 + $0x1e0] ss:$16 sps:$4 sm:$0xff]  }
 0x51a   :  { %2732 = vmatpush2.bf16.msra.mxu0 %v5189_v46  ;;  %v5939_v46 = vld [vmem:[#allocation16 + $0x1a4] ss:$16 sps:$4 sm:$0xff]  }
 0x51b   :  { %2773 = vmatpush2.bf16.msra.mxu1 %v5317_v47  ;;  %2733 = vmatprep.subr.bf16.mxu0 %v5182_v48  ;;  %v5952_v47 = vld [vmem:[#allocation16 + $0x3c0] ss:$16 sps:$4 sm:$0xff]   ;;  %v5960_v48 = vld [vmem:[#allocation16 + $0x3a4] ss:$16 sps:$4 sm:$0xff]  }
 0x51c   :  { %2774 = vmatprep.subr.bf16.mxu1 %v5310_v49  ;;  %v5937_v49 = vld [vmem:[#allocation16 + $0x1a0] ss:$16 sps:$4 sm:$0xff]  }
 0x51e   :  { %2734 = vmatpush2.bf16.msra.mxu0 %v5181_v50  ;;  %v5945_v50 = vld [vmem:[#allocation16 + $0x184] ss:$16 sps:$4 sm:$0xff]  }
 0x51f   :  { %2775 = vmatpush2.bf16.msra.mxu1 %v5309_v51  ;;  %4359 = vmatprep.subr.bf16.mxu0 %v5888_v52  ;;  %v5958_v51 = vld [vmem:[#allocation16 + $0x3a0] ss:$16 sps:$4 sm:$0xff]   ;;  %v5966_v52 = vld [vmem:[#allocation16 + $0x384] ss:$16 sps:$4 sm:$0xff]  }
 0x520   :  { %4400 = vmatprep.subr.bf16.mxu1 %v5900_v53  ;;  %v5943_v53 = vld [vmem:[#allocation16 + $0x180] ss:$16 sps:$4 sm:$0xff]  }
 0x521   :  { %2736 = vmatmul.mubr.bf16.vlgmr.msra.gmra.mxu0 %v6790_v7  ;;  %v6816_v60 = vpop.f32.mrf.mxu0  ;;  %v6818_v61 = vpop.f32.mrf.mxu1 }
 0x522   :  { %2777 = vmatmul.mubr.bf16.vlgmr.msra.gmra.mxu1 %v6792_v8  ;;  %4360 = vmatpush1.bf16.msra.mxu0 %v5886_v54  ;;  %v5897_v8 = vld [vmem:[#allocation16 + $0x84] ss:$16 sps:$4 sm:$0xff]  }
 0x523   :  { %v2493_v63 = vpop.f32.mrf.mxu0  ;;  %v2534_v0 = vpop.f32.mrf.mxu1  ;;  %4361 = vmatprep.subr.bf16.mxu0 %v5891_v56  ;;  %4401 = vmatpush1.bf16.msra.mxu1 %v5898_v57  ;;  %v5951_v54 = vld [vmem:[#allocation16 + $0x164] ss:$16 sps:$4 sm:$0xff]   ;;  %v5964_v56 = vld [vmem:[#allocation16 + $0x380] ss:$16 sps:$4 sm:$0xff]  }
 0x524   :  { %v2494_v5 = vadd.f32 %v2493_v63, %v1144_v58  ;;  %4402 = vmatprep.subr.bf16.mxu1 %v5906_v59  ;;  %v5972_v57 = vld [vmem:[#allocation16 + $0x364] ss:$16 sps:$4 sm:$0xff]   ;;  %v5949_v58 = vld [vmem:[#allocation16 + $0x160] ss:$16 sps:$4 sm:$0xff]   ;;  %v1140_v59 = vrot.slane %v6811_v55, %v6771_v40 }
 0x525   :  { %v2495_v4 = vpop.f32.mrf.mxu0  ;;  %v2536_v9 = vpop.f32.mrf.mxu1  ;;  %v5970_v63 = vld [vmem:[#allocation16 + $0x360] ss:$16 sps:$4 sm:$0xff]  }
 0x526   :  { %v2535_v7 = vadd.f32 %v2534_v0, %v2494_v5  ;;  %4362 = vmatpush1.bf16.msra.mxu0 %v5889_v62  ;;  %v5957_v62 = vld [vmem:[#allocation16 + $0x144] ss:$16 sps:$4 sm:$0xff]   ;;  %v5961_v9 = vld [vmem:[#allocation16 + $0x120] ss:$16 sps:$4 sm:$0xff]  }
 0x527   :  { %v2496_v6 = vpop.f32.mrf.mxu0  ;;  %v2537_v11 = vpop.f32.mrf.mxu1  ;;  %4363 = vmatprep.subr.bf16.mxu0 %v5894_v1  ;;  %4403 = vmatpush1.bf16.msra.mxu1 %v5904_v2  ;;  %v5975_v0 = vld [vmem:[#allocation16 + $0x344] ss:$16 sps:$4 sm:$0xff]   ;;  %v5955_v1 = vld [vmem:[#allocation16 + $0x140] ss:$16 sps:$4 sm:$0xff]   ;;  %v2492_v2 = vadd.f32 %v6816_v60, %v1140_v59 }
 0x528   :  { %v2786_v13 = vmax.f32 %v2535_v7, 0.0  ;;  %4404 = vmatprep.subr.bf16.mxu1 %v5912_v3  ;;  %v5963_v5 = vld [vmem:[#allocation16 + $0x124] ss:$16 sps:$4 sm:$0xff]   ;;  %v5973_v3 = vld [vmem:[#allocation16 + $0x340] ss:$16 sps:$4 sm:$0xff]  }
 0x529   :  { %v5978_v4 = vld [vmem:[#allocation16 + $0x324] ss:$16 sps:$4 sm:$0xff]   ;;  %v2533_v7 = vadd.f32 %v6818_v61, %v2492_v2  ;;  %v5976_v6 = vld [vmem:[#allocation16 + $0x320] ss:$16 sps:$4 sm:$0xff]  }
 0x52a   :  { %v6821_v15 = vpack.c.bf16 %v2786_v13, %v2786_v13  ;;  %4364 = vmatpush1.bf16.msra.mxu0 %v5892_v10  ;;  %v5969_v10 = vld [vmem:[#allocation16 + $0x104] ss:$16 sps:$4 sm:$0xff]   ;;  %v5979_v60 = vld [vmem:[#allocation16 + $0x300] ss:$16 sps:$4 sm:$0xff]  }
 0x52b   :  { %4365 = vmatprep.subr.bf16.mxu0 %v5897_v8  ;;  %4405 = vmatpush1.bf16.msra.mxu1 %v5910_v12  ;;  %v5981_v11 = vld [vmem:[#allocation16 + $0x304] ss:$16 sps:$4 sm:$0xff]   ;;  %v5967_v8 = vld [vmem:[#allocation16 + $0x100] ss:$16 sps:$4 sm:$0xff]   ;;  %v2785_v12 = vmax.f32 %v2533_v7, 0.0 }
 0x52c   :  { %4391 = vmatprep.mubr.bf16.mxu0 %v6821_v15  ;;  %4406 = vmatprep.subr.bf16.mxu1 %v5918_v14  ;;  %v5984_v13 = vld [vmem:[#allocation16 + $0x4e4] ss:$16 sps:$4 sm:$0xff]   ;;  %v5982_v61 = vld [vmem:[#allocation16 + $0x4e0] ss:$16 sps:$4 sm:$0xff]  }
 0x52d   :  { %v6032_v14 = vld [vmem:[#allocation16 + $0x6e4] ss:$16 sps:$4 sm:$0xff]   ;;  %v6048_v59 = vld [vmem:[#allocation16 + $0x680] ss:$16 sps:$4 sm:$0xff]  }
 0x52e   :  { %4366 = vmatpush1.bf16.msra.mxu0 %v5895_v16  ;;  %v1148_v16 = vrot.slane %v6811_v55, %v6774_v41  ;;  %v6008_v2 = vld [vmem:[#allocation16 + $0x5e4] ss:$16 sps:$4 sm:$0xff]  }
 0x52f   :  { %4367 = vmatprep.subr.bf16.mxu0 %v5903_v17  ;;  %4407 = vmatpush1.bf16.msra.mxu1 %v5916_v18  ;;  %v6830_v17 = vpack.c.bf16 %v2785_v12, %v2785_v12  ;;  %v5987_v18 = vld [vmem:[#allocation16 + $0x4c4] ss:$16 sps:$4 sm:$0xff]   ;;  %v6012_v12 = vld [vmem:[#allocation16 + $0x5a0] ss:$16 sps:$4 sm:$0xff]  }
 0x530   :  { %4408 = vmatprep.subr.bf16.mxu1 %v5924_v19  ;;  %v1152_v19 = vrot.slane %v6811_v55, %v6780_v44  ;;  %v6068_v7 = vld [vmem:[#allocation16 + $0x624] ss:$16 sps:$4 sm:$0xff]  }
 0x532   :  { %4368 = vmatpush1.bf16.msra.mxu0 %v5901_v20 }
 0x533   :  { %4369 = vmatprep.subr.bf16.mxu0 %v5909_v21  ;;  %4409 = vmatpush1.bf16.msra.mxu1 %v5922_v22 }
 0x534   :  { %4410 = vmatprep.subr.bf16.mxu1 %v5930_v23  ;;  %v5985_v23 = vld [vmem:[#allocation16 + $0x4c0] ss:$16 sps:$4 sm:$0xff]  }
 0x536   :  { %4370 = vmatpush1.bf16.msra.mxu0 %v5907_v24 }
 0x537   :  { %4371 = vmatprep.subr.bf16.mxu0 %v5915_v25  ;;  %4411 = vmatpush1.bf16.msra.mxu1 %v5928_v26  ;;  %v5990_v26 = vld [vmem:[#allocation16 + $0x4a4] ss:$16 sps:$4 sm:$0xff]  }
 0x538   :  { %4412 = vmatprep.subr.bf16.mxu1 %v5936_v27 }
 0x53a   :  { %4372 = vmatpush1.bf16.msra.mxu0 %v5913_v28 }
 0x53b   :  { %4373 = vmatprep.subr.bf16.mxu0 %v5921_v29  ;;  %4413 = vmatpush1.bf16.msra.mxu1 %v5934_v30 }
 0x53c   :  { %4414 = vmatprep.subr.bf16.mxu1 %v5942_v31 }
 0x53e   :  { %4374 = vmatpush1.bf16.msra.mxu0 %v5919_v32  ;;  %v5988_v32 = vld [vmem:[#allocation16 + $0x4a0] ss:$16 sps:$4 sm:$0xff]  }
 0x53f   :  { %4375 = vmatprep.subr.bf16.mxu0 %v5927_v33  ;;  %4415 = vmatpush1.bf16.msra.mxu1 %v5940_v34 }
 0x540   :  { %4416 = vmatprep.subr.bf16.mxu1 %v5948_v35 }
 0x542   :  { %4376 = vmatpush2.bf16.msra.mxu0 %v5925_v36  ;;  %v5993_v36 = vld [vmem:[#allocation16 + $0x484] ss:$16 sps:$4 sm:$0xff]  }
 0x543   :  { %4377 = vmatprep.subr.bf16.mxu0 %v5933_v37  ;;  %4417 = vmatpush2.bf16.msra.mxu1 %v5946_v38 }
 0x544   :  { %4418 = vmatprep.subr.bf16.mxu1 %v5954_v42  ;;  %v5991_v42 = vld [vmem:[#allocation16 + $0x480] ss:$16 sps:$4 sm:$0xff]  }
 0x546   :  { %4378 = vmatpush2.bf16.msra.mxu0 %v5931_v45  ;;  %v6030_v45 = vld [vmem:[#allocation16 + $0x6e0] ss:$16 sps:$4 sm:$0xff]  }
 0x547   :  { %4379 = vmatprep.subr.bf16.mxu0 %v5939_v46  ;;  %4419 = vmatpush2.bf16.msra.mxu1 %v5952_v47  ;;  %v5996_v47 = vld [vmem:[#allocation16 + $0x464] ss:$16 sps:$4 sm:$0xff]  }
 0x548   :  { %4420 = vmatprep.subr.bf16.mxu1 %v5960_v48  ;;  %v6038_v48 = vld [vmem:[#allocation16 + $0x6c4] ss:$16 sps:$4 sm:$0xff]  }
 0x54a   :  { %4380 = vmatpush2.bf16.msra.mxu0 %v5937_v49  ;;  %v5994_v49 = vld [vmem:[#allocation16 + $0x460] ss:$16 sps:$4 sm:$0xff]  }
 0x54b   :  { %4381 = vmatprep.subr.bf16.mxu0 %v5945_v50  ;;  %4421 = vmatpush2.bf16.msra.mxu1 %v5958_v51  ;;  %v6036_v50 = vld [vmem:[#allocation16 + $0x6c0] ss:$16 sps:$4 sm:$0xff]   ;;  %v5999_v51 = vld [vmem:[#allocation16 + $0x444] ss:$16 sps:$4 sm:$0xff]  }
 0x54c   :  { %4422 = vmatprep.subr.bf16.mxu1 %v5966_v52  ;;  %v6044_v52 = vld [vmem:[#allocation16 + $0x6a4] ss:$16 sps:$4 sm:$0xff]  }
 0x54e   :  { %4382 = vmatpush2.bf16.msra.mxu0 %v5943_v53  ;;  %v5997_v53 = vld [vmem:[#allocation16 + $0x440] ss:$16 sps:$4 sm:$0xff]  }
 0x54f   :  { %4383 = vmatprep.subr.bf16.mxu0 %v5951_v54  ;;  %4423 = vmatpush2.bf16.msra.mxu1 %v5964_v56  ;;  %v6042_v54 = vld [vmem:[#allocation16 + $0x6a0] ss:$16 sps:$4 sm:$0xff]   ;;  %v6002_v56 = vld [vmem:[#allocation16 + $0x424] ss:$16 sps:$4 sm:$0xff]  }
 0x550   :  { %4424 = vmatprep.subr.bf16.mxu1 %v5972_v57  ;;  %v6050_v57 = vld [vmem:[#allocation16 + $0x684] ss:$16 sps:$4 sm:$0xff]  }
 0x552   :  { %4384 = vmatpush2.bf16.msra.mxu0 %v5949_v58  ;;  %v6000_v58 = vld [vmem:[#allocation16 + $0x420] ss:$16 sps:$4 sm:$0xff]  }
 0x553   :  { %4385 = vmatprep.subr.bf16.mxu0 %v5957_v62  ;;  %4425 = vmatpush2.bf16.msra.mxu1 %v5970_v63  ;;  %v6005_v62 = vld [vmem:[#allocation16 + $0x404] ss:$16 sps:$4 sm:$0xff]  }
 0x554   :  { %4426 = vmatprep.subr.bf16.mxu1 %v5975_v0  ;;  %v6056_v63 = vld [vmem:[#allocation16 + $0x664] ss:$16 sps:$4 sm:$0xff]   ;;  %v6003_v0 = vld [vmem:[#allocation16 + $0x400] ss:$16 sps:$4 sm:$0xff]  }
 0x556   :  { %4386 = vmatpush2.bf16.msra.mxu0 %v5955_v1  ;;  %v6054_v1 = vld [vmem:[#allocation16 + $0x660] ss:$16 sps:$4 sm:$0xff]  }
 0x557   :  { %4387 = vmatprep.subr.bf16.mxu0 %v5963_v5  ;;  %4427 = vmatpush2.bf16.msra.mxu1 %v5973_v3  ;;  %v6062_v5 = vld [vmem:[#allocation16 + $0x644] ss:$16 sps:$4 sm:$0xff]   ;;  %v6006_v3 = vld [vmem:[#allocation16 + $0x5e0] ss:$16 sps:$4 sm:$0xff]  }
 0x558   :  { %4428 = vmatprep.subr.bf16.mxu1 %v5978_v4  ;;  %v6060_v4 = vld [vmem:[#allocation16 + $0x640] ss:$16 sps:$4 sm:$0xff]  }
 0x55a   :  { %4388 = vmatpush2.bf16.msra.mxu0 %v5961_v9  ;;  %v6011_v9 = vld [vmem:[#allocation16 + $0x5c4] ss:$16 sps:$4 sm:$0xff]  }
 0x55b   :  { %4389 = vmatprep.subr.bf16.mxu0 %v5969_v10  ;;  %4429 = vmatpush2.bf16.msra.mxu1 %v5976_v6  ;;  %v6009_v10 = vld [vmem:[#allocation16 + $0x5c0] ss:$16 sps:$4 sm:$0xff]  }
 0x55c   :  { %4430 = vmatprep.subr.bf16.mxu1 %v5981_v11  ;;  %v6066_v6 = vld [vmem:[#allocation16 + $0x620] ss:$16 sps:$4 sm:$0xff]   ;;  %v6014_v11 = vld [vmem:[#allocation16 + $0x5a4] ss:$16 sps:$4 sm:$0xff]  }
 0x55e   :  { %4390 = vmatpush2.bf16.msra.mxu0 %v5967_v8  ;;  %v6074_v8 = vld [vmem:[#allocation16 + $0x604] ss:$16 sps:$4 sm:$0xff]  }
 0x55f   :  { %4431 = vmatpush2.bf16.msra.mxu1 %v5979_v60  ;;  %4441 = vmatprep.subr.bf16.mxu0 %v5984_v13  ;;  %v6072_v60 = vld [vmem:[#allocation16 + $0x600] ss:$16 sps:$4 sm:$0xff]   ;;  %v6017_v13 = vld [vmem:[#allocation16 + $0x584] ss:$16 sps:$4 sm:$0xff]  }
 0x560   :  { %4482 = vmatprep.subr.bf16.mxu1 %v6032_v14  ;;  %v6080_v14 = vld [vmem:[#allocation16 + $0x7e4] ss:$16 sps:$4 sm:$0xff]  }
 0x561   :  { %v2573_v20 = vpop.f32.mrf.mxu0  ;;  %v2614_v21 = vpop.f32.mrf.mxu1  ;;  %4392 = vmatmul.mubr.bf16.vlgmr.msra.gmra.mxu0 %v6830_v17 }
 0x562   :  { %v2574_v22 = vadd.f32 %v2573_v20, %v1148_v16  ;;  %4442 = vmatpush1.bf16.msra.mxu0 %v5982_v61  ;;  %v6015_v16 = vld [vmem:[#allocation16 + $0x580] ss:$16 sps:$4 sm:$0xff]  }
 0x563   :  { %v2575_v24 = vpop.f32.mrf.mxu0  ;;  %v2616_v25 = vpop.f32.mrf.mxu1  ;;  %4443 = vmatprep.subr.bf16.mxu0 %v5987_v18  ;;  %v6078_v61 = vld [vmem:[#allocation16 + $0x7e0] ss:$16 sps:$4 sm:$0xff]   ;;  %v6020_v18 = vld [vmem:[#allocation16 + $0x564] ss:$16 sps:$4 sm:$0xff]  }
 0x564   :  { %v2615_v27 = vadd.f32 %v2614_v21, %v2574_v22  ;;  %v2576_v28 = vadd.f32 %v2575_v24, %v1152_v19  ;;  %v6086_v19 = vld [vmem:[#allocation16 + $0x7c4] ss:$16 sps:$4 sm:$0xff]   ;;  %v6018_v20 = vld [vmem:[#allocation16 + $0x560] ss:$16 sps:$4 sm:$0xff]  }
 0x565   :  { %v2577_v29 = vpop.f32.mrf.mxu0  ;;  %v2618_v30 = vpop.f32.mrf.mxu1  ;;  %v6084_v21 = vld [vmem:[#allocation16 + $0x7c0] ss:$16 sps:$4 sm:$0xff]   ;;  %v6023_v22 = vld [vmem:[#allocation16 + $0x544] ss:$16 sps:$4 sm:$0xff]  }
 0x566   :  { %v2617_v31 = vadd.f32 %v2616_v25, %v2576_v28  ;;  %4444 = vmatpush1.bf16.msra.mxu0 %v5985_v23  ;;  %v2787_v33 = vmax.f32 %v2615_v27, 0.0  ;;  %v6092_v23 = vld [vmem:[#allocation16 + $0x7a4] ss:$16 sps:$4 sm:$0xff]   ;;  %v6021_v24 = vld [vmem:[#allocation16 + $0x540] ss:$16 sps:$4 sm:$0xff]  }
 0x567   :  { %v2578_v34 = vpop.f32.mrf.mxu0  ;;  %v2619_v35 = vpop.f32.mrf.mxu1  ;;  %4445 = vmatprep.subr.bf16.mxu0 %v5990_v26  ;;  %v6090_v25 = vld [vmem:[#allocation16 + $0x7a0] ss:$16 sps:$4 sm:$0xff]   ;;  %v6026_v26 = vld [vmem:[#allocation16 + $0x524] ss:$16 sps:$4 sm:$0xff]  }
 0x568   :  { %v2788_v37 = vmax.f32 %v2617_v31, 0.0  ;;  %v6837_v46 = vpack.c.bf16 %v2787_v33, %v2787_v33  ;;  %v6098_v27 = vld [vmem:[#allocation16 + $0x784] ss:$16 sps:$4 sm:$0xff]   ;;  %v6024_v28 = vld [vmem:[#allocation16 + $0x520] ss:$16 sps:$4 sm:$0xff]  }
 0x569   :  { %v6096_v29 = vld [vmem:[#allocation16 + $0x780] ss:$16 sps:$4 sm:$0xff]   ;;  %v6029_v30 = vld [vmem:[#allocation16 + $0x504] ss:$16 sps:$4 sm:$0xff]   ;;  %v6035_v35 = vld [vmem:[#allocation16 + $0xec] ss:$16 sps:$4 sm:$0xff]  }
 0x56a   :  { %v6835_v38 = vpack.c.bf16 %v2788_v37, %v2788_v37  ;;  %4446 = vmatpush1.bf16.msra.mxu0 %v5988_v32  ;;  %v6104_v31 = vld [vmem:[#allocation16 + $0x764] ss:$16 sps:$4 sm:$0xff]   ;;  %v1155_v32 = vsub.s32 4, %v6768_v39  ;;  %v6027_v33 = vld [vmem:[#allocation16 + $0x500] ss:$16 sps:$4 sm:$0xff]   ;;  %v1159_v37 = vsub.s32 5, %v6768_v39 }
 0x56b   :  { %4447 = vmatprep.subr.bf16.mxu0 %v5993_v36  ;;  %v6102_v34 = vld [vmem:[#allocation16 + $0x760] ss:$16 sps:$4 sm:$0xff]   ;;  %v6110_v36 = vld [vmem:[#allocation16 + $0x744] ss:$16 sps:$4 sm:$0xff]  }
 0x56c   :  { %4432 = vmatprep.mubr.bf16.mxu1 %v6835_v38 }
 0x56d   :  { %4433 = vmatmul.mubr.bf16.vlgmr.msra.gmra.mxu1 %v6837_v46 }
 0x56e   :  { %4448 = vmatpush1.bf16.msra.mxu0 %v5991_v42  ;;  %4483 = vmatpush1.bf16.msra.mxu1 %v6030_v45  ;;  %v1156_v42 = vrot.slane %v6811_v55, %v1155_v32  ;;  %v6108_v45 = vld [vmem:[#allocation16 + $0x740] ss:$16 sps:$4 sm:$0xff]   ;;  %v1163_v32 = vsub.s32 6, %v6768_v39 }
 0x56f   :  { %4449 = vmatprep.subr.bf16.mxu0 %v5996_v47  ;;  %4484 = vmatprep.subr.bf16.mxu1 %v6038_v48  ;;  %v6116_v47 = vld [vmem:[#allocation16 + $0x724] ss:$16 sps:$4 sm:$0xff]   ;;  %v1160_v48 = vrot.slane %v6811_v55, %v1159_v37  ;;  %v6119_v37 = vld [vmem:[#allocation16 + $0x12c] ss:$16 sps:$4 sm:$0xff]  }
 0x572   :  { %4450 = vmatpush1.bf16.msra.mxu0 %v5994_v49  ;;  %4485 = vmatpush1.bf16.msra.mxu1 %v6036_v50 }
 0x573   :  { %4451 = vmatprep.subr.bf16.mxu0 %v5999_v51  ;;  %4486 = vmatprep.subr.bf16.mxu1 %v6044_v52  ;;  %v6114_v52 = vld [vmem:[#allocation16 + $0x720] ss:$16 sps:$4 sm:$0xff]  }
 0x576   :  { %4452 = vmatpush1.bf16.msra.mxu0 %v5997_v53  ;;  %4487 = vmatpush1.bf16.msra.mxu1 %v6042_v54  ;;  %v6122_v54 = vld [vmem:[#allocation16 + $0x704] ss:$16 sps:$4 sm:$0xff]  }
 0x577   :  { %4453 = vmatprep.subr.bf16.mxu0 %v6002_v56  ;;  %4488 = vmatprep.subr.bf16.mxu1 %v6050_v57 }
 0x57a   :  { %4454 = vmatpush1.bf16.msra.mxu0 %v6000_v58  ;;  %4489 = vmatpush1.bf16.msra.mxu1 %v6048_v59 }
 0x57b   :  { %4455 = vmatprep.subr.bf16.mxu0 %v6005_v62  ;;  %4490 = vmatprep.subr.bf16.mxu1 %v6056_v63 }
 0x57e   :  { %4456 = vmatpush1.bf16.msra.mxu0 %v6003_v0  ;;  %4491 = vmatpush1.bf16.msra.mxu1 %v6054_v1  ;;  %v6120_v0 = vld [vmem:[#allocation16 + $0x700] ss:$16 sps:$4 sm:$0xff]  }
 0x57f   :  { %4457 = vmatprep.subr.bf16.mxu0 %v6008_v2  ;;  %4492 = vmatprep.subr.bf16.mxu1 %v6062_v5  ;;  %v6128_v5 = vld [vmem:[#allocation16 + $0x2ec] ss:$16 sps:$4 sm:$0xff]  }
 0x582   :  { %4458 = vmatpush2.bf16.msra.mxu0 %v6006_v3  ;;  %4493 = vmatpush1.bf16.msra.mxu1 %v6060_v4 }
 0x583   :  { %4459 = vmatprep.subr.bf16.mxu0 %v6011_v9  ;;  %4494 = vmatprep.subr.bf16.mxu1 %v6068_v7  ;;  %v6033_v7 = vld [vmem:[#allocation16 + $0xe8] ss:$16 sps:$4 sm:$0xff]  }
 0x586   :  { %4460 = vmatpush2.bf16.msra.mxu0 %v6009_v10  ;;  %4495 = vmatpush1.bf16.msra.mxu1 %v6066_v6  ;;  %v6041_v6 = vld [vmem:[#allocation16 + $0xcc] ss:$16 sps:$4 sm:$0xff]  }
 0x587   :  { %4461 = vmatprep.subr.bf16.mxu0 %v6014_v11  ;;  %4496 = vmatprep.subr.bf16.mxu1 %v6074_v8  ;;  %v6039_v11 = vld [vmem:[#allocation16 + $0xc8] ss:$16 sps:$4 sm:$0xff]   ;;  %v6047_v8 = vld [vmem:[#allocation16 + $0xac] ss:$16 sps:$4 sm:$0xff]  }
 0x58a   :  { %4462 = vmatpush2.bf16.msra.mxu0 %v6012_v12  ;;  %4497 = vmatpush1.bf16.msra.mxu1 %v6072_v60  ;;  %v6045_v12 = vld [vmem:[#allocation16 + $0xa8] ss:$16 sps:$4 sm:$0xff]   ;;  %v6053_v60 = vld [vmem:[#allocation16 + $0x8c] ss:$16 sps:$4 sm:$0xff]  }
 0x58b   :  { %4463 = vmatprep.subr.bf16.mxu0 %v6017_v13  ;;  %4498 = vmatprep.subr.bf16.mxu1 %v6080_v14  ;;  %v6051_v13 = vld [vmem:[#allocation16 + $0x88] ss:$16 sps:$4 sm:$0xff]   ;;  %v6059_v14 = vld [vmem:[#allocation16 + $0x6c] ss:$16 sps:$4 sm:$0xff]  }
 0x58e   :  { %4464 = vmatpush2.bf16.msra.mxu0 %v6015_v16  ;;  %4499 = vmatpush2.bf16.msra.mxu1 %v6078_v61  ;;  %v6057_v16 = vld [vmem:[#allocation16 + $0x68] ss:$16 sps:$4 sm:$0xff]   ;;  %v6065_v61 = vld [vmem:[#allocation16 + $0x4c] ss:$16 sps:$4 sm:$0xff]  }
 0x58f   :  { %4465 = vmatprep.subr.bf16.mxu0 %v6020_v18  ;;  %4500 = vmatprep.subr.bf16.mxu1 %v6086_v19  ;;  %v6063_v18 = vld [vmem:[#allocation16 + $0x48] ss:$16 sps:$4 sm:$0xff]   ;;  %v6071_v19 = vld [vmem:[#allocation16 + $0x2c] ss:$16 sps:$4 sm:$0xff]  }
 0x592   :  { %4466 = vmatpush2.bf16.msra.mxu0 %v6018_v20  ;;  %4501 = vmatpush2.bf16.msra.mxu1 %v6084_v21  ;;  %v6077_v20 = vld [vmem:[#allocation16 + $0xc] ss:$16 sps:$4 sm:$0xff]   ;;  %v6075_v21 = vld [vmem:[#allocation16 + $0x8] ss:$16 sps:$4 sm:$0xff]  }
 0x593   :  { %4467 = vmatprep.subr.bf16.mxu0 %v6023_v22  ;;  %4502 = vmatprep.subr.bf16.mxu1 %v6092_v23  ;;  %v6083_v22 = vld [vmem:[#allocation16 + $0x1ec] ss:$16 sps:$4 sm:$0xff]   ;;  %v6081_v23 = vld [vmem:[#allocation16 + $0x1e8] ss:$16 sps:$4 sm:$0xff]  }
 0x596   :  { %4468 = vmatpush2.bf16.msra.mxu0 %v6021_v24  ;;  %4503 = vmatpush2.bf16.msra.mxu1 %v6090_v25  ;;  %v6089_v24 = vld [vmem:[#allocation16 + $0x1cc] ss:$16 sps:$4 sm:$0xff]   ;;  %v6087_v25 = vld [vmem:[#allocation16 + $0x1c8] ss:$16 sps:$4 sm:$0xff]  }
 0x597   :  { %4469 = vmatprep.subr.bf16.mxu0 %v6026_v26  ;;  %4504 = vmatprep.subr.bf16.mxu1 %v6098_v27  ;;  %v6095_v26 = vld [vmem:[#allocation16 + $0x1ac] ss:$16 sps:$4 sm:$0xff]   ;;  %v6093_v27 = vld [vmem:[#allocation16 + $0x1a8] ss:$16 sps:$4 sm:$0xff]  }
 0x59a   :  { %4470 = vmatpush2.bf16.msra.mxu0 %v6024_v28  ;;  %4505 = vmatpush2.bf16.msra.mxu1 %v6096_v29  ;;  %v6101_v28 = vld [vmem:[#allocation16 + $0x18c] ss:$16 sps:$4 sm:$0xff]   ;;  %v6099_v29 = vld [vmem:[#allocation16 + $0x188] ss:$16 sps:$4 sm:$0xff]  }
 0x59b   :  { %4471 = vmatprep.subr.bf16.mxu0 %v6029_v30  ;;  %4506 = vmatprep.subr.bf16.mxu1 %v6104_v31  ;;  %v6107_v30 = vld [vmem:[#allocation16 + $0x16c] ss:$16 sps:$4 sm:$0xff]   ;;  %v6105_v31 = vld [vmem:[#allocation16 + $0x168] ss:$16 sps:$4 sm:$0xff]  }
 0x59e   :  { %4472 = vmatpush2.bf16.msra.mxu0 %v6027_v33  ;;  %4507 = vmatpush2.bf16.msra.mxu1 %v6102_v34  ;;  %v6113_v33 = vld [vmem:[#allocation16 + $0x14c] ss:$16 sps:$4 sm:$0xff]   ;;  %v1167_v34 = vsub.s32 7, %v6768_v39 }
 0x59f   :  { %4523 = vmatprep.subr.bf16.mxu0 %v6035_v35  ;;  %4508 = vmatprep.subr.bf16.mxu1 %v6110_v36  ;;  %v6111_v35 = vld [vmem:[#allocation16 + $0x148] ss:$16 sps:$4 sm:$0xff]   ;;  %v1164_v36 = vrot.slane %v6811_v55, %v1163_v32  ;;  %v6179_v32 = vld [vmem:[#allocation16 + $0x5ec] ss:$16 sps:$4 sm:$0xff]  }
 0x5a1   :  { %v2655_v49 = vpop.f32.mrf.mxu0 }
 0x5a2   :  { %v2656_v50 = vadd.f32 %v2655_v49, %v1156_v42  ;;  %v2696_v51 = vpop.f32.mrf.mxu1  ;;  %4509 = vmatpush2.bf16.msra.mxu1 %v6108_v45  ;;  %v1168_v42 = vrot.slane %v6811_v55, %v1167_v34  ;;  %v6117_v49 = vld [vmem:[#allocation16 + $0x128] ss:$16 sps:$4 sm:$0xff]   ;;  %v6131_v55 = vld [vmem:[#allocation16 + $0x4ec] ss:$16 sps:$4 sm:$0xff]  }
 0x5a3   :  { %v2657_v53 = vpop.f32.mrf.mxu0  ;;  %4510 = vmatprep.subr.bf16.mxu1 %v6116_v47  ;;  %v6177_v34 = vld [vmem:[#allocation16 + $0x5e8] ss:$16 sps:$4 sm:$0xff]  }
 0x5a4   :  { %v2697_v56 = vadd.f32 %v2696_v51, %v2656_v50  ;;  %v2658_v57 = vadd.f32 %v2657_v53, %v1160_v48  ;;  %v2698_v58 = vpop.f32.mrf.mxu1  ;;  %v6125_v51 = vld [vmem:[#allocation16 + $0x10c] ss:$16 sps:$4 sm:$0xff]  }
 0x5a5   :  { %v2659_v59 = vpop.f32.mrf.mxu0 }
 0x5a6   :  { %v2699_v62 = vadd.f32 %v2698_v58, %v2658_v57  ;;  %v2700_v63 = vpop.f32.mrf.mxu1  ;;  %4511 = vmatpush2.bf16.msra.mxu1 %v6114_v52  ;;  %v2789_v1 = vmax.f32 %v2697_v56, 0.0  ;;  %v6123_v58 = vld [vmem:[#allocation16 + $0x108] ss:$16 sps:$4 sm:$0xff]  }
 0x5a7   :  { %v2660_v2 = vpop.f32.mrf.mxu0  ;;  %4512 = vmatprep.subr.bf16.mxu1 %v6122_v54 }
 0x5a8   :  { %v2790_v3 = vmax.f32 %v2699_v62, 0.0  ;;  %v2701_v4 = vpop.f32.mrf.mxu1  ;;  %v6847_v10 = vpack.c.bf16 %v2789_v1, %v2789_v1  ;;  %v6126_v2 = vld [vmem:[#allocation16 + $0x2e8] ss:$16 sps:$4 sm:$0xff]  }
 0x5a9   :  { %v6134_v4 = vld [vmem:[#allocation16 + $0x2cc] ss:$16 sps:$4 sm:$0xff]  }
 0x5aa   :  { %v6845_v9 = vpack.c.bf16 %v2790_v3, %v2790_v3  ;;  %4513 = vmatpush2.bf16.msra.mxu1 %v6120_v0 }
 0x5ab   :  { %4564 = vmatprep.subr.bf16.mxu1 %v6128_v5  ;;  %v6129_v5 = vld [vmem:[#allocation16 + $0x4e8] ss:$16 sps:$4 sm:$0xff]  }
 0x5ac   :  { %4473 = vmatprep.mubr.bf16.mxu0 %v6845_v9 }
 0x5ad   :  { %4474 = vmatmul.mubr.bf16.vlgmr.msra.gmra.mxu0 %v6847_v10 }
 0x5ae   :  { %4524 = vmatpush1.bf16.msra.mxu0 %v6033_v7  ;;  %4555 = vmatprep.mubr.bf16.mxu0 %v6821_v15  ;;  %v6069_v15 = vld [vmem:[#allocation16 + $0x28] ss:$16 sps:$4 sm:$0xff]   ;;  %v6137_v7 = vld [vmem:[#allocation16 + $0x4cc] ss:$16 sps:$4 sm:$0xff]  }
 0x5af   :  { %4525 = vmatprep.subr.bf16.mxu0 %v6041_v6  ;;  %v6132_v6 = vld [vmem:[#allocation16 + $0x2c8] ss:$16 sps:$4 sm:$0xff]  }
 0x5b2   :  { %4526 = vmatpush1.bf16.msra.mxu0 %v6039_v11  ;;  %v6135_v11 = vld [vmem:[#allocation16 + $0x4c8] ss:$16 sps:$4 sm:$0xff]  }
 0x5b3   :  { %4527 = vmatprep.subr.bf16.mxu0 %v6047_v8  ;;  %v6140_v8 = vld [vmem:[#allocation16 + $0x2ac] ss:$16 sps:$4 sm:$0xff]  }
 0x5b6   :  { %4528 = vmatpush1.bf16.msra.mxu0 %v6045_v12  ;;  %v6143_v12 = vld [vmem:[#allocation16 + $0x4ac] ss:$16 sps:$4 sm:$0xff]  }
 0x5b7   :  { %4529 = vmatprep.subr.bf16.mxu0 %v6053_v60  ;;  %v6138_v60 = vld [vmem:[#allocation16 + $0x2a8] ss:$16 sps:$4 sm:$0xff]  }
 0x5ba   :  { %4530 = vmatpush1.bf16.msra.mxu0 %v6051_v13  ;;  %v6141_v13 = vld [vmem:[#allocation16 + $0x4a8] ss:$16 sps:$4 sm:$0xff]  }
 0x5bb   :  { %4531 = vmatprep.subr.bf16.mxu0 %v6059_v14  ;;  %v6149_v14 = vld [vmem:[#allocation16 + $0x48c] ss:$16 sps:$4 sm:$0xff]  }
 0x5be   :  { %4532 = vmatpush1.bf16.msra.mxu0 %v6057_v16  ;;  %v6144_v16 = vld [vmem:[#allocation16 + $0x288] ss:$16 sps:$4 sm:$0xff]  }
 0x5bf   :  { %4533 = vmatprep.subr.bf16.mxu0 %v6065_v61  ;;  %v6147_v61 = vld [vmem:[#allocation16 + $0x488] ss:$16 sps:$4 sm:$0xff]  }
 0x5c2   :  { %4534 = vmatpush1.bf16.msra.mxu0 %v6063_v18  ;;  %v6150_v18 = vld [vmem:[#allocation16 + $0x268] ss:$16 sps:$4 sm:$0xff]  }
 0x5c3   :  { %4535 = vmatprep.subr.bf16.mxu0 %v6071_v19  ;;  %v6153_v19 = vld [vmem:[#allocation16 + $0x468] ss:$16 sps:$4 sm:$0xff]  }
 0x5c6   :  { %4536 = vmatpush1.bf16.msra.mxu0 %v6069_v15  ;;  %v6158_v15 = vld [vmem:[#allocation16 + $0x24c] ss:$16 sps:$4 sm:$0xff]  }
 0x5c7   :  { %4537 = vmatprep.subr.bf16.mxu0 %v6077_v20  ;;  %v6161_v20 = vld [vmem:[#allocation16 + $0x44c] ss:$16 sps:$4 sm:$0xff]  }
 0x5ca   :  { %4538 = vmatpush1.bf16.msra.mxu0 %v6075_v21  ;;  %v6156_v21 = vld [vmem:[#allocation16 + $0x248] ss:$16 sps:$4 sm:$0xff]  }
 0x5cb   :  { %4539 = vmatprep.subr.bf16.mxu0 %v6083_v22  ;;  %v6159_v22 = vld [vmem:[#allocation16 + $0x448] ss:$16 sps:$4 sm:$0xff]  }
 0x5ce   :  { %4540 = vmatpush2.bf16.msra.mxu0 %v6081_v23  ;;  %v6164_v23 = vld [vmem:[#allocation16 + $0x22c] ss:$16 sps:$4 sm:$0xff]  }
 0x5cf   :  { %4541 = vmatprep.subr.bf16.mxu0 %v6089_v24  ;;  %v6167_v24 = vld [vmem:[#allocation16 + $0x42c] ss:$16 sps:$4 sm:$0xff]  }
 0x5d2   :  { %4542 = vmatpush2.bf16.msra.mxu0 %v6087_v25  ;;  %v6162_v25 = vld [vmem:[#allocation16 + $0x228] ss:$16 sps:$4 sm:$0xff]  }
 0x5d3   :  { %4543 = vmatprep.subr.bf16.mxu0 %v6095_v26  ;;  %v6165_v26 = vld [vmem:[#allocation16 + $0x428] ss:$16 sps:$4 sm:$0xff]  }
 0x5d6   :  { %4544 = vmatpush2.bf16.msra.mxu0 %v6093_v27  ;;  %v6170_v27 = vld [vmem:[#allocation16 + $0x20c] ss:$16 sps:$4 sm:$0xff]  }
 0x5d7   :  { %4545 = vmatprep.subr.bf16.mxu0 %v6101_v28  ;;  %v6173_v28 = vld [vmem:[#allocation16 + $0x40c] ss:$16 sps:$4 sm:$0xff]  }
 0x5da   :  { %4546 = vmatpush2.bf16.msra.mxu0 %v6099_v29  ;;  %v6168_v29 = vld [vmem:[#allocation16 + $0x208] ss:$16 sps:$4 sm:$0xff]  }
 0x5db   :  { %4547 = vmatprep.subr.bf16.mxu0 %v6107_v30  ;;  %v6171_v30 = vld [vmem:[#allocation16 + $0x408] ss:$16 sps:$4 sm:$0xff]  }
 0x5de   :  { %4548 = vmatpush2.bf16.msra.mxu0 %v6105_v31  ;;  %v6176_v31 = vld [vmem:[#allocation16 + $0x3ec] ss:$16 sps:$4 sm:$0xff]  }
 0x5df   :  { %4549 = vmatprep.subr.bf16.mxu0 %v6113_v33  ;;  %v6174_v33 = vld [vmem:[#allocation16 + $0x3e8] ss:$16 sps:$4 sm:$0xff]  }
 0x5e1   :  { %v2737_v45 = vpop.f32.mrf.mxu0 }
 0x5e2   :  { %v2738_v47 = vadd.f32 %v2737_v45, %v1164_v36  ;;  %v2778_v48 = vpop.f32.mrf.mxu1  ;;  %4550 = vmatpush2.bf16.msra.mxu0 %v6111_v35  ;;  %v6182_v35 = vld [vmem:[#allocation16 + $0x3cc] ss:$16 sps:$4 sm:$0xff]  }
 0x5e3   :  { %v2739_v50 = vpop.f32.mrf.mxu0  ;;  %4551 = vmatprep.subr.bf16.mxu0 %v6119_v37  ;;  %v6185_v36 = vld [vmem:[#allocation16 + $0x5cc] ss:$16 sps:$4 sm:$0xff]   ;;  %v6180_v37 = vld [vmem:[#allocation16 + $0x3c8] ss:$16 sps:$4 sm:$0xff]  }
 0x5e4   :  { %v2779_v52 = vadd.f32 %v2778_v48, %v2738_v47  ;;  %v2740_v53 = vadd.f32 %v2739_v50, %v1168_v42  ;;  %v2780_v54 = vpop.f32.mrf.mxu1  ;;  %v6183_v42 = vld [vmem:[#allocation16 + $0x5c8] ss:$16 sps:$4 sm:$0xff]   ;;  %v6188_v45 = vld [vmem:[#allocation16 + $0x3ac] ss:$16 sps:$4 sm:$0xff]  }
 0x5e5   :  { %v2741_v39 = vpop.f32.mrf.mxu0  ;;  %v6191_v47 = vld [vmem:[#allocation16 + $0x5ac] ss:$16 sps:$4 sm:$0xff]   ;;  %v6186_v48 = vld [vmem:[#allocation16 + $0x3a8] ss:$16 sps:$4 sm:$0xff]  }
 0x5e6   :  { %v2781_v56 = vadd.f32 %v2780_v54, %v2740_v53  ;;  %v2782_v57 = vpop.f32.mrf.mxu1  ;;  %4552 = vmatpush2.bf16.msra.mxu0 %v6117_v49  ;;  %v2791_v59 = vmax.f32 %v2779_v52, 0.0  ;;  %v6189_v49 = vld [vmem:[#allocation16 + $0x5a8] ss:$16 sps:$4 sm:$0xff]   ;;  %v6194_v50 = vld [vmem:[#allocation16 + $0x38c] ss:$16 sps:$4 sm:$0xff]  }
 0x5e7   :  { %v2742_v62 = vpop.f32.mrf.mxu0  ;;  %4553 = vmatprep.subr.bf16.mxu0 %v6125_v51  ;;  %v6197_v51 = vld [vmem:[#allocation16 + $0x58c] ss:$16 sps:$4 sm:$0xff]   ;;  %v6192_v52 = vld [vmem:[#allocation16 + $0x388] ss:$16 sps:$4 sm:$0xff]  }
 0x5e8   :  { %v2792_v63 = vmax.f32 %v2781_v56, 0.0  ;;  %v2783_v0 = vpop.f32.mrf.mxu1  ;;  %v6858_v3 = vpack.c.bf16 %v2791_v59, %v2791_v59  ;;  %v6195_v53 = vld [vmem:[#allocation16 + $0x588] ss:$16 sps:$4 sm:$0xff]   ;;  %v6200_v54 = vld [vmem:[#allocation16 + $0x36c] ss:$16 sps:$4 sm:$0xff]  }
 0x5e9   :  { %v6203_v39 = vld [vmem:[#allocation16 + $0x56c] ss:$16 sps:$4 sm:$0xff]   ;;  %v6198_v56 = vld [vmem:[#allocation16 + $0x368] ss:$16 sps:$4 sm:$0xff]  }
 0x5ea   :  { %v6856_v1 = vpack.c.bf16 %v2792_v63, %v2792_v63  ;;  %4554 = vmatpush2.bf16.msra.mxu0 %v6123_v58  ;;  %v6201_v57 = vld [vmem:[#allocation16 + $0x568] ss:$16 sps:$4 sm:$0xff]   ;;  %v6206_v58 = vld [vmem:[#allocation16 + $0x34c] ss:$16 sps:$4 sm:$0xff]  }
 0x5eb   :  { %4605 = vmatprep.subr.bf16.mxu0 %v6131_v55  ;;  %v6209_v59 = vld [vmem:[#allocation16 + $0x54c] ss:$16 sps:$4 sm:$0xff]   ;;  %v6204_v62 = vld [vmem:[#allocation16 + $0x348] ss:$16 sps:$4 sm:$0xff]  }
 0x5ec   :  { %4514 = vmatprep.mubr.bf16.mxu1 %v6856_v1  ;;  %v6207_v55 = vld [vmem:[#allocation16 + $0x548] ss:$16 sps:$4 sm:$0xff]   ;;  %v6212_v63 = vld [vmem:[#allocation16 + $0x32c] ss:$16 sps:$4 sm:$0xff]  }
 0x5ed   :  { %4556 = vmatmul.mubr.bf16.vlgmr.msra.gmra.mxu0 %v6830_v17  ;;  %4515 = vmatmul.mubr.bf16.vlgmr.msra.gmra.mxu1 %v6858_v3  ;;  %v6146_v17 = vld [vmem:[#allocation16 + $0x28c] ss:$16 sps:$4 sm:$0xff]  }
 0x5ee   :  { %4565 = vmatpush1.bf16.msra.mxu1 %v6126_v2  ;;  %4606 = vmatpush1.bf16.msra.mxu0 %v6129_v5  ;;  %v6215_v0 = vld [vmem:[#allocation16 + $0x52c] ss:$16 sps:$4 sm:$0xff]   ;;  %v6210_v5 = vld [vmem:[#allocation16 + $0x328] ss:$16 sps:$4 sm:$0xff]  }
 0x5ef   :  { %4637 = vmatprep.mubr.bf16.mxu0 %v6845_v9  ;;  %4596 = vmatprep.mubr.bf16.mxu1 %v6835_v38  ;;  %v6152_v9 = vld [vmem:[#allocation16 + $0x26c] ss:$16 sps:$4 sm:$0xff]  }
 0x5f0   :  { %4566 = vmatprep.subr.bf16.mxu1 %v6134_v4  ;;  %4607 = vmatprep.subr.bf16.mxu0 %v6137_v7  ;;  %v6155_v38 = vld [vmem:[#allocation16 + $0x46c] ss:$16 sps:$4 sm:$0xff]   ;;  %v6213_v4 = vld [vmem:[#allocation16 + $0x528] ss:$16 sps:$4 sm:$0xff]  }
 0x5f2   :  { %4567 = vmatpush1.bf16.msra.mxu1 %v6132_v6  ;;  %4608 = vmatpush1.bf16.msra.mxu0 %v6135_v11  ;;  %v6218_v6 = vld [vmem:[#allocation16 + $0x30c] ss:$16 sps:$4 sm:$0xff]  }
 0x5f3   :  { %4568 = vmatprep.subr.bf16.mxu1 %v6140_v8  ;;  %4609 = vmatprep.subr.bf16.mxu0 %v6143_v12  ;;  %v6221_v11 = vld [vmem:[#allocation16 + $0x50c] ss:$16 sps:$4 sm:$0xff]   ;;  %v6868_v8 = vld [vmem:[%s7001_s14] sm:$0xf] }
 0x5f6   :  { %4569 = vmatpush1.bf16.msra.mxu1 %v6138_v60  ;;  %4610 = vmatpush1.bf16.msra.mxu0 %v6141_v13  ;;  %v6216_v60 = vld [vmem:[#allocation16 + $0x308] ss:$16 sps:$4 sm:$0xff]  }
 0x5f7   :  { %4570 = vmatprep.subr.bf16.mxu1 %v6146_v17  ;;  %4611 = vmatprep.subr.bf16.mxu0 %v6149_v14  ;;  %v6219_v13 = vld [vmem:[#allocation16 + $0x508] ss:$16 sps:$4 sm:$0xff]   ;;  %v6224_v14 = vld [vmem:[#allocation16 + $0x6ec] ss:$16 sps:$4 sm:$0xff]  }
 0x5fa   :  { %4571 = vmatpush1.bf16.msra.mxu1 %v6144_v16  ;;  %4612 = vmatpush1.bf16.msra.mxu0 %v6147_v61  ;;  %v6270_v16 = vld [vmem:[%s7002_s15 + $0x78] sm:$0xff]   ;;  %v3062_v61 = vrot.slane %v6868_v8, %v6771_v40 }
 0x5fb   :  { %4572 = vmatprep.subr.bf16.mxu1 %v6152_v9  ;;  %4613 = vmatprep.subr.bf16.mxu0 %v6155_v38  ;;  %v3066_v9 = vrot.slane %v6868_v8, %v6777_v43  ;;  %v6222_v38 = vld [vmem:[#allocation16 + $0x6e8] ss:$16 sps:$4 sm:$0xff]  }
 0x5fe   :  { %4573 = vmatpush1.bf16.msra.mxu1 %v6150_v18  ;;  %4614 = vmatpush1.bf16.msra.mxu0 %v6153_v19  ;;  %v6227_v18 = vld [vmem:[#allocation16 + $0x6cc] ss:$16 sps:$4 sm:$0xff]  }
 0x5ff   :  { %4574 = vmatprep.subr.bf16.mxu1 %v6158_v15  ;;  %4615 = vmatprep.subr.bf16.mxu0 %v6161_v20  ;;  %v6271_v19 = vld [vmem:[%s7002_s15 + $0x38] sm:$0xff]   ;;  %v6272_v20 = vld [vmem:[%s7002_s15 + $0x70] sm:$0xff]  }
 0x602   :  { %4575 = vmatpush1.bf16.msra.mxu1 %v6156_v21  ;;  %4616 = vmatpush1.bf16.msra.mxu0 %v6159_v22  ;;  %v6225_v22 = vld [vmem:[#allocation16 + $0x6c8] ss:$16 sps:$4 sm:$0xff]  }
 0x603   :  { %4576 = vmatprep.subr.bf16.mxu1 %v6164_v23  ;;  %4617 = vmatprep.subr.bf16.mxu0 %v6167_v24  ;;  %v6230_v24 = vld [vmem:[#allocation16 + $0x6ac] ss:$16 sps:$4 sm:$0xff]  }
 0x606   :  { %4577 = vmatpush1.bf16.msra.mxu1 %v6162_v25  ;;  %4618 = vmatpush1.bf16.msra.mxu0 %v6165_v26  ;;  %v6273_v25 = vld [vmem:[%s7002_s15 + $0x30] sm:$0xff]  }
 0x607   :  { %4578 = vmatprep.subr.bf16.mxu1 %v6170_v27  ;;  %4619 = vmatprep.subr.bf16.mxu0 %v6173_v28  ;;  %v6228_v27 = vld [vmem:[#allocation16 + $0x6a8] ss:$16 sps:$4 sm:$0xff]   ;;  %v6233_v28 = vld [vmem:[#allocation16 + $0x68c] ss:$16 sps:$4 sm:$0xff]  }
 0x60a   :  { %4579 = vmatpush1.bf16.msra.mxu1 %v6168_v29  ;;  %4620 = vmatpush1.bf16.msra.mxu0 %v6171_v30  ;;  %v6275_v29 = vld [vmem:[%s7002_s15 + $0x28] sm:$0xff]   ;;  %v6276_v30 = vld [vmem:[%s7002_s15 + $0x60] sm:$0xff]  }
 0x60b   :  { %4580 = vmatprep.subr.bf16.mxu1 %v6176_v31  ;;  %4621 = vmatprep.subr.bf16.mxu0 %v6179_v32  ;;  %v6231_v31 = vld [vmem:[#allocation16 + $0x688] ss:$16 sps:$4 sm:$0xff]   ;;  %v6236_v32 = vld [vmem:[#allocation16 + $0x66c] ss:$16 sps:$4 sm:$0xff]  }
 0x60e   :  { %4581 = vmatpush2.bf16.msra.mxu1 %v6174_v33  ;;  %4622 = vmatpush2.bf16.msra.mxu0 %v6177_v34  ;;  %v6277_v33 = vld [vmem:[%s7002_s15 + $0x20] sm:$0xff]   ;;  %v6278_v34 = vld [vmem:[%s7002_s15 + $0x58] sm:$0xff]  }
 0x60f   :  { %4582 = vmatprep.subr.bf16.mxu1 %v6182_v35  ;;  %4623 = vmatprep.subr.bf16.mxu0 %v6185_v36  ;;  %v6234_v35 = vld [vmem:[#allocation16 + $0x668] ss:$16 sps:$4 sm:$0xff]   ;;  %v6239_v36 = vld [vmem:[#allocation16 + $0x64c] ss:$16 sps:$4 sm:$0xff]  }
 0x612   :  { %4583 = vmatpush2.bf16.msra.mxu1 %v6180_v37  ;;  %4624 = vmatpush2.bf16.msra.mxu0 %v6183_v42  ;;  %v6279_v37 = vld [vmem:[%s7002_s15 + $0x18] sm:$0xff]   ;;  %v6280_v42 = vld [vmem:[%s7002_s15 + $0x50] sm:$0xff]  }
 0x613   :  { %4584 = vmatprep.subr.bf16.mxu1 %v6188_v45  ;;  %4625 = vmatprep.subr.bf16.mxu0 %v6191_v47  ;;  %v6237_v45 = vld [vmem:[#allocation16 + $0x648] ss:$16 sps:$4 sm:$0xff]   ;;  %v6242_v47 = vld [vmem:[#allocation16 + $0x62c] ss:$16 sps:$4 sm:$0xff]  }
 0x616   :  { %4585 = vmatpush2.bf16.msra.mxu1 %v6186_v48  ;;  %4626 = vmatpush2.bf16.msra.mxu0 %v6189_v49  ;;  %v6281_v48 = vld [vmem:[%s7002_s15 + $0x10] sm:$0xff]   ;;  %v6282_v49 = vld [vmem:[%s7002_s15 + $0x48] sm:$0xff]  }
 0x617   :  { %4586 = vmatprep.subr.bf16.mxu1 %v6194_v50  ;;  %4627 = vmatprep.subr.bf16.mxu0 %v6197_v51  ;;  %v6240_v50 = vld [vmem:[#allocation16 + $0x628] ss:$16 sps:$4 sm:$0xff]   ;;  %v6245_v51 = vld [vmem:[#allocation16 + $0x60c] ss:$16 sps:$4 sm:$0xff]  }
 0x61a   :  { %4587 = vmatpush2.bf16.msra.mxu1 %v6192_v52  ;;  %4628 = vmatpush2.bf16.msra.mxu0 %v6195_v53  ;;  %v6283_v52 = vld [vmem:[%s7002_s15 + $0x8] sm:$0xff]   ;;  %v6284_v53 = vld [vmem:[%s7002_s15 + $0x40] sm:$0xff]  }
 0x61b   :  { %4588 = vmatprep.subr.bf16.mxu1 %v6200_v54  ;;  %4629 = vmatprep.subr.bf16.mxu0 %v6203_v39  ;;  %v6243_v54 = vld [vmem:[#allocation16 + $0x608] ss:$16 sps:$4 sm:$0xff]   ;;  %v6248_v39 = vld [vmem:[#allocation16 + $0x7ec] ss:$16 sps:$4 sm:$0xff]  }
 0x61e   :  { %4589 = vmatpush2.bf16.msra.mxu1 %v6198_v56  ;;  %4630 = vmatpush2.bf16.msra.mxu0 %v6201_v57  ;;  %v6285_v56 = vld [vmem:[%s7002_s15] sm:$0xff]  }
 0x61f   :  { %4590 = vmatprep.subr.bf16.mxu1 %v6206_v58  ;;  %4631 = vmatprep.subr.bf16.mxu0 %v6209_v59  ;;  %v6246_v57 = vld [vmem:[#allocation16 + $0x7e8] ss:$16 sps:$4 sm:$0xff]   ;;  %v6251_v58 = vld [vmem:[#allocation16 + $0x7cc] ss:$16 sps:$4 sm:$0xff]  }
 0x620   :  { %v6249_v59 = vld [vmem:[#allocation16 + $0x7c8] ss:$16 sps:$4 sm:$0xff]  }
 0x621   :  { %v4393_v2 = vpop.f32.mrf.mxu0 }
 0x622   :  { %4591 = vmatpush2.bf16.msra.mxu1 %v6204_v62  ;;  %4632 = vmatpush2.bf16.msra.mxu0 %v6207_v55  ;;  %v4394_v15 = vadd.f32 %v4393_v2, %v3062_v61  ;;  %v6254_v62 = vld [vmem:[#allocation16 + $0x7ac] ss:$16 sps:$4 sm:$0xff]   ;;  %v6252_v55 = vld [vmem:[#allocation16 + $0x7a8] ss:$16 sps:$4 sm:$0xff]  }
 0x623   :  { %v4395_v7 = vpop.f32.mrf.mxu0  ;;  %4592 = vmatprep.subr.bf16.mxu1 %v6212_v63  ;;  %4633 = vmatprep.subr.bf16.mxu0 %v6215_v0  ;;  %v6257_v63 = vld [vmem:[#allocation16 + $0x78c] ss:$16 sps:$4 sm:$0xff]   ;;  %v6255_v0 = vld [vmem:[#allocation16 + $0x788] ss:$16 sps:$4 sm:$0xff]  }
 0x624   :  { %v4396_v43 = vadd.f32 %v4395_v7, %v3066_v9  ;;  %v6260_v2 = vld [vmem:[#allocation16 + $0x76c] ss:$16 sps:$4 sm:$0xff]   ;;  %v6261_v7 = vld [vmem:[#allocation16 + $0x748] ss:$16 sps:$4 sm:$0xff]  }
 0x625   :  { %v4397_v12 = vpop.f32.mrf.mxu0  ;;  %v6286_v9 = vld [vmem:[%s7002_s15 + $0xf8] sm:$0xff]  }
 0x626   :  { %4593 = vmatpush2.bf16.msra.mxu1 %v6210_v5  ;;  %4634 = vmatpush2.bf16.msra.mxu0 %v6213_v4  ;;  %v6258_v5 = vld [vmem:[#allocation16 + $0x768] ss:$16 sps:$4 sm:$0xff]   ;;  %v6263_v4 = vld [vmem:[#allocation16 + $0x74c] ss:$16 sps:$4 sm:$0xff]  }
 0x627   :  { %v4398_v17 = vpop.f32.mrf.mxu0  ;;  %4594 = vmatprep.subr.bf16.mxu1 %v6218_v6  ;;  %4635 = vmatprep.subr.bf16.mxu0 %v6221_v11  ;;  %v6266_v6 = vld [vmem:[#allocation16 + $0x72c] ss:$16 sps:$4 sm:$0xff]   ;;  %v6264_v11 = vld [vmem:[#allocation16 + $0x728] ss:$16 sps:$4 sm:$0xff]  }
 0x628   :  { %v6269_v12 = vld [vmem:[#allocation16 + $0x70c] ss:$16 sps:$4 sm:$0xff]  }
 0x62a   :  { %4595 = vmatpush2.bf16.msra.mxu1 %v6216_v60  ;;  %4636 = vmatpush2.bf16.msra.mxu0 %v6219_v13  ;;  %v6267_v60 = vld [vmem:[#allocation16 + $0x708] ss:$16 sps:$4 sm:$0xff]  }
 0x62b   :  { %4646 = vmatprep.subr.bf16.mxu1 %v6224_v14  ;;  %5685 = vmatprep.subr.bf16.mxu0 %v6270_v16 }
 0x62d   :  { %4597 = vmatmul.mubr.bf16.vlgmr.msra.gmra.mxu1 %v6837_v46  ;;  %4638 = vmatmul.mubr.bf16.vlgmr.msra.gmra.mxu0 %v6847_v10  ;;  %v4434_v40 = vpop.f32.mrf.mxu1  ;;  %v6274_v46 = vld [vmem:[%s7002_s15 + $0x68] sm:$0xff]  }
 0x62e   :  { %v6885_v21 = vadd.f32 %v4434_v40, %v4394_v15  ;;  %4647 = vmatpush1.bf16.msra.mxu1 %v6222_v38  ;;  %4678 = vmatprep.mubr.bf16.mxu1 %v6856_v1  ;;  %v6287_v38 = vld [vmem:[%s7002_s15 + $0xb8] sm:$0xff]   ;;  %v6291_v15 = vld [vmem:[%s7002_s15 + $0xa8] sm:$0xff]   ;;  %v6293_v40 = vld [vmem:[%s7002_s15 + $0xa0] sm:$0xff]  }
 0x62f   :  { %v4436_v23 = vpop.f32.mrf.mxu1  ;;  %4648 = vmatprep.subr.bf16.mxu1 %v6227_v18  ;;  %5686 = vmatpush3.bf16.msra.mxu0 %v6271_v19  ;;  %v6288_v18 = vld [vmem:[%s7002_s15 + $0xf0] sm:$0xff]   ;;  %v6290_v19 = vld [vmem:[%s7002_s15 + $0xe8] sm:$0xff]  }
 0x630   :  { %v6891_v26 = vadd.f32 %v4436_v23, %v4396_v43  ;;  %5687 = vmatprep.subr.bf16.mxu0 %v6272_v20  ;;  %v6292_v20 = vld [vmem:[%s7002_s15 + $0xe0] sm:$0xff]   ;;  %v6294_v43 = vld [vmem:[%s7002_s15 + $0xd8] sm:$0xff]   ;;  %v6297_v23 = vld [vmem:[%s7002_s15 + $0x90] sm:$0xff]  }
 0x631   :  { %v4438_v10 = vpop.f32.mrf.mxu1 }
 0x632   :  { %4649 = vmatpush1.bf16.msra.mxu1 %v6225_v22  ;;  %v6296_v22 = vld [vmem:[%s7002_s15 + $0xd0] sm:$0xff]  }
 0x633   :  { %v4439_v1 = vpop.f32.mrf.mxu1  ;;  %4650 = vmatprep.subr.bf16.mxu1 %v6230_v24  ;;  %5688 = vmatpush3.bf16.msra.mxu0 %v6273_v25 }
 0x634   :  { %5689 = vmatprep.subr.bf16.mxu0 %v6274_v46 }
 0x636   :  { %4651 = vmatpush1.bf16.msra.mxu1 %v6228_v27  ;;  %v6298_v27 = vld [vmem:[%s7002_s15 + $0xc8] sm:$0xff]  }
 0x637   :  { %4652 = vmatprep.subr.bf16.mxu1 %v6233_v28  ;;  %5690 = vmatpush3.bf16.msra.mxu0 %v6275_v29  ;;  %v6299_v29 = vld [vmem:[%s7002_s15 + $0x88] sm:$0xff]  }
 0x638   :  { %5691 = vmatprep.subr.bf16.mxu0 %v6276_v30 }
 0x63a   :  { %4653 = vmatpush1.bf16.msra.mxu1 %v6231_v31 }
 0x63b   :  { %4654 = vmatprep.subr.bf16.mxu1 %v6236_v32  ;;  %5692 = vmatpush3.bf16.msra.mxu0 %v6277_v33 }
 0x63c   :  { %5693 = vmatprep.subr.bf16.mxu0 %v6278_v34 }
 0x63e   :  { %4655 = vmatpush1.bf16.msra.mxu1 %v6234_v35 }
 0x63f   :  { %4656 = vmatprep.subr.bf16.mxu1 %v6239_v36  ;;  %5694 = vmatpush3.bf16.msra.mxu0 %v6279_v37  ;;  %v6301_v37 = vld [vmem:[%s7002_s15 + $0x80] sm:$0xff]  }
 0x640   :  { %5695 = vmatprep.subr.bf16.mxu0 %v6280_v42 }
 0x642   :  { %4657 = vmatpush1.bf16.msra.mxu1 %v6237_v45 }
 0x643   :  { %4658 = vmatprep.subr.bf16.mxu1 %v6242_v47  ;;  %5696 = vmatpush3.bf16.msra.mxu0 %v6281_v48  ;;  %v3070_v47 = vrot.slane %v6868_v8, %v6774_v41 }
 0x644   :  { %5697 = vmatprep.subr.bf16.mxu0 %v6282_v49 }
 0x646   :  { %4659 = vmatpush1.bf16.msra.mxu1 %v6240_v50 }
 0x647   :  { %4660 = vmatprep.subr.bf16.mxu1 %v6245_v51  ;;  %5698 = vmatpush3.bf16.msra.mxu0 %v6283_v52 }
 0x648   :  { %5699 = vmatprep.subr.bf16.mxu0 %v6284_v53 }
 0x64a   :  { %4661 = vmatpush1.bf16.msra.mxu1 %v6243_v54 }
 0x64b   :  { %4662 = vmatprep.subr.bf16.mxu1 %v6248_v39  ;;  %5700 = vmatpush3.bf16.msra.mxu0 %v6285_v56 }
 0x64e   :  { %4663 = vmatpush2.bf16.msra.mxu1 %v6246_v57 }
 0x64f   :  { %4664 = vmatprep.subr.bf16.mxu1 %v6251_v58 }
 0x652   :  { %4665 = vmatpush2.bf16.msra.mxu1 %v6249_v59  ;;  %v3074_v59 = vrot.slane %v6868_v8, %v6780_v44  ;;  %v5623_v8 = vld [vmem:[#allocation2] ss:$0 sm:$0xff] }
 0x653   :  { %4666 = vmatprep.subr.bf16.mxu1 %v6254_v62 }
 0x656   :  { %4667 = vmatpush2.bf16.msra.mxu1 %v6252_v55 }
 0x657   :  { %4668 = vmatprep.subr.bf16.mxu1 %v6257_v63 }
 0x65a   :  { %4669 = vmatpush2.bf16.msra.mxu1 %v6255_v0 }
 0x65b   :  { %4670 = vmatprep.subr.bf16.mxu1 %v6260_v2 }
 0x65e   :  { %4671 = vmatpush2.bf16.msra.mxu1 %v6258_v5 }
 0x65f   :  { %4672 = vmatprep.subr.bf16.mxu1 %v6263_v4 }
 0x662   :  { %4673 = vmatpush2.bf16.msra.mxu1 %v6261_v7 }
 0x663   :  { %4674 = vmatprep.subr.bf16.mxu1 %v6266_v6 }
 0x666   :  { %4675 = vmatpush2.bf16.msra.mxu1 %v6264_v11 }
 0x667   :  { %4676 = vmatprep.subr.bf16.mxu1 %v6269_v12 }
 0x66a   :  { %4677 = vmatpush2.bf16.msra.mxu1 %v6267_v60 }
 0x66b   :  { %5707 = vmatprep.subr.bf16.mxu1 %v6286_v9 }
 0x66d   :  { %4679 = vmatmul.mubr.bf16.vlgmr.msra.gmra.mxu1 %v6858_v3  ;;  %v4475_v13 = vpop.f32.mrf.mxu0  ;;  %v6289_v3 = vld [vmem:[%s7002_s15 + $0xb0] sm:$0xff]  }
 0x66e   :  { %v4476_v17 = vadd.f32 %v4475_v13, %v6885_v21  ;;  %5708 = vmatpush3.bf16.msra.mxu1 %v6287_v38  ;;  %v6295_v21 = vld [vmem:[%s7002_s15 + $0x98] sm:$0xff]  }
 0x66f   :  { %v4477_v14 = vpop.f32.mrf.mxu0  ;;  %5709 = vmatprep.subr.bf16.mxu1 %v6288_v18 }
 0x670   :  { %v4478_v46 = vadd.f32 %v4477_v14, %v6891_v26  ;;  %v6300_v26 = vld [vmem:[%s7002_s15 + $0xc0] sm:$0xff]  }
 0x671   :  { %v4479_v16 = vpop.f32.mrf.mxu0 }
 0x672   :  { %5710 = vmatpush3.bf16.msra.mxu1 %v6289_v3 }
 0x673   :  { %v4480_v61 = vpop.f32.mrf.mxu0  ;;  %5711 = vmatprep.subr.bf16.mxu1 %v6290_v19 }
 0x676   :  { %5712 = vmatpush3.bf16.msra.mxu1 %v6291_v15 }
 0x677   :  { %5713 = vmatprep.subr.bf16.mxu1 %v6292_v20 }
 0x67a   :  { %5714 = vmatpush3.bf16.msra.mxu1 %v6293_v40 }
 0x67b   :  { %5715 = vmatprep.subr.bf16.mxu1 %v6294_v43 }
 0x67e   :  { %5716 = vmatpush3.bf16.msra.mxu1 %v6295_v21 }
 0x67f   :  { %5717 = vmatprep.subr.bf16.mxu1 %v6296_v22 }
 0x682   :  { %5718 = vmatpush3.bf16.msra.mxu1 %v6297_v23 }
 0x683   :  { %5719 = vmatprep.subr.bf16.mxu1 %v6298_v27 }
 0x686   :  { %5720 = vmatpush3.bf16.msra.mxu1 %v6299_v29 }
 0x687   :  { %5721 = vmatprep.subr.bf16.mxu1 %v6300_v26 }
 0x68a   :  { %5722 = vmatpush3.bf16.msra.mxu1 %v6301_v37 }
 0x6ad   :  { %v4557_v24 = vpop.f32.mrf.mxu0  ;;  %v4516_v25 = vpop.f32.mrf.mxu1 }
 0x6ae   :  { %v4517_v10 = vadd.f32 %v4516_v25, %v4476_v17  ;;  %v4558_v48 = vadd.f32 %v4557_v24, %v3070_v47 }
 0x6af   :  { %v4559_v1 = vpop.f32.mrf.mxu0  ;;  %v4518_v28 = vpop.f32.mrf.mxu1 }
 0x6b0   :  { %v4519_v30 = vadd.f32 %v4518_v28, %v4478_v46  ;;  %v4687_v31 = vmax.f32 %v4517_v10, 0.0  ;;  %v4560_v62 = vadd.f32 %v4559_v1, %v3074_v59 }
 0x6b1   :  { %v4561_v32 = vpop.f32.mrf.mxu0  ;;  %v4520_v33 = vpop.f32.mrf.mxu1 }
 0x6b2   :  { %v4688_v34 = vmax.f32 %v4519_v30, 0.0  ;;  %v4691_v45 = vpack.c.bf16 %v4687_v31, %v4687_v31 }
 0x6b3   :  { %v4562_v35 = vpop.f32.mrf.mxu0  ;;  %v4521_v36 = vpop.f32.mrf.mxu1 }
 0x6b4   :  { %v4692_v42 = vpack.c.bf16 %v4688_v34, %v4688_v34 }
 0x6b6   :  { %4990 = vmatprep.mubr.bf16.mxu0 %v4692_v42 }
 0x6b7   :  { %4991 = vmatmul.mubr.bf16.vlgmr.msra.gmra.mxu0 %v4691_v45 }
 0x6ed   :  { %v4598_v49 = vpop.f32.mrf.mxu1  ;;  %v4639_v50 = vpop.f32.mrf.mxu0 }
 0x6ee   :  { %v4599_v51 = vadd.f32 %v4598_v49, %v4558_v48 }
 0x6ef   :  { %v4600_v52 = vpop.f32.mrf.mxu1  ;;  %v4641_v53 = vpop.f32.mrf.mxu0 }
 0x6f0   :  { %v4640_v54 = vadd.f32 %v4639_v50, %v4599_v51  ;;  %v4601_v55 = vadd.f32 %v4600_v52, %v4560_v62 }
 0x6f1   :  { %v4602_v39 = vpop.f32.mrf.mxu1  ;;  %v4643_v56 = vpop.f32.mrf.mxu0 }
 0x6f2   :  { %v4642_v0 = vadd.f32 %v4641_v53, %v4601_v55 }
 0x6f3   :  { %v4603_v57 = vpop.f32.mrf.mxu1  ;;  %v4644_v58 = vpop.f32.mrf.mxu0 }
 0x72d   :  { %v4680_v63 = vpop.f32.mrf.mxu1 }
 0x72e   :  { %v4681_v2 = vadd.f32 %v4680_v63, %v4640_v54 }
 0x72f   :  { %v4682_v41 = vpop.f32.mrf.mxu1 }
 0x730   :  { %v4683_v5 = vadd.f32 %v4682_v41, %v4642_v0  ;;  %v4689_v4 = vmax.f32 %v4681_v2, 0.0 }
 0x731   :  { %v4684_v7 = vpop.f32.mrf.mxu1 }
 0x732   :  { %v4690_v6 = vmax.f32 %v4683_v5, 0.0  ;;  %v4693_v60 = vpack.c.bf16 %v4689_v4, %v4689_v4 }
 0x733   :  { %v4685_v11 = vpop.f32.mrf.mxu1 }
 0x734   :  { %v4694_v12 = vpack.c.bf16 %v4690_v6, %v4690_v6 }
 0x736   :  { %5030 = vmatprep.mubr.bf16.mxu1 %v4694_v12 }
 0x737   :  { %5031 = vmatmul.mubr.bf16.vlgmr.msra.gmra.mxu1 %v4693_v60 }
 0x777   :  { %v5701_v13 = vpop.f32.mrf.mxu0 }
 0x779   :  { %v5702_v17 = vpop.f32.mrf.mxu0 }
 0x77a   :  { %v5703_v14 = vadd.f32 %v5702_v17, %v5701_v13 }
 0x77b   :  { %v5704_v16 = vpop.f32.mrf.mxu0 }
 0x77c   :  { %v4993_v38 = vadd.f32 %v5703_v14, %v5623_v8 }
 0x77d   :  { %v5705_v44 = vpop.f32.mrf.mxu0 }
 0x7f7   :  { %v5723_v61 = vpop.f32.mrf.mxu1 }
 0x7f9   :  { %v5724_v9 = vpop.f32.mrf.mxu1 }
 0x7fa   :  { %v5725_v18 = vadd.f32 %v5724_v9, %v5723_v61 }
 0x7fb   :  { %v5726_v3 = vpop.f32.mrf.mxu1 }
 0x7fc   :  { %v5033_v19 = vadd.f32 %v5725_v18, %v4993_v38 }
 0x7fd   :  { %v5727_v15 = vpop.f32.mrf.mxu1 }
 0x7fe   :  { %5039 = vst.msk [vmem:[%s7004_s17] sm:$0xff] %vm5038_vm2, %v5033_v19 }
 0x7ff   :  { %5044 = vsyncpa [#allocation4], 1 }
 0x800   :  { %5045 = vsyncpa [#allocation6], 1 }
 0x801   :  { %5046 = vsyncpa [#allocation9], 1 }
 0x802   :  { %5047 = vsyncpa [#allocation12], 1 }
 0x803   :  { %5048 = vsyncpa [#allocation15], 1 }

</bundles_post_ra>
